<compile_context>
chip_gen: v7x
topology: tpu7x:2x2x1
jax: 0.10.0
libtpu: 0.0.40
codegen_flags: <defaults>
</compile_context>

<pallas_src>
import functools

import jax
import jax.numpy as jnp
from jax.experimental import pallas as pl
from jax.experimental.pallas import tpu as pltpu

# ----------------------- hyper-parameters (small, CRNN-consistent) -----------------------
NUM_SPEAKERS = 10
INPUT_DIM = 16       # mel dim  (PyTorch default 40)
SEGMENT_LEN = 16     # frames   (PyTorch default 128)
HIDDEN_DIM = 32      # LSTM hidden (PyTorch default 128)
RNN_LAYERS = 2
BATCH = 2
BN_EPS = 1e-5
LN_EPS = 1e-5

VMEM_SPEC = pl.BlockSpec(memory_space=pltpu.MemorySpace.VMEM)
F32 = jnp.float32


# ------------------------------------ Pallas kernels -------------------------------------
def conv_bn_relu_se_kernel(p_ref, w_ref, scale_ref, shift_ref,
                           sw1_ref, sb1_ref, sw2_ref, sb2_ref, o_ref, *, batch):
    """Conv (as im2col matmul) + folded BN scale/shift + ReLU, fused with the following
    Squeeze-Excitation (global mean -> FC -> ReLU -> FC -> sigmoid -> channel scale).

    p_ref : (B*H*W, 9*Cin) patches, rows ordered (b, h, w)  -> image b owns a contiguous,
            8-aligned block of rows, so the SE squeeze is a plain sublane reduction.
    w_ref : (9*Cin, Cout)   scale/shift : (1, Cout)
    o_ref : (B*H*W, Cout) excited activations (max-pool happens in the XLA wrapper).
    """
    c = jnp.dot(p_ref[...], w_ref[...], preferred_element_type=F32)
    c = jnp.maximum(c * scale_ref[...] + shift_ref[...], 0.0)             # (N, Cout)
    rows = c.shape[0] // batch
    sw1 = sw1_ref[...]
    sb1 = sb1_ref[...]
    sw2 = sw2_ref[...]
    sb2 = sb2_ref[...]
    for b in range(batch):                                                # static unroll (B=2)
        cb = c[b * rows:(b + 1) * rows, :]
        y = jnp.mean(cb, axis=0, keepdims=True)                           # (1, Cout) squeeze
        y = jnp.maximum(jnp.dot(y, sw1, preferred_element_type=F32) + sb1, 0.0)
        y = jax.nn.sigmoid(jnp.dot(y, sw2, preferred_element_type=F32) + sb2)
        o_ref[b * rows:(b + 1) * rows, :] = (cb * y).astype(o_ref.dtype)  # excitation


def rnn_head_kernel(x_ref,
                    wih1_ref, whh1f_ref, whh1b_ref, b1_ref,
                    wih2f_ref, wih2b_ref, whh2f_ref, whh2b_ref, b2_ref,
                    lngf_ref, lngb_ref, lnbf_ref, lnbb_ref,
                    waf_ref, wab_ref, ab_ref,
                    w1f_ref, w1b_ref, fb1_ref, w2_ref, fb2_ref,
                    o_ref, *, t_steps, batch):
    """Bidirectional 2-layer LSTM + LayerNorm + attention pooling + MLP head.

    x_ref    : (T'*B, D) sequence, rows ordered (t, b) -- pre-flattened in the wrapper so
               the whole layer-1 input projection is ONE matmul instead of T tiny ones.
    wih1_ref : (D, 8H)  forward gates (i,f,g,o) in cols [0,4H), backward in [4H,8H).
    whh*_ref : (H, 4H) recurrent weights per direction; b*_ref: (1, 8H) combined biases.
    wih2f/b  : rows of layer-2 W_ih that multiply the fwd / bwd half of layer-1's output.
    Head weights are pre-split into fwd/bwd halves in the wrapper so no in-kernel
    concatenation is needed; gate order is PyTorch's (i, f, g, o).
    """
    T, B = t_steps, batch
    H = whh1f_ref.shape[0]
    G = 4 * H

    b1 = b1_ref[...]
    wih2f = wih2f_ref[...]
    wih2b = wih2b_ref[...]
    b2 = b2_ref[...]
    whh1f = whh1f_ref[...]
    whh1b = whh1b_ref[...]
    whh2f = whh2f_ref[...]
    whh2b = whh2b_ref[...]

    def cell(gx, h, c, whh):
        g = gx + jnp.dot(h, whh, preferred_element_type=F32)              # (B, 4H)
        i = jax.nn.sigmoid(g[:, 0 * H:1 * H])
        f = jax.nn.sigmoid(g[:, 1 * H:2 * H])
        gg = jnp.tanh(g[:, 2 * H:3 * H])
        o = jax.nn.sigmoid(g[:, 3 * H:4 * H])
        c = f * c + i * gg
        h = o * jnp.tanh(c)
        return h, c

    def bilstm(gx_all, whh_f, whh_b):
        """gx_all[t]: (B, 8H) hoisted input projections; fwd and bwd recurrences run
        interleaved in one fully-unrolled loop (bwd reads time T-1-s)."""
        zero = jnp.zeros((B, H), F32)
        hf = cf = hb = cb = zero
        outf = [None] * T
        outb = [None] * T
        for s in range(T):                                                # static unroll
            hf, cf = cell(gx_all[s][:, :G], hf, cf, whh_f)
            outf[s] = hf
            tb = T - 1 - s
            hb, cb = cell(gx_all[tb][:, G:], hb, cb, whh_b)
            outb[tb] = hb
        return outf, outb

    # ---- layer 1: input projection hoisted out of the recurrence as ONE matmul ----------
    gx1_all = jnp.dot(x_ref[...], wih1_ref[...], preferred_element_type=F32) + b1  # (T*B, 8H)
    gx1 = [gx1_all[t * B:(t + 1) * B, :] for t in range(T)]
    h1f, h1b = bilstm(gx1, whh1f, whh1b)

    # ---- layer 2 (input = concat(fwd, bwd) handled by split W_ih rows, no concat) --------
    gx2 = [jnp.dot(h1f[t], wih2f, preferred_element_type=F32)
           + jnp.dot(h1b[t], wih2b, preferred_element_type=F32) + b2 for t in range(T)]
    h2f, h2b = bilstm(gx2, whh2f, whh2b)

    # ---- LayerNorm + attention softmax pooling over time (fwd/bwd halves kept apart) -----
    lngf = lngf_ref[...]
    lngb = lngb_ref[...]
    lnbf = lnbf_ref[...]
    lnbb = lnbb_ref[...]
    waf = waf_ref[...]
    wab = wab_ref[...]
    ab = ab_ref[...]
    inv_d = 1.0 / (2 * H)
    nf = [None] * T
    nb = [None] * T
    logit = [None] * T
    for t in range(T):
        of, ob = h2f[t], h2b[t]
        mu = (jnp.sum(of, axis=-1, keepdims=True)
              + jnp.sum(ob, axis=-1, keepdims=True)) * inv_d
        df = of - mu
        db = ob - mu
        var = (jnp.sum(df * df, axis=-1, keepdims=True)
               + jnp.sum(db * db, axis=-1, keepdims=True)) * inv_d
        r = jax.lax.rsqrt(var + LN_EPS)
        nf[t] = df * r * lngf + lnbf
        nb[t] = db * r * lngb + lnbb
        logit[t] = (jnp.sum(nf[t] * waf, axis=-1, keepdims=True)
                    + jnp.sum(nb[t] * wab, axis=-1, keepdims=True) + ab)  # (B, 1)

    m = logit[0]
    for t in range(1, T):
        m = jnp.maximum(m, logit[t])
    es = [jnp.exp(l - m) for l in logit]
    z = es[0]
    for t in range(1, T):
        z = z + es[t]
    inv_z = 1.0 / z
    pf = jnp.zeros((B, H), F32)
    pb = jnp.zeros((B, H), F32)
    for t in range(T):
        a = es[t] * inv_z
        pf = pf + a * nf[t]
        pb = pb + a * nb[t]

    # ---- classifier MLP (Dropout = identity in eval) --------------------------------------
    h = jnp.maximum(jnp.dot(pf, w1f_ref[...], preferred_element_type=F32)
                    + jnp.dot(pb, w1b_ref[...], preferred_element_type=F32)
                    + fb1_ref[...], 0.0)
    out = jnp.dot(h, w2_ref[...], preferred_element_type=F32) + fb2_ref[...]
    o_ref[...] = out.astype(o_ref.dtype)


# --------------------------------- pallas_call wrappers ----------------------------------
def conv_bn_relu_se(patches, w, scale, shift, sw1, sb1, sw2, sb2, *, batch):
    return pl.pallas_call(
        functools.partial(conv_bn_relu_se_kernel, batch=batch),
        out_shape=jax.ShapeDtypeStruct((patches.shape[0], w.shape[1]), F32),
        in_specs=[VMEM_SPEC] * 8,
        out_specs=VMEM_SPEC,
    )(patches, w, scale, shift, sw1, sb1, sw2, sb2)


def rnn_head(x_flat, weights, *, t_steps, batch):
    num_out = weights[-1].shape[1]
    args = (x_flat,) + tuple(weights)
    return pl.pallas_call(
        functools.partial(rnn_head_kernel, t_steps=t_steps, batch=batch),
        out_shape=jax.ShapeDtypeStruct((batch, num_out), F32),
        in_specs=[VMEM_SPEC] * len(args),
        out_specs=VMEM_SPEC,
    )(*args)


# ------------------------------------- JAX glue -------------------------------------------
def im2col(x):
    """x: (B, H, W, C) -> patches (B*H*W, 9*C); column = (dy*3+dx)*C + c (matches weights)."""
    B, H, W, C = x.shape
    xp = jnp.pad(x, ((0, 0), (1, 1), (1, 1), (0, 0)))
    cols = [xp[:, dy:dy + H, dx:dx + W, :] for dy in range(3) for dx in range(3)]
    return jnp.concatenate(cols, axis=-1).reshape(B * H * W, 9 * C)


def maxpool2x2(x):
    """MaxPool2d(2,2) on channels-last (B, H, W, C)."""
    B, H, W, C = x.shape
    x = jnp.max(x.reshape(B, H // 2, 2, W, C), axis=2)
    x = jnp.max(x.reshape(B, H // 2, W // 2, 2, C), axis=3)
    return x


def crnn_forward(params, x):
    """x: (B, T, F) float32 — same as the PyTorch forward input (before unsqueeze(1))."""
    B, T, Fd = x.shape
    H = HIDDEN_DIM

    # ---- CNN stage 1: Conv(1->32)+BN+ReLU+SE (kernel 1), MaxPool 2x2 (XLA glue) ----
    e1 = conv_bn_relu_se(im2col(x[:, :, :, None]),
                         params['conv1_w'], params['bn1_scale'], params['bn1_shift'],
                         params['se1_w1'], params['se1_b1'],
                         params['se1_w2'], params['se1_b2'], batch=B)      # (B*T*F, 32)
    s1 = maxpool2x2(e1.reshape(B, T, Fd, 32))                              # (B, T/2, F/2, 32)

    # ---- CNN stage 2: Conv(32->64)+BN+ReLU+SE (kernel 2), MaxPool 2x2 ----
    e2 = conv_bn_relu_se(im2col(s1),
                         params['conv2_w'], params['bn2_scale'], params['bn2_shift'],
                         params['se2_w1'], params['se2_b1'],
                         params['se2_w2'], params['se2_b2'], batch=B)      # (B*T/2*F/2, 64)
    s2 = maxpool2x2(e2.reshape(B, T // 2, Fd // 2, 64))                    # (B, T/4, F/4, 64)

    # ---- sequence: torch permute(0,2,1,3).view -> feature index = c*F' + f ----
    tq, fq = T // 4, Fd // 4
    seq = s2.transpose(0, 1, 3, 2).reshape(B, tq, 64 * fq)                 # (B, T', D)
    x_flat = seq.transpose(1, 0, 2).reshape(tq * B, 64 * fq)               # (T'*B, D), (t,b) order

    # ---- pack LSTM / head weights into the fused-kernel layout (tiny XLA ops) ----
    l1, l2 = params['lstm']
    wih1 = jnp.concatenate([l1['wih_f'], l1['wih_b']], axis=1)             # (D, 8H)
    b1 = jnp.concatenate([l1['b_f'], l1['b_b']], axis=1)                   # (1, 8H)
    wih2 = jnp.concatenate([l2['wih_f'], l2['wih_b']], axis=1)             # (2H, 8H)
    b2 = jnp.concatenate([l2['b_f'], l2['b_b']], axis=1)
    weights = (
        wih1, l1['whh_f'], l1['whh_b'], b1,
        wih2[:H], wih2[H:], l2['whh_f'], l2['whh_b'], b2,
        params['ln_g'][:, :H], params['ln_g'][:, H:],
        params['ln_b'][:, :H], params['ln_b'][:, H:],
        params['attn_w'][:, :H], params['attn_w'][:, H:], params['attn_b'],
        params['fc1_w'][:H], params['fc1_w'][H:], params['fc1_b'],
        params['fc2_w'], params['fc2_b'],
    )
    return rnn_head(x_flat, weights, t_steps=tq, batch=B)                  # (B, num_speakers)


# --------------------------------- deterministic init -------------------------------------
def init_params(key):
    def normal(k, shape, scale=0.1):
        return scale * jax.random.normal(k, shape, F32)

    keys = iter(jax.random.split(key, 40))
    p = {}
    bn_scale = 1.0 / jnp.sqrt(1.0 + BN_EPS)      # eval BN: mean=0, var=1, gamma=1, beta=0

    # conv1: 1 -> 32, 3x3, padding 1 (weights stored as (9*Cin, Cout) for im2col matmul)
    conv1_w = normal(next(keys), (3, 3, 1, 32))
    conv1_b = normal(next(keys), (32,), 0.05)
    p['conv1_w'] = conv1_w.reshape(9 * 1, 32)
    p['bn1_scale'] = jnp.full((1, 32), bn_scale, F32)
    p['bn1_shift'] = (conv1_b * bn_scale).reshape(1, 32)
    # SE1: 32 -> 2 -> 32  (reduction=16)
    p['se1_w1'] = normal(next(keys), (32, 2)); p['se1_b1'] = normal(next(keys), (1, 2), 0.05)
    p['se1_w2'] = normal(next(keys), (2, 32)); p['se1_b2'] = normal(next(keys), (1, 32), 0.05)

    # conv2: 32 -> 64
    conv2_w = normal(next(keys), (3, 3, 32, 64))
    conv2_b = normal(next(keys), (64,), 0.05)
    p['conv2_w'] = conv2_w.reshape(9 * 32, 64)
    p['bn2_scale'] = jnp.full((1, 64), bn_scale, F32)
    p['bn2_shift'] = (conv2_b * bn_scale).reshape(1, 64)
    # SE2: 64 -> 4 -> 64
    p['se2_w1'] = normal(next(keys), (64, 4)); p['se2_b1'] = normal(next(keys), (1, 4), 0.05)
    p['se2_w2'] = normal(next(keys), (4, 64)); p['se2_b2'] = normal(next(keys), (1, 64), 0.05)

    # LSTM: 2 layers, bidirectional; gate order i,f,g,o; bias = b_ih + b_hh (combined)
    p['lstm'] = []
    din = (INPUT_DIM // 4) * 64
    for _ in range(RNN_LAYERS):
        layer = {}
        for d in ('f', 'b'):
            layer['wih_' + d] = normal(next(keys), (din, 4 * HIDDEN_DIM))
            layer['whh_' + d] = normal(next(keys), (HIDDEN_DIM, 4 * HIDDEN_DIM))
            layer['b_' + d] = normal(next(keys), (1, 4 * HIDDEN_DIM), 0.05)
        p['lstm'].append(layer)
        din = 2 * HIDDEN_DIM

    # LayerNorm (PyTorch default affine init: weight=1, bias=0)
    p['ln_g'] = jnp.ones((1, 2 * HIDDEN_DIM), F32)
    p['ln_b'] = jnp.zeros((1, 2 * HIDDEN_DIM), F32)
    # attention Linear(2H, 1)
    p['attn_w'] = normal(next(keys), (1, 2 * HIDDEN_DIM))
    p['attn_b'] = normal(next(keys), (1, 1), 0.05)
    # classifier: Linear(2H, 256) -> ReLU -> Linear(256, num_speakers)
    p['fc1_w'] = normal(next(keys), (2 * HIDDEN_DIM, 256))
    p['fc1_b'] = normal(next(keys), (1, 256), 0.05)
    p['fc2_w'] = normal(next(keys), (256, NUM_SPEAKERS))
    p['fc2_b'] = normal(next(keys), (1, NUM_SPEAKERS), 0.05)
    return p


if __name__ == "__main__":
    key = jax.random.PRNGKey(0)
    pkey, xkey = jax.random.split(key)
    params = init_params(pkey)
    x = jax.random.normal(xkey, (BATCH, SEGMENT_LEN, INPUT_DIM), jnp.float32)

    fwd = jax.jit(crnn_forward)
    out = jax.block_until_ready(fwd(params, x))
    assert out.shape == (BATCH, NUM_SPEAKERS), out.shape
    assert bool(jnp.all(jnp.isfinite(out)))
    print("KERNEL_OK")
</pallas_src>

<mosaic_0001>
module attributes {stable_mosaic.version = 11 : i64} {
  func.func @conv_bn_relu_se_kernel(%arg0: memref<512x9xf32, #tpu.memory_space<vmem>>, %arg1: memref<9x32xf32, #tpu.memory_space<vmem>>, %arg2: memref<1x32xf32, #tpu.memory_space<vmem>>, %arg3: memref<1x32xf32, #tpu.memory_space<vmem>>, %arg4: memref<32x2xf32, #tpu.memory_space<vmem>>, %arg5: memref<1x2xf32, #tpu.memory_space<vmem>>, %arg6: memref<2x32xf32, #tpu.memory_space<vmem>>, %arg7: memref<1x32xf32, #tpu.memory_space<vmem>>, %arg8: memref<512x32xf32, #tpu.memory_space<vmem>>) attributes {dimension_semantics = [], scalar_prefetch = 0 : i64, scratch_operands = 0 : i64, tpu.core_type = #tpu.core_type<tc>} {
    %c0 = arith.constant 0 : index
    %c0_0 = arith.constant 0 : index
    %0 = vector.load %arg0[%c0, %c0_0] : memref<512x9xf32, #tpu.memory_space<vmem>>, vector<512x9xf32>
    %c0_1 = arith.constant 0 : index
    %c0_2 = arith.constant 0 : index
    %1 = vector.load %arg1[%c0_1, %c0_2] : memref<9x32xf32, #tpu.memory_space<vmem>>, vector<9x32xf32>
    %cst = arith.constant dense<0.000000e+00> : vector<512x32xf32>
    %2 = tpu.matmul %0, %1, %cst {dimension_numbers = #tpu.dot_dimension_numbers<[1], [0], [0], [1], [0, 0, 1, 1], [], []>} : vector<512x9xf32>, vector<9x32xf32>, vector<512x32xf32> -> vector<512x32xf32>
    %c0_3 = arith.constant 0 : index
    %c0_4 = arith.constant 0 : index
    %3 = vector.load %arg2[%c0_3, %c0_4] : memref<1x32xf32, #tpu.memory_space<vmem>>, vector<1x32xf32>
    %4 = vector.broadcast %3 : vector<1x32xf32> to vector<512x32xf32>
    %5 = arith.mulf %2, %4 : vector<512x32xf32>
    %c0_5 = arith.constant 0 : index
    %c0_6 = arith.constant 0 : index
    %6 = vector.load %arg3[%c0_5, %c0_6] : memref<1x32xf32, #tpu.memory_space<vmem>>, vector<1x32xf32>
    %7 = vector.broadcast %6 : vector<1x32xf32> to vector<512x32xf32>
    %8 = arith.addf %5, %7 : vector<512x32xf32>
    %cst_7 = arith.constant 0.000000e+00 : f32
    %9 = vector.broadcast %cst_7 : f32 to vector<512x32xf32>
    %10 = arith.maximumf %8, %9 : vector<512x32xf32>
    %c0_8 = arith.constant 0 : index
    %c0_9 = arith.constant 0 : index
    %11 = vector.load %arg4[%c0_8, %c0_9] : memref<32x2xf32, #tpu.memory_space<vmem>>, vector<32x2xf32>
    %c0_10 = arith.constant 0 : index
    %c0_11 = arith.constant 0 : index
    %12 = vector.load %arg5[%c0_10, %c0_11] : memref<1x2xf32, #tpu.memory_space<vmem>>, vector<1x2xf32>
    %c0_12 = arith.constant 0 : index
    %c0_13 = arith.constant 0 : index
    %13 = vector.load %arg6[%c0_12, %c0_13] : memref<2x32xf32, #tpu.memory_space<vmem>>, vector<2x32xf32>
    %c0_14 = arith.constant 0 : index
    %c0_15 = arith.constant 0 : index
    %14 = vector.load %arg7[%c0_14, %c0_15] : memref<1x32xf32, #tpu.memory_space<vmem>>, vector<1x32xf32>
    %15 = vector.extract_strided_slice %10 {offsets = [0, 0], sizes = [256, 32], strides = [1, 1]} : vector<512x32xf32> to vector<256x32xf32>
    %cst_16 = arith.constant dense<0.000000e+00> : vector<32xf32>
    %16 = vector.multi_reduction <add>, %15, %cst_16 [0] : vector<256x32xf32> to vector<32xf32>
    %17 = vector.shape_cast %16 : vector<32xf32> to vector<1x32xf32>
    %cst_17 = arith.constant 2.560000e+02 : f32
    %18 = vector.broadcast %cst_17 : f32 to vector<1x32xf32>
    %19 = arith.divf %17, %18 : vector<1x32xf32>
    %cst_18 = arith.constant dense<0.000000e+00> : vector<1x2xf32>
    %20 = tpu.matmul %19, %11, %cst_18 {dimension_numbers = #tpu.dot_dimension_numbers<[1], [0], [0], [1], [0, 0, 1, 1], [], []>} : vector<1x32xf32>, vector<32x2xf32>, vector<1x2xf32> -> vector<1x2xf32>
    %21 = arith.addf %20, %12 : vector<1x2xf32>
    %cst_19 = arith.constant 0.000000e+00 : f32
    %22 = vector.broadcast %cst_19 : f32 to vector<1x2xf32>
    %23 = arith.maximumf %21, %22 : vector<1x2xf32>
    %cst_20 = arith.constant dense<0.000000e+00> : vector<1x32xf32>
    %24 = tpu.matmul %23, %13, %cst_20 {dimension_numbers = #tpu.dot_dimension_numbers<[1], [0], [0], [1], [0, 0, 1, 1], [], []>} : vector<1x2xf32>, vector<2x32xf32>, vector<1x32xf32> -> vector<1x32xf32>
    %25 = arith.addf %24, %14 : vector<1x32xf32>
    %26 = arith.negf %25 : vector<1x32xf32>
    %27 = math.exp %26 : vector<1x32xf32>
    %cst_21 = arith.constant 1.000000e+00 : f32
    %28 = vector.broadcast %cst_21 : f32 to vector<1x32xf32>
    %29 = arith.addf %28, %27 : vector<1x32xf32>
    %30 = arith.divf %28, %29 : vector<1x32xf32>
    %31 = vector.broadcast %30 : vector<1x32xf32> to vector<256x32xf32>
    %32 = arith.mulf %15, %31 : vector<256x32xf32>
    %c0_22 = arith.constant 0 : index
    %c0_23 = arith.constant 0 : index
    %33 = vector.load %arg8[%c0_22, %c0_23] : memref<512x32xf32, #tpu.memory_space<vmem>>, vector<256x32xf32>
    tpu.vector_store %arg8[%c0_22, %c0_23], %32 {strides = array<i32>} : memref<512x32xf32, #tpu.memory_space<vmem>>, vector<256x32xf32>,
    %34 = vector.extract_strided_slice %10 {offsets = [256, 0], sizes = [256, 32], strides = [1, 1]} : vector<512x32xf32> to vector<256x32xf32>
    %cst_24 = arith.constant dense<0.000000e+00> : vector<32xf32>
    %35 = vector.multi_reduction <add>, %34, %cst_24 [0] : vector<256x32xf32> to vector<32xf32>
    %36 = vector.shape_cast %35 : vector<32xf32> to vector<1x32xf32>
    %cst_25 = arith.constant 2.560000e+02 : f32
    %37 = vector.broadcast %cst_25 : f32 to vector<1x32xf32>
    %38 = arith.divf %36, %37 : vector<1x32xf32>
    %cst_26 = arith.constant dense<0.000000e+00> : vector<1x2xf32>
    %39 = tpu.matmul %38, %11, %cst_26 {dimension_numbers = #tpu.dot_dimension_numbers<[1], [0], [0], [1], [0, 0, 1, 1], [], []>} : vector<1x32xf32>, vector<32x2xf32>, vector<1x2xf32> -> vector<1x2xf32>
    %40 = arith.addf %39, %12 : vector<1x2xf32>
    %cst_27 = arith.constant 0.000000e+00 : f32
    %41 = vector.broadcast %cst_27 : f32 to vector<1x2xf32>
    %42 = arith.maximumf %40, %41 : vector<1x2xf32>
    %cst_28 = arith.constant dense<0.000000e+00> : vector<1x32xf32>
    %43 = tpu.matmul %42, %13, %cst_28 {dimension_numbers = #tpu.dot_dimension_numbers<[1], [0], [0], [1], [0, 0, 1, 1], [], []>} : vector<1x2xf32>, vector<2x32xf32>, vector<1x32xf32> -> vector<1x32xf32>
    %44 = arith.addf %43, %14 : vector<1x32xf32>
    %45 = arith.negf %44 : vector<1x32xf32>
    %46 = math.exp %45 : vector<1x32xf32>
    %cst_29 = arith.constant 1.000000e+00 : f32
    %47 = vector.broadcast %cst_29 : f32 to vector<1x32xf32>
    %48 = arith.addf %47, %46 : vector<1x32xf32>
    %49 = arith.divf %47, %48 : vector<1x32xf32>
    %50 = vector.broadcast %49 : vector<1x32xf32> to vector<256x32xf32>
    %51 = arith.mulf %34, %50 : vector<256x32xf32>
    %c256 = arith.constant 256 : index
    %c0_30 = arith.constant 0 : index
    %52 = vector.load %arg8[%c256, %c0_30] : memref<512x32xf32, #tpu.memory_space<vmem>>, vector<256x32xf32>
    tpu.vector_store %arg8[%c256, %c0_30], %51 {strides = array<i32>} : memref<512x32xf32, #tpu.memory_space<vmem>>, vector<256x32xf32>,
    return
  }
}

module attributes {stable_mosaic.version = 11 : i64} {
  func.func @conv_bn_relu_se_kernel(%arg0: memref<128x288xf32, #tpu.memory_space<vmem>>, %arg1: memref<288x64xf32, #tpu.memory_space<vmem>>, %arg2: memref<1x64xf32, #tpu.memory_space<vmem>>, %arg3: memref<1x64xf32, #tpu.memory_space<vmem>>, %arg4: memref<64x4xf32, #tpu.memory_space<vmem>>, %arg5: memref<1x4xf32, #tpu.memory_space<vmem>>, %arg6: memref<4x64xf32, #tpu.memory_space<vmem>>, %arg7: memref<1x64xf32, #tpu.memory_space<vmem>>, %arg8: memref<128x64xf32, #tpu.memory_space<vmem>>) attributes {dimension_semantics = [], scalar_prefetch = 0 : i64, scratch_operands = 0 : i64, tpu.core_type = #tpu.core_type<tc>} {
    %c0 = arith.constant 0 : index
    %c0_0 = arith.constant 0 : index
    %0 = vector.load %arg0[%c0, %c0_0] : memref<128x288xf32, #tpu.memory_space<vmem>>, vector<128x288xf32>
    %c0_1 = arith.constant 0 : index
    %c0_2 = arith.constant 0 : index
    %1 = vector.load %arg1[%c0_1, %c0_2] : memref<288x64xf32, #tpu.memory_space<vmem>>, vector<288x64xf32>
    %cst = arith.constant dense<0.000000e+00> : vector<128x64xf32>
    %2 = tpu.matmul %0, %1, %cst {dimension_numbers = #tpu.dot_dimension_numbers<[1], [0], [0], [1], [0, 0, 1, 1], [], []>} : vector<128x288xf32>, vector<288x64xf32>, vector<128x64xf32> -> vector<128x64xf32>
    %c0_3 = arith.constant 0 : index
    %c0_4 = arith.constant 0 : index
    %3 = vector.load %arg2[%c0_3, %c0_4] : memref<1x64xf32, #tpu.memory_space<vmem>>, vector<1x64xf32>
    %4 = vector.broadcast %3 : vector<1x64xf32> to vector<128x64xf32>
    %5 = arith.mulf %2, %4 : vector<128x64xf32>
    %c0_5 = arith.constant 0 : index
    %c0_6 = arith.constant 0 : index
    %6 = vector.load %arg3[%c0_5, %c0_6] : memref<1x64xf32, #tpu.memory_space<vmem>>, vector<1x64xf32>
    %7 = vector.broadcast %6 : vector<1x64xf32> to vector<128x64xf32>
    %8 = arith.addf %5, %7 : vector<128x64xf32>
    %cst_7 = arith.constant 0.000000e+00 : f32
    %9 = vector.broadcast %cst_7 : f32 to vector<128x64xf32>
    %10 = arith.maximumf %8, %9 : vector<128x64xf32>
    %c0_8 = arith.constant 0 : index
    %c0_9 = arith.constant 0 : index
    %11 = vector.load %arg4[%c0_8, %c0_9] : memref<64x4xf32, #tpu.memory_space<vmem>>, vector<64x4xf32>
    %c0_10 = arith.constant 0 : index
    %c0_11 = arith.constant 0 : index
    %12 = vector.load %arg5[%c0_10, %c0_11] : memref<1x4xf32, #tpu.memory_space<vmem>>, vector<1x4xf32>
    %c0_12 = arith.constant 0 : index
    %c0_13 = arith.constant 0 : index
    %13 = vector.load %arg6[%c0_12, %c0_13] : memref<4x64xf32, #tpu.memory_space<vmem>>, vector<4x64xf32>
    %c0_14 = arith.constant 0 : index
    %c0_15 = arith.constant 0 : index
    %14 = vector.load %arg7[%c0_14, %c0_15] : memref<1x64xf32, #tpu.memory_space<vmem>>, vector<1x64xf32>
    %15 = vector.extract_strided_slice %10 {offsets = [0, 0], sizes = [64, 64], strides = [1, 1]} : vector<128x64xf32> to vector<64x64xf32>
    %cst_16 = arith.constant dense<0.000000e+00> : vector<64xf32>
    %16 = vector.multi_reduction <add>, %15, %cst_16 [0] : vector<64x64xf32> to vector<64xf32>
    %17 = vector.shape_cast %16 : vector<64xf32> to vector<1x64xf32>
    %cst_17 = arith.constant 6.400000e+01 : f32
    %18 = vector.broadcast %cst_17 : f32 to vector<1x64xf32>
    %19 = arith.divf %17, %18 : vector<1x64xf32>
    %cst_18 = arith.constant dense<0.000000e+00> : vector<1x4xf32>
    %20 = tpu.matmul %19, %11, %cst_18 {dimension_numbers = #tpu.dot_dimension_numbers<[1], [0], [0], [1], [0, 0, 1, 1], [], []>} : vector<1x64xf32>, vector<64x4xf32>, vector<1x4xf32> -> vector<1x4xf32>
    %21 = arith.addf %20, %12 : vector<1x4xf32>
    %cst_19 = arith.constant 0.000000e+00 : f32
    %22 = vector.broadcast %cst_19 : f32 to vector<1x4xf32>
    %23 = arith.maximumf %21, %22 : vector<1x4xf32>
    %cst_20 = arith.constant dense<0.000000e+00> : vector<1x64xf32>
    %24 = tpu.matmul %23, %13, %cst_20 {dimension_numbers = #tpu.dot_dimension_numbers<[1], [0], [0], [1], [0, 0, 1, 1], [], []>} : vector<1x4xf32>, vector<4x64xf32>, vector<1x64xf32> -> vector<1x64xf32>
    %25 = arith.addf %24, %14 : vector<1x64xf32>
    %26 = arith.negf %25 : vector<1x64xf32>
    %27 = math.exp %26 : vector<1x64xf32>
    %cst_21 = arith.constant 1.000000e+00 : f32
    %28 = vector.broadcast %cst_21 : f32 to vector<1x64xf32>
    %29 = arith.addf %28, %27 : vector<1x64xf32>
    %30 = arith.divf %28, %29 : vector<1x64xf32>
    %31 = vector.broadcast %30 : vector<1x64xf32> to vector<64x64xf32>
    %32 = arith.mulf %15, %31 : vector<64x64xf32>
    %c0_22 = arith.constant 0 : index
    %c0_23 = arith.constant 0 : index
    %33 = vector.load %arg8[%c0_22, %c0_23] : memref<128x64xf32, #tpu.memory_space<vmem>>, vector<64x64xf32>
    tpu.vector_store %arg8[%c0_22, %c0_23], %32 {strides = array<i32>} : memref<128x64xf32, #tpu.memory_space<vmem>>, vector<64x64xf32>,
    %34 = vector.extract_strided_slice %10 {offsets = [64, 0], sizes = [64, 64], strides = [1, 1]} : vector<128x64xf32> to vector<64x64xf32>
    %cst_24 = arith.constant dense<0.000000e+00> : vector<64xf32>
    %35 = vector.multi_reduction <add>, %34, %cst_24 [0] : vector<64x64xf32> to vector<64xf32>
    %36 = vector.shape_cast %35 : vector<64xf32> to vector<1x64xf32>
    %cst_25 = arith.constant 6.400000e+01 : f32
    %37 = vector.broadcast %cst_25 : f32 to vector<1x64xf32>
    %38 = arith.divf %36, %37 : vector<1x64xf32>
    %cst_26 = arith.constant dense<0.000000e+00> : vector<1x4xf32>
    %39 = tpu.matmul %38, %11, %cst_26 {dimension_numbers = #tpu.dot_dimension_numbers<[1], [0], [0], [1], [0, 0, 1, 1], [], []>} : vector<1x64xf32>, vector<64x4xf32>, vector<1x4xf32> -> vector<1x4xf32>
    %40 = arith.addf %39, %12 : vector<1x4xf32>
    %cst_27 = arith.constant 0.000000e+00 : f32
    %41 = vector.broadcast %cst_27 : f32 to vector<1x4xf32>
    %42 = arith.maximumf %40, %41 : vector<1x4xf32>
    %cst_28 = arith.constant dense<0.000000e+00> : vector<1x64xf32>
    %43 = tpu.matmul %42, %13, %cst_28 {dimension_numbers = #tpu.dot_dimension_numbers<[1], [0], [0], [1], [0, 0, 1, 1], [], []>} : vector<1x4xf32>, vector<4x64xf32>, vector<1x64xf32> -> vector<1x64xf32>
    %44 = arith.addf %43, %14 : vector<1x64xf32>
    %45 = arith.negf %44 : vector<1x64xf32>
    %46 = math.exp %45 : vector<1x64xf32>
    %cst_29 = arith.constant 1.000000e+00 : f32
    %47 = vector.broadcast %cst_29 : f32 to vector<1x64xf32>
    %48 = arith.addf %47, %46 : vector<1x64xf32>
    %49 = arith.divf %47, %48 : vector<1x64xf32>
    %50 = vector.broadcast %49 : vector<1x64xf32> to vector<64x64xf32>
    %51 = arith.mulf %34, %50 : vector<64x64xf32>
    %c64 = arith.constant 64 : index
    %c0_30 = arith.constant 0 : index
    %52 = vector.load %arg8[%c64, %c0_30] : memref<128x64xf32, #tpu.memory_space<vmem>>, vector<64x64xf32>
    tpu.vector_store %arg8[%c64, %c0_30], %51 {strides = array<i32>} : memref<128x64xf32, #tpu.memory_space<vmem>>, vector<64x64xf32>,
    return
  }
}

module attributes {stable_mosaic.version = 11 : i64} {
  func.func @rnn_head_kernel(%arg0: memref<8x256xf32, #tpu.memory_space<vmem>>, %arg1: memref<256x256xf32, #tpu.memory_space<vmem>>, %arg2: memref<32x128xf32, #tpu.memory_space<vmem>>, %arg3: memref<32x128xf32, #tpu.memory_space<vmem>>, %arg4: memref<1x256xf32, #tpu.memory_space<vmem>>, %arg5: memref<32x256xf32, #tpu.memory_space<vmem>>, %arg6: memref<32x256xf32, #tpu.memory_space<vmem>>, %arg7: memref<32x128xf32, #tpu.memory_space<vmem>>, %arg8: memref<32x128xf32, #tpu.memory_space<vmem>>, %arg9: memref<1x256xf32, #tpu.memory_space<vmem>>, %arg10: memref<1x32xf32, #tpu.memory_space<vmem>>, %arg11: memref<1x32xf32, #tpu.memory_space<vmem>>, %arg12: memref<1x32xf32, #tpu.memory_space<vmem>>, %arg13: memref<1x32xf32, #tpu.memory_space<vmem>>, %arg14: memref<1x32xf32, #tpu.memory_space<vmem>>, %arg15: memref<1x32xf32, #tpu.memory_space<vmem>>, %arg16: memref<1x1xf32, #tpu.memory_space<vmem>>, %arg17: memref<32x256xf32, #tpu.memory_space<vmem>>, %arg18: memref<32x256xf32, #tpu.memory_space<vmem>>, %arg19: memref<1x256xf32, #tpu.memory_space<vmem>>, %arg20: memref<256x10xf32, #tpu.memory_space<vmem>>, %arg21: memref<1x10xf32, #tpu.memory_space<vmem>>, %arg22: memref<2x10xf32, #tpu.memory_space<vmem>>) attributes {dimension_semantics = [], scalar_prefetch = 0 : i64, scratch_operands = 0 : i64, tpu.core_type = #tpu.core_type<tc>} {
    %c0 = arith.constant 0 : index
    %c0_0 = arith.constant 0 : index
    %0 = vector.load %arg4[%c0, %c0_0] : memref<1x256xf32, #tpu.memory_space<vmem>>, vector<1x256xf32>
    %c0_1 = arith.constant 0 : index
    %c0_2 = arith.constant 0 : index
    %1 = vector.load %arg5[%c0_1, %c0_2] : memref<32x256xf32, #tpu.memory_space<vmem>>, vector<32x256xf32>
    %c0_3 = arith.constant 0 : index
    %c0_4 = arith.constant 0 : index
    %2 = vector.load %arg6[%c0_3, %c0_4] : memref<32x256xf32, #tpu.memory_space<vmem>>, vector<32x256xf32>
    %c0_5 = arith.constant 0 : index
    %c0_6 = arith.constant 0 : index
    %3 = vector.load %arg9[%c0_5, %c0_6] : memref<1x256xf32, #tpu.memory_space<vmem>>, vector<1x256xf32>
    %c0_7 = arith.constant 0 : index
    %c0_8 = arith.constant 0 : index
    %4 = vector.load %arg2[%c0_7, %c0_8] : memref<32x128xf32, #tpu.memory_space<vmem>>, vector<32x128xf32>
    %c0_9 = arith.constant 0 : index
    %c0_10 = arith.constant 0 : index
    %5 = vector.load %arg3[%c0_9, %c0_10] : memref<32x128xf32, #tpu.memory_space<vmem>>, vector<32x128xf32>
    %c0_11 = arith.constant 0 : index
    %c0_12 = arith.constant 0 : index
    %6 = vector.load %arg7[%c0_11, %c0_12] : memref<32x128xf32, #tpu.memory_space<vmem>>, vector<32x128xf32>
    %c0_13 = arith.constant 0 : index
    %c0_14 = arith.constant 0 : index
    %7 = vector.load %arg8[%c0_13, %c0_14] : memref<32x128xf32, #tpu.memory_space<vmem>>, vector<32x128xf32>
    %c0_15 = arith.constant 0 : index
    %c0_16 = arith.constant 0 : index
    %8 = vector.load %arg0[%c0_15, %c0_16] : memref<8x256xf32, #tpu.memory_space<vmem>>, vector<8x256xf32>
    %c0_17 = arith.constant 0 : index
    %c0_18 = arith.constant 0 : index
    %9 = vector.load %arg1[%c0_17, %c0_18] : memref<256x256xf32, #tpu.memory_space<vmem>>, vector<256x256xf32>
    %cst = arith.constant dense<0.000000e+00> : vector<8x256xf32>
    %10 = tpu.matmul %8, %9, %cst {dimension_numbers = #tpu.dot_dimension_numbers<[1], [0], [0], [1], [0, 0, 1, 1], [], []>} : vector<8x256xf32>, vector<256x256xf32>, vector<8x256xf32> -> vector<8x256xf32>
    %11 = vector.broadcast %0 : vector<1x256xf32> to vector<8x256xf32>
    %12 = arith.addf %10, %11 : vector<8x256xf32>
    %13 = vector.extract_strided_slice %12 {offsets = [0, 0], sizes = [2, 256], strides = [1, 1]} : vector<8x256xf32> to vector<2x256xf32>
    %14 = vector.extract_strided_slice %12 {offsets = [2, 0], sizes = [2, 256], strides = [1, 1]} : vector<8x256xf32> to vector<2x256xf32>
    %15 = vector.extract_strided_slice %12 {offsets = [4, 0], sizes = [2, 256], strides = [1, 1]} : vector<8x256xf32> to vector<2x256xf32>
    %16 = vector.extract_strided_slice %12 {offsets = [6, 0], sizes = [2, 256], strides = [1, 1]} : vector<8x256xf32> to vector<2x256xf32>
    %cst_19 = arith.constant 0.000000e+00 : f32
    %17 = vector.broadcast %cst_19 : f32 to vector<2x32xf32>
    %18 = vector.extract_strided_slice %13 {offsets = [0, 0], sizes = [2, 128], strides = [1, 1]} : vector<2x256xf32> to vector<2x128xf32>
    %cst_20 = arith.constant dense<0.000000e+00> : vector<2x128xf32>
    %19 = tpu.matmul %17, %4, %cst_20 {dimension_numbers = #tpu.dot_dimension_numbers<[1], [0], [0], [1], [0, 0, 1, 1], [], []>} : vector<2x32xf32>, vector<32x128xf32>, vector<2x128xf32> -> vector<2x128xf32>
    %20 = arith.addf %18, %19 : vector<2x128xf32>
    %21 = vector.extract_strided_slice %20 {offsets = [0, 0], sizes = [2, 32], strides = [1, 1]} : vector<2x128xf32> to vector<2x32xf32>
    %22 = arith.negf %21 : vector<2x32xf32>
    %23 = math.exp %22 : vector<2x32xf32>
    %cst_21 = arith.constant 1.000000e+00 : f32
    %24 = vector.broadcast %cst_21 : f32 to vector<2x32xf32>
    %25 = arith.addf %24, %23 : vector<2x32xf32>
    %26 = arith.divf %24, %25 : vector<2x32xf32>
    %27 = vector.extract_strided_slice %20 {offsets = [0, 32], sizes = [2, 32], strides = [1, 1]} : vector<2x128xf32> to vector<2x32xf32>
    %28 = arith.negf %27 : vector<2x32xf32>
    %29 = math.exp %28 : vector<2x32xf32>
    %cst_22 = arith.constant 1.000000e+00 : f32
    %30 = vector.broadcast %cst_22 : f32 to vector<2x32xf32>
    %31 = arith.addf %30, %29 : vector<2x32xf32>
    %32 = arith.divf %30, %31 : vector<2x32xf32>
    %33 = vector.extract_strided_slice %20 {offsets = [0, 64], sizes = [2, 32], strides = [1, 1]} : vector<2x128xf32> to vector<2x32xf32>
    %34 = math.tanh %33 : vector<2x32xf32>
    %35 = vector.extract_strided_slice %20 {offsets = [0, 96], sizes = [2, 32], strides = [1, 1]} : vector<2x128xf32> to vector<2x32xf32>
    %36 = arith.negf %35 : vector<2x32xf32>
    %37 = math.exp %36 : vector<2x32xf32>
    %cst_23 = arith.constant 1.000000e+00 : f32
    %38 = vector.broadcast %cst_23 : f32 to vector<2x32xf32>
    %39 = arith.addf %38, %37 : vector<2x32xf32>
    %40 = arith.divf %38, %39 : vector<2x32xf32>
    %41 = arith.mulf %32, %17 : vector<2x32xf32>
    %42 = arith.mulf %26, %34 : vector<2x32xf32>
    %43 = arith.addf %41, %42 : vector<2x32xf32>
    %44 = math.tanh %43 : vector<2x32xf32>
    %45 = arith.mulf %40, %44 : vector<2x32xf32>
    %46 = vector.extract_strided_slice %16 {offsets = [0, 128], sizes = [2, 128], strides = [1, 1]} : vector<2x256xf32> to vector<2x128xf32>
    %cst_24 = arith.constant dense<0.000000e+00> : vector<2x128xf32>
    %47 = tpu.matmul %17, %5, %cst_24 {dimension_numbers = #tpu.dot_dimension_numbers<[1], [0], [0], [1], [0, 0, 1, 1], [], []>} : vector<2x32xf32>, vector<32x128xf32>, vector<2x128xf32> -> vector<2x128xf32>
    %48 = arith.addf %46, %47 : vector<2x128xf32>
    %49 = vector.extract_strided_slice %48 {offsets = [0, 0], sizes = [2, 32], strides = [1, 1]} : vector<2x128xf32> to vector<2x32xf32>
    %50 = arith.negf %49 : vector<2x32xf32>
    %51 = math.exp %50 : vector<2x32xf32>
    %cst_25 = arith.constant 1.000000e+00 : f32
    %52 = vector.broadcast %cst_25 : f32 to vector<2x32xf32>
    %53 = arith.addf %52, %51 : vector<2x32xf32>
    %54 = arith.divf %52, %53 : vector<2x32xf32>
    %55 = vector.extract_strided_slice %48 {offsets = [0, 32], sizes = [2, 32], strides = [1, 1]} : vector<2x128xf32> to vector<2x32xf32>
    %56 = arith.negf %55 : vector<2x32xf32>
    %57 = math.exp %56 : vector<2x32xf32>
    %cst_26 = arith.constant 1.000000e+00 : f32
    %58 = vector.broadcast %cst_26 : f32 to vector<2x32xf32>
    %59 = arith.addf %58, %57 : vector<2x32xf32>
    %60 = arith.divf %58, %59 : vector<2x32xf32>
    %61 = vector.extract_strided_slice %48 {offsets = [0, 64], sizes = [2, 32], strides = [1, 1]} : vector<2x128xf32> to vector<2x32xf32>
    %62 = math.tanh %61 : vector<2x32xf32>
    %63 = vector.extract_strided_slice %48 {offsets = [0, 96], sizes = [2, 32], strides = [1, 1]} : vector<2x128xf32> to vector<2x32xf32>
    %64 = arith.negf %63 : vector<2x32xf32>
    %65 = math.exp %64 : vector<2x32xf32>
    %cst_27 = arith.constant 1.000000e+00 : f32
    %66 = vector.broadcast %cst_27 : f32 to vector<2x32xf32>
    %67 = arith.addf %66, %65 : vector<2x32xf32>
    %68 = arith.divf %66, %67 : vector<2x32xf32>
    %69 = arith.mulf %60, %17 : vector<2x32xf32>
    %70 = arith.mulf %54, %62 : vector<2x32xf32>
    %71 = arith.addf %69, %70 : vector<2x32xf32>
    %72 = math.tanh %71 : vector<2x32xf32>
    %73 = arith.mulf %68, %72 : vector<2x32xf32>
    %74 = vector.extract_strided_slice %14 {offsets = [0, 0], sizes = [2, 128], strides = [1, 1]} : vector<2x256xf32> to vector<2x128xf32>
    %cst_28 = arith.constant dense<0.000000e+00> : vector<2x128xf32>
    %75 = tpu.matmul %45, %4, %cst_28 {dimension_numbers = #tpu.dot_dimension_numbers<[1], [0], [0], [1], [0, 0, 1, 1], [], []>} : vector<2x32xf32>, vector<32x128xf32>, vector<2x128xf32> -> vector<2x128xf32>
    %76 = arith.addf %74, %75 : vector<2x128xf32>
    %77 = vector.extract_strided_slice %76 {offsets = [0, 0], sizes = [2, 32], strides = [1, 1]} : vector<2x128xf32> to vector<2x32xf32>
    %78 = arith.negf %77 : vector<2x32xf32>
    %79 = math.exp %78 : vector<2x32xf32>
    %cst_29 = arith.constant 1.000000e+00 : f32
    %80 = vector.broadcast %cst_29 : f32 to vector<2x32xf32>
    %81 = arith.addf %80, %79 : vector<2x32xf32>
    %82 = arith.divf %80, %81 : vector<2x32xf32>
    %83 = vector.extract_strided_slice %76 {offsets = [0, 32], sizes = [2, 32], strides = [1, 1]} : vector<2x128xf32> to vector<2x32xf32>
    %84 = arith.negf %83 : vector<2x32xf32>
    %85 = math.exp %84 : vector<2x32xf32>
    %cst_30 = arith.constant 1.000000e+00 : f32
    %86 = vector.broadcast %cst_30 : f32 to vector<2x32xf32>
    %87 = arith.addf %86, %85 : vector<2x32xf32>
    %88 = arith.divf %86, %87 : vector<2x32xf32>
    %89 = vector.extract_strided_slice %76 {offsets = [0, 64], sizes = [2, 32], strides = [1, 1]} : vector<2x128xf32> to vector<2x32xf32>
    %90 = math.tanh %89 : vector<2x32xf32>
    %91 = vector.extract_strided_slice %76 {offsets = [0, 96], sizes = [2, 32], strides = [1, 1]} : vector<2x128xf32> to vector<2x32xf32>
    %92 = arith.negf %91 : vector<2x32xf32>
    %93 = math.exp %92 : vector<2x32xf32>
    %cst_31 = arith.constant 1.000000e+00 : f32
    %94 = vector.broadcast %cst_31 : f32 to vector<2x32xf32>
    %95 = arith.addf %94, %93 : vector<2x32xf32>
    %96 = arith.divf %94, %95 : vector<2x32xf32>
    %97 = arith.mulf %88, %43 : vector<2x32xf32>
    %98 = arith.mulf %82, %90 : vector<2x32xf32>
    %99 = arith.addf %97, %98 : vector<2x32xf32>
    %100 = math.tanh %99 : vector<2x32xf32>
    %101 = arith.mulf %96, %100 : vector<2x32xf32>
    %102 = vector.extract_strided_slice %15 {offsets = [0, 128], sizes = [2, 128], strides = [1, 1]} : vector<2x256xf32> to vector<2x128xf32>
    %cst_32 = arith.constant dense<0.000000e+00> : vector<2x128xf32>
    %103 = tpu.matmul %73, %5, %cst_32 {dimension_numbers = #tpu.dot_dimension_numbers<[1], [0], [0], [1], [0, 0, 1, 1], [], []>} : vector<2x32xf32>, vector<32x128xf32>, vector<2x128xf32> -> vector<2x128xf32>
    %104 = arith.addf %102, %103 : vector<2x128xf32>
    %105 = vector.extract_strided_slice %104 {offsets = [0, 0], sizes = [2, 32], strides = [1, 1]} : vector<2x128xf32> to vector<2x32xf32>
    %106 = arith.negf %105 : vector<2x32xf32>
    %107 = math.exp %106 : vector<2x32xf32>
    %cst_33 = arith.constant 1.000000e+00 : f32
    %108 = vector.broadcast %cst_33 : f32 to vector<2x32xf32>
    %109 = arith.addf %108, %107 : vector<2x32xf32>
    %110 = arith.divf %108, %109 : vector<2x32xf32>
    %111 = vector.extract_strided_slice %104 {offsets = [0, 32], sizes = [2, 32], strides = [1, 1]} : vector<2x128xf32> to vector<2x32xf32>
    %112 = arith.negf %111 : vector<2x32xf32>
    %113 = math.exp %112 : vector<2x32xf32>
    %cst_34 = arith.constant 1.000000e+00 : f32
    %114 = vector.broadcast %cst_34 : f32 to vector<2x32xf32>
    %115 = arith.addf %114, %113 : vector<2x32xf32>
    %116 = arith.divf %114, %115 : vector<2x32xf32>
    %117 = vector.extract_strided_slice %104 {offsets = [0, 64], sizes = [2, 32], strides = [1, 1]} : vector<2x128xf32> to vector<2x32xf32>
    %118 = math.tanh %117 : vector<2x32xf32>
    %119 = vector.extract_strided_slice %104 {offsets = [0, 96], sizes = [2, 32], strides = [1, 1]} : vector<2x128xf32> to vector<2x32xf32>
    %120 = arith.negf %119 : vector<2x32xf32>
    %121 = math.exp %120 : vector<2x32xf32>
    %cst_35 = arith.constant 1.000000e+00 : f32
    %122 = vector.broadcast %cst_35 : f32 to vector<2x32xf32>
    %123 = arith.addf %122, %121 : vector<2x32xf32>
    %124 = arith.divf %122, %123 : vector<2x32xf32>
    %125 = arith.mulf %116, %71 : vector<2x32xf32>
    %126 = arith.mulf %110, %118 : vector<2x32xf32>
    %127 = arith.addf %125, %126 : vector<2x32xf32>
    %128 = math.tanh %127 : vector<2x32xf32>
    %129 = arith.mulf %124, %128 : vector<2x32xf32>
    %130 = vector.extract_strided_slice %15 {offsets = [0, 0], sizes = [2, 128], strides = [1, 1]} : vector<2x256xf32> to vector<2x128xf32>
    %cst_36 = arith.constant dense<0.000000e+00> : vector<2x128xf32>
    %131 = tpu.matmul %101, %4, %cst_36 {dimension_numbers = #tpu.dot_dimension_numbers<[1], [0], [0], [1], [0, 0, 1, 1], [], []>} : vector<2x32xf32>, vector<32x128xf32>, vector<2x128xf32> -> vector<2x128xf32>
    %132 = arith.addf %130, %131 : vector<2x128xf32>
    %133 = vector.extract_strided_slice %132 {offsets = [0, 0], sizes = [2, 32], strides = [1, 1]} : vector<2x128xf32> to vector<2x32xf32>
    %134 = arith.negf %133 : vector<2x32xf32>
    %135 = math.exp %134 : vector<2x32xf32>
    %cst_37 = arith.constant 1.000000e+00 : f32
    %136 = vector.broadcast %cst_37 : f32 to vector<2x32xf32>
    %137 = arith.addf %136, %135 : vector<2x32xf32>
    %138 = arith.divf %136, %137 : vector<2x32xf32>
    %139 = vector.extract_strided_slice %132 {offsets = [0, 32], sizes = [2, 32], strides = [1, 1]} : vector<2x128xf32> to vector<2x32xf32>
    %140 = arith.negf %139 : vector<2x32xf32>
    %141 = math.exp %140 : vector<2x32xf32>
    %cst_38 = arith.constant 1.000000e+00 : f32
    %142 = vector.broadcast %cst_38 : f32 to vector<2x32xf32>
    %143 = arith.addf %142, %141 : vector<2x32xf32>
    %144 = arith.divf %142, %143 : vector<2x32xf32>
    %145 = vector.extract_strided_slice %132 {offsets = [0, 64], sizes = [2, 32], strides = [1, 1]} : vector<2x128xf32> to vector<2x32xf32>
    %146 = math.tanh %145 : vector<2x32xf32>
    %147 = vector.extract_strided_slice %132 {offsets = [0, 96], sizes = [2, 32], strides = [1, 1]} : vector<2x128xf32> to vector<2x32xf32>
    %148 = arith.negf %147 : vector<2x32xf32>
    %149 = math.exp %148 : vector<2x32xf32>
    %cst_39 = arith.constant 1.000000e+00 : f32
    %150 = vector.broadcast %cst_39 : f32 to vector<2x32xf32>
    %151 = arith.addf %150, %149 : vector<2x32xf32>
    %152 = arith.divf %150, %151 : vector<2x32xf32>
    %153 = arith.mulf %144, %99 : vector<2x32xf32>
    %154 = arith.mulf %138, %146 : vector<2x32xf32>
    %155 = arith.addf %153, %154 : vector<2x32xf32>
    %156 = math.tanh %155 : vector<2x32xf32>
    %157 = arith.mulf %152, %156 : vector<2x32xf32>
    %158 = vector.extract_strided_slice %14 {offsets = [0, 128], sizes = [2, 128], strides = [1, 1]} : vector<2x256xf32> to vector<2x128xf32>
    %cst_40 = arith.constant dense<0.000000e+00> : vector<2x128xf32>
    %159 = tpu.matmul %129, %5, %cst_40 {dimension_numbers = #tpu.dot_dimension_numbers<[1], [0], [0], [1], [0, 0, 1, 1], [], []>} : vector<2x32xf32>, vector<32x128xf32>, vector<2x128xf32> -> vector<2x128xf32>
    %160 = arith.addf %158, %159 : vector<2x128xf32>
    %161 = vector.extract_strided_slice %160 {offsets = [0, 0], sizes = [2, 32], strides = [1, 1]} : vector<2x128xf32> to vector<2x32xf32>
    %162 = arith.negf %161 : vector<2x32xf32>
    %163 = math.exp %162 : vector<2x32xf32>
    %cst_41 = arith.constant 1.000000e+00 : f32
    %164 = vector.broadcast %cst_41 : f32 to vector<2x32xf32>
    %165 = arith.addf %164, %163 : vector<2x32xf32>
    %166 = arith.divf %164, %165 : vector<2x32xf32>
    %167 = vector.extract_strided_slice %160 {offsets = [0, 32], sizes = [2, 32], strides = [1, 1]} : vector<2x128xf32> to vector<2x32xf32>
    %168 = arith.negf %167 : vector<2x32xf32>
    %169 = math.exp %168 : vector<2x32xf32>
    %cst_42 = arith.constant 1.000000e+00 : f32
    %170 = vector.broadcast %cst_42 : f32 to vector<2x32xf32>
    %171 = arith.addf %170, %169 : vector<2x32xf32>
    %172 = arith.divf %170, %171 : vector<2x32xf32>
    %173 = vector.extract_strided_slice %160 {offsets = [0, 64], sizes = [2, 32], strides = [1, 1]} : vector<2x128xf32> to vector<2x32xf32>
    %174 = math.tanh %173 : vector<2x32xf32>
    %175 = vector.extract_strided_slice %160 {offsets = [0, 96], sizes = [2, 32], strides = [1, 1]} : vector<2x128xf32> to vector<2x32xf32>
    %176 = arith.negf %175 : vector<2x32xf32>
    %177 = math.exp %176 : vector<2x32xf32>
    %cst_43 = arith.constant 1.000000e+00 : f32
    %178 = vector.broadcast %cst_43 : f32 to vector<2x32xf32>
    %179 = arith.addf %178, %177 : vector<2x32xf32>
    %180 = arith.divf %178, %179 : vector<2x32xf32>
    %181 = arith.mulf %172, %127 : vector<2x32xf32>
    %182 = arith.mulf %166, %174 : vector<2x32xf32>
    %183 = arith.addf %181, %182 : vector<2x32xf32>
    %184 = math.tanh %183 : vector<2x32xf32>
    %185 = arith.mulf %180, %184 : vector<2x32xf32>
    %186 = vector.extract_strided_slice %16 {offsets = [0, 0], sizes = [2, 128], strides = [1, 1]} : vector<2x256xf32> to vector<2x128xf32>
    %cst_44 = arith.constant dense<0.000000e+00> : vector<2x128xf32>
    %187 = tpu.matmul %157, %4, %cst_44 {dimension_numbers = #tpu.dot_dimension_numbers<[1], [0], [0], [1], [0, 0, 1, 1], [], []>} : vector<2x32xf32>, vector<32x128xf32>, vector<2x128xf32> -> vector<2x128xf32>
    %188 = arith.addf %186, %187 : vector<2x128xf32>
    %189 = vector.extract_strided_slice %188 {offsets = [0, 0], sizes = [2, 32], strides = [1, 1]} : vector<2x128xf32> to vector<2x32xf32>
    %190 = arith.negf %189 : vector<2x32xf32>
    %191 = math.exp %190 : vector<2x32xf32>
    %cst_45 = arith.constant 1.000000e+00 : f32
    %192 = vector.broadcast %cst_45 : f32 to vector<2x32xf32>
    %193 = arith.addf %192, %191 : vector<2x32xf32>
    %194 = arith.divf %192, %193 : vector<2x32xf32>
    %195 = vector.extract_strided_slice %188 {offsets = [0, 32], sizes = [2, 32], strides = [1, 1]} : vector<2x128xf32> to vector<2x32xf32>
    %196 = arith.negf %195 : vector<2x32xf32>
    %197 = math.exp %196 : vector<2x32xf32>
    %cst_46 = arith.constant 1.000000e+00 : f32
    %198 = vector.broadcast %cst_46 : f32 to vector<2x32xf32>
    %199 = arith.addf %198, %197 : vector<2x32xf32>
    %200 = arith.divf %198, %199 : vector<2x32xf32>
    %201 = vector.extract_strided_slice %188 {offsets = [0, 64], sizes = [2, 32], strides = [1, 1]} : vector<2x128xf32> to vector<2x32xf32>
    %202 = math.tanh %201 : vector<2x32xf32>
    %203 = vector.extract_strided_slice %188 {offsets = [0, 96], sizes = [2, 32], strides = [1, 1]} : vector<2x128xf32> to vector<2x32xf32>
    %204 = arith.negf %203 : vector<2x32xf32>
    %205 = math.exp %204 : vector<2x32xf32>
    %cst_47 = arith.constant 1.000000e+00 : f32
    %206 = vector.broadcast %cst_47 : f32 to vector<2x32xf32>
    %207 = arith.addf %206, %205 : vector<2x32xf32>
    %208 = arith.divf %206, %207 : vector<2x32xf32>
    %209 = arith.mulf %200, %155 : vector<2x32xf32>
    %210 = arith.mulf %194, %202 : vector<2x32xf32>
    %211 = arith.addf %209, %210 : vector<2x32xf32>
    %212 = math.tanh %211 : vector<2x32xf32>
    %213 = arith.mulf %208, %212 : vector<2x32xf32>
    %214 = vector.extract_strided_slice %13 {offsets = [0, 128], sizes = [2, 128], strides = [1, 1]} : vector<2x256xf32> to vector<2x128xf32>
    %cst_48 = arith.constant dense<0.000000e+00> : vector<2x128xf32>
    %215 = tpu.matmul %185, %5, %cst_48 {dimension_numbers = #tpu.dot_dimension_numbers<[1], [0], [0], [1], [0, 0, 1, 1], [], []>} : vector<2x32xf32>, vector<32x128xf32>, vector<2x128xf32> -> vector<2x128xf32>
    %216 = arith.addf %214, %215 : vector<2x128xf32>
    %217 = vector.extract_strided_slice %216 {offsets = [0, 0], sizes = [2, 32], strides = [1, 1]} : vector<2x128xf32> to vector<2x32xf32>
    %218 = arith.negf %217 : vector<2x32xf32>
    %219 = math.exp %218 : vector<2x32xf32>
    %cst_49 = arith.constant 1.000000e+00 : f32
    %220 = vector.broadcast %cst_49 : f32 to vector<2x32xf32>
    %221 = arith.addf %220, %219 : vector<2x32xf32>
    %222 = arith.divf %220, %221 : vector<2x32xf32>
    %223 = vector.extract_strided_slice %216 {offsets = [0, 32], sizes = [2, 32], strides = [1, 1]} : vector<2x128xf32> to vector<2x32xf32>
    %224 = arith.negf %223 : vector<2x32xf32>
    %225 = math.exp %224 : vector<2x32xf32>
    %cst_50 = arith.constant 1.000000e+00 : f32
    %226 = vector.broadcast %cst_50 : f32 to vector<2x32xf32>
    %227 = arith.addf %226, %225 : vector<2x32xf32>
    %228 = arith.divf %226, %227 : vector<2x32xf32>
    %229 = vector.extract_strided_slice %216 {offsets = [0, 64], sizes = [2, 32], strides = [1, 1]} : vector<2x128xf32> to vector<2x32xf32>
    %230 = math.tanh %229 : vector<2x32xf32>
    %231 = vector.extract_strided_slice %216 {offsets = [0, 96], sizes = [2, 32], strides = [1, 1]} : vector<2x128xf32> to vector<2x32xf32>
    %232 = arith.negf %231 : vector<2x32xf32>
    %233 = math.exp %232 : vector<2x32xf32>
    %cst_51 = arith.constant 1.000000e+00 : f32
    %234 = vector.broadcast %cst_51 : f32 to vector<2x32xf32>
    %235 = arith.addf %234, %233 : vector<2x32xf32>
    %236 = arith.divf %234, %235 : vector<2x32xf32>
    %237 = arith.mulf %228, %183 : vector<2x32xf32>
    %238 = arith.mulf %222, %230 : vector<2x32xf32>
    %239 = arith.addf %237, %238 : vector<2x32xf32>
    %240 = math.tanh %239 : vector<2x32xf32>
    %241 = arith.mulf %236, %240 : vector<2x32xf32>
    %cst_52 = arith.constant dense<0.000000e+00> : vector<2x256xf32>
    %242 = tpu.matmul %45, %1, %cst_52 {dimension_numbers = #tpu.dot_dimension_numbers<[1], [0], [0], [1], [0, 0, 1, 1], [], []>} : vector<2x32xf32>, vector<32x256xf32>, vector<2x256xf32> -> vector<2x256xf32>
    %cst_53 = arith.constant dense<0.000000e+00> : vector<2x256xf32>
    %243 = tpu.matmul %241, %2, %cst_53 {dimension_numbers = #tpu.dot_dimension_numbers<[1], [0], [0], [1], [0, 0, 1, 1], [], []>} : vector<2x32xf32>, vector<32x256xf32>, vector<2x256xf32> -> vector<2x256xf32>
    %244 = arith.addf %242, %243 : vector<2x256xf32>
    %245 = vector.broadcast %3 : vector<1x256xf32> to vector<2x256xf32>
    %246 = arith.addf %244, %245 : vector<2x256xf32>
    %cst_54 = arith.constant dense<0.000000e+00> : vector<2x256xf32>
    %247 = tpu.matmul %101, %1, %cst_54 {dimension_numbers = #tpu.dot_dimension_numbers<[1], [0], [0], [1], [0, 0, 1, 1], [], []>} : vector<2x32xf32>, vector<32x256xf32>, vector<2x256xf32> -> vector<2x256xf32>
    %cst_55 = arith.constant dense<0.000000e+00> : vector<2x256xf32>
    %248 = tpu.matmul %185, %2, %cst_55 {dimension_numbers = #tpu.dot_dimension_numbers<[1], [0], [0], [1], [0, 0, 1, 1], [], []>} : vector<2x32xf32>, vector<32x256xf32>, vector<2x256xf32> -> vector<2x256xf32>
    %249 = arith.addf %247, %248 : vector<2x256xf32>
    %250 = vector.broadcast %3 : vector<1x256xf32> to vector<2x256xf32>
    %251 = arith.addf %249, %250 : vector<2x256xf32>
    %cst_56 = arith.constant dense<0.000000e+00> : vector<2x256xf32>
    %252 = tpu.matmul %157, %1, %cst_56 {dimension_numbers = #tpu.dot_dimension_numbers<[1], [0], [0], [1], [0, 0, 1, 1], [], []>} : vector<2x32xf32>, vector<32x256xf32>, vector<2x256xf32> -> vector<2x256xf32>
    %cst_57 = arith.constant dense<0.000000e+00> : vector<2x256xf32>
    %253 = tpu.matmul %129, %2, %cst_57 {dimension_numbers = #tpu.dot_dimension_numbers<[1], [0], [0], [1], [0, 0, 1, 1], [], []>} : vector<2x32xf32>, vector<32x256xf32>, vector<2x256xf32> -> vector<2x256xf32>
    %254 = arith.addf %252, %253 : vector<2x256xf32>
    %255 = vector.broadcast %3 : vector<1x256xf32> to vector<2x256xf32>
    %256 = arith.addf %254, %255 : vector<2x256xf32>
    %cst_58 = arith.constant dense<0.000000e+00> : vector<2x256xf32>
    %257 = tpu.matmul %213, %1, %cst_58 {dimension_numbers = #tpu.dot_dimension_numbers<[1], [0], [0], [1], [0, 0, 1, 1], [], []>} : vector<2x32xf32>, vector<32x256xf32>, vector<2x256xf32> -> vector<2x256xf32>
    %cst_59 = arith.constant dense<0.000000e+00> : vector<2x256xf32>
    %258 = tpu.matmul %73, %2, %cst_59 {dimension_numbers = #tpu.dot_dimension_numbers<[1], [0], [0], [1], [0, 0, 1, 1], [], []>} : vector<2x32xf32>, vector<32x256xf32>, vector<2x256xf32> -> vector<2x256xf32>
    %259 = arith.addf %257, %258 : vector<2x256xf32>
    %260 = vector.broadcast %3 : vector<1x256xf32> to vector<2x256xf32>
    %261 = arith.addf %259, %260 : vector<2x256xf32>
    %cst_60 = arith.constant 0.000000e+00 : f32
    %262 = vector.broadcast %cst_60 : f32 to vector<2x32xf32>
    %263 = vector.extract_strided_slice %246 {offsets = [0, 0], sizes = [2, 128], strides = [1, 1]} : vector<2x256xf32> to vector<2x128xf32>
    %cst_61 = arith.constant dense<0.000000e+00> : vector<2x128xf32>
    %264 = tpu.matmul %262, %6, %cst_61 {dimension_numbers = #tpu.dot_dimension_numbers<[1], [0], [0], [1], [0, 0, 1, 1], [], []>} : vector<2x32xf32>, vector<32x128xf32>, vector<2x128xf32> -> vector<2x128xf32>
    %265 = arith.addf %263, %264 : vector<2x128xf32>
    %266 = vector.extract_strided_slice %265 {offsets = [0, 0], sizes = [2, 32], strides = [1, 1]} : vector<2x128xf32> to vector<2x32xf32>
    %267 = arith.negf %266 : vector<2x32xf32>
    %268 = math.exp %267 : vector<2x32xf32>
    %cst_62 = arith.constant 1.000000e+00 : f32
    %269 = vector.broadcast %cst_62 : f32 to vector<2x32xf32>
    %270 = arith.addf %269, %268 : vector<2x32xf32>
    %271 = arith.divf %269, %270 : vector<2x32xf32>
    %272 = vector.extract_strided_slice %265 {offsets = [0, 32], sizes = [2, 32], strides = [1, 1]} : vector<2x128xf32> to vector<2x32xf32>
    %273 = arith.negf %272 : vector<2x32xf32>
    %274 = math.exp %273 : vector<2x32xf32>
    %cst_63 = arith.constant 1.000000e+00 : f32
    %275 = vector.broadcast %cst_63 : f32 to vector<2x32xf32>
    %276 = arith.addf %275, %274 : vector<2x32xf32>
    %277 = arith.divf %275, %276 : vector<2x32xf32>
    %278 = vector.extract_strided_slice %265 {offsets = [0, 64], sizes = [2, 32], strides = [1, 1]} : vector<2x128xf32> to vector<2x32xf32>
    %279 = math.tanh %278 : vector<2x32xf32>
    %280 = vector.extract_strided_slice %265 {offsets = [0, 96], sizes = [2, 32], strides = [1, 1]} : vector<2x128xf32> to vector<2x32xf32>
    %281 = arith.negf %280 : vector<2x32xf32>
    %282 = math.exp %281 : vector<2x32xf32>
    %cst_64 = arith.constant 1.000000e+00 : f32
    %283 = vector.broadcast %cst_64 : f32 to vector<2x32xf32>
    %284 = arith.addf %283, %282 : vector<2x32xf32>
    %285 = arith.divf %283, %284 : vector<2x32xf32>
    %286 = arith.mulf %277, %262 : vector<2x32xf32>
    %287 = arith.mulf %271, %279 : vector<2x32xf32>
    %288 = arith.addf %286, %287 : vector<2x32xf32>
    %289 = math.tanh %288 : vector<2x32xf32>
    %290 = arith.mulf %285, %289 : vector<2x32xf32>
    %291 = vector.extract_strided_slice %261 {offsets = [0, 128], sizes = [2, 128], strides = [1, 1]} : vector<2x256xf32> to vector<2x128xf32>
    %cst_65 = arith.constant dense<0.000000e+00> : vector<2x128xf32>
    %292 = tpu.matmul %262, %7, %cst_65 {dimension_numbers = #tpu.dot_dimension_numbers<[1], [0], [0], [1], [0, 0, 1, 1], [], []>} : vector<2x32xf32>, vector<32x128xf32>, vector<2x128xf32> -> vector<2x128xf32>
    %293 = arith.addf %291, %292 : vector<2x128xf32>
    %294 = vector.extract_strided_slice %293 {offsets = [0, 0], sizes = [2, 32], strides = [1, 1]} : vector<2x128xf32> to vector<2x32xf32>
    %295 = arith.negf %294 : vector<2x32xf32>
    %296 = math.exp %295 : vector<2x32xf32>
    %cst_66 = arith.constant 1.000000e+00 : f32
    %297 = vector.broadcast %cst_66 : f32 to vector<2x32xf32>
    %298 = arith.addf %297, %296 : vector<2x32xf32>
    %299 = arith.divf %297, %298 : vector<2x32xf32>
    %300 = vector.extract_strided_slice %293 {offsets = [0, 32], sizes = [2, 32], strides = [1, 1]} : vector<2x128xf32> to vector<2x32xf32>
    %301 = arith.negf %300 : vector<2x32xf32>
    %302 = math.exp %301 : vector<2x32xf32>
    %cst_67 = arith.constant 1.000000e+00 : f32
    %303 = vector.broadcast %cst_67 : f32 to vector<2x32xf32>
    %304 = arith.addf %303, %302 : vector<2x32xf32>
    %305 = arith.divf %303, %304 : vector<2x32xf32>
    %306 = vector.extract_strided_slice %293 {offsets = [0, 64], sizes = [2, 32], strides = [1, 1]} : vector<2x128xf32> to vector<2x32xf32>
    %307 = math.tanh %306 : vector<2x32xf32>
    %308 = vector.extract_strided_slice %293 {offsets = [0, 96], sizes = [2, 32], strides = [1, 1]} : vector<2x128xf32> to vector<2x32xf32>
    %309 = arith.negf %308 : vector<2x32xf32>
    %310 = math.exp %309 : vector<2x32xf32>
    %cst_68 = arith.constant 1.000000e+00 : f32
    %311 = vector.broadcast %cst_68 : f32 to vector<2x32xf32>
    %312 = arith.addf %311, %310 : vector<2x32xf32>
    %313 = arith.divf %311, %312 : vector<2x32xf32>
    %314 = arith.mulf %305, %262 : vector<2x32xf32>
    %315 = arith.mulf %299, %307 : vector<2x32xf32>
    %316 = arith.addf %314, %315 : vector<2x32xf32>
    %317 = math.tanh %316 : vector<2x32xf32>
    %318 = arith.mulf %313, %317 : vector<2x32xf32>
    %319 = vector.extract_strided_slice %251 {offsets = [0, 0], sizes = [2, 128], strides = [1, 1]} : vector<2x256xf32> to vector<2x128xf32>
    %cst_69 = arith.constant dense<0.000000e+00> : vector<2x128xf32>
    %320 = tpu.matmul %290, %6, %cst_69 {dimension_numbers = #tpu.dot_dimension_numbers<[1], [0], [0], [1], [0, 0, 1, 1], [], []>} : vector<2x32xf32>, vector<32x128xf32>, vector<2x128xf32> -> vector<2x128xf32>
    %321 = arith.addf %319, %320 : vector<2x128xf32>
    %322 = vector.extract_strided_slice %321 {offsets = [0, 0], sizes = [2, 32], strides = [1, 1]} : vector<2x128xf32> to vector<2x32xf32>
    %323 = arith.negf %322 : vector<2x32xf32>
    %324 = math.exp %323 : vector<2x32xf32>
    %cst_70 = arith.constant 1.000000e+00 : f32
    %325 = vector.broadcast %cst_70 : f32 to vector<2x32xf32>
    %326 = arith.addf %325, %324 : vector<2x32xf32>
    %327 = arith.divf %325, %326 : vector<2x32xf32>
    %328 = vector.extract_strided_slice %321 {offsets = [0, 32], sizes = [2, 32], strides = [1, 1]} : vector<2x128xf32> to vector<2x32xf32>
    %329 = arith.negf %328 : vector<2x32xf32>
    %330 = math.exp %329 : vector<2x32xf32>
    %cst_71 = arith.constant 1.000000e+00 : f32
    %331 = vector.broadcast %cst_71 : f32 to vector<2x32xf32>
    %332 = arith.addf %331, %330 : vector<2x32xf32>
    %333 = arith.divf %331, %332 : vector<2x32xf32>
    %334 = vector.extract_strided_slice %321 {offsets = [0, 64], sizes = [2, 32], strides = [1, 1]} : vector<2x128xf32> to vector<2x32xf32>
    %335 = math.tanh %334 : vector<2x32xf32>
    %336 = vector.extract_strided_slice %321 {offsets = [0, 96], sizes = [2, 32], strides = [1, 1]} : vector<2x128xf32> to vector<2x32xf32>
    %337 = arith.negf %336 : vector<2x32xf32>
    %338 = math.exp %337 : vector<2x32xf32>
    %cst_72 = arith.constant 1.000000e+00 : f32
    %339 = vector.broadcast %cst_72 : f32 to vector<2x32xf32>
    %340 = arith.addf %339, %338 : vector<2x32xf32>
    %341 = arith.divf %339, %340 : vector<2x32xf32>
    %342 = arith.mulf %333, %288 : vector<2x32xf32>
    %343 = arith.mulf %327, %335 : vector<2x32xf32>
    %344 = arith.addf %342, %343 : vector<2x32xf32>
    %345 = math.tanh %344 : vector<2x32xf32>
    %346 = arith.mulf %341, %345 : vector<2x32xf32>
    %347 = vector.extract_strided_slice %256 {offsets = [0, 128], sizes = [2, 128], strides = [1, 1]} : vector<2x256xf32> to vector<2x128xf32>
    %cst_73 = arith.constant dense<0.000000e+00> : vector<2x128xf32>
    %348 = tpu.matmul %318, %7, %cst_73 {dimension_numbers = #tpu.dot_dimension_numbers<[1], [0], [0], [1], [0, 0, 1, 1], [], []>} : vector<2x32xf32>, vector<32x128xf32>, vector<2x128xf32> -> vector<2x128xf32>
    %349 = arith.addf %347, %348 : vector<2x128xf32>
    %350 = vector.extract_strided_slice %349 {offsets = [0, 0], sizes = [2, 32], strides = [1, 1]} : vector<2x128xf32> to vector<2x32xf32>
    %351 = arith.negf %350 : vector<2x32xf32>
    %352 = math.exp %351 : vector<2x32xf32>
    %cst_74 = arith.constant 1.000000e+00 : f32
    %353 = vector.broadcast %cst_74 : f32 to vector<2x32xf32>
    %354 = arith.addf %353, %352 : vector<2x32xf32>
    %355 = arith.divf %353, %354 : vector<2x32xf32>
    %356 = vector.extract_strided_slice %349 {offsets = [0, 32], sizes = [2, 32], strides = [1, 1]} : vector<2x128xf32> to vector<2x32xf32>
    %357 = arith.negf %356 : vector<2x32xf32>
    %358 = math.exp %357 : vector<2x32xf32>
    %cst_75 = arith.constant 1.000000e+00 : f32
    %359 = vector.broadcast %cst_75 : f32 to vector<2x32xf32>
    %360 = arith.addf %359, %358 : vector<2x32xf32>
    %361 = arith.divf %359, %360 : vector<2x32xf32>
    %362 = vector.extract_strided_slice %349 {offsets = [0, 64], sizes = [2, 32], strides = [1, 1]} : vector<2x128xf32> to vector<2x32xf32>
    %363 = math.tanh %362 : vector<2x32xf32>
    %364 = vector.extract_strided_slice %349 {offsets = [0, 96], sizes = [2, 32], strides = [1, 1]} : vector<2x128xf32> to vector<2x32xf32>
    %365 = arith.negf %364 : vector<2x32xf32>
    %366 = math.exp %365 : vector<2x32xf32>
    %cst_76 = arith.constant 1.000000e+00 : f32
    %367 = vector.broadcast %cst_76 : f32 to vector<2x32xf32>
    %368 = arith.addf %367, %366 : vector<2x32xf32>
    %369 = arith.divf %367, %368 : vector<2x32xf32>
    %370 = arith.mulf %361, %316 : vector<2x32xf32>
    %371 = arith.mulf %355, %363 : vector<2x32xf32>
    %372 = arith.addf %370, %371 : vector<2x32xf32>
    %373 = math.tanh %372 : vector<2x32xf32>
    %374 = arith.mulf %369, %373 : vector<2x32xf32>
    %375 = vector.extract_strided_slice %256 {offsets = [0, 0], sizes = [2, 128], strides = [1, 1]} : vector<2x256xf32> to vector<2x128xf32>
    %cst_77 = arith.constant dense<0.000000e+00> : vector<2x128xf32>
    %376 = tpu.matmul %346, %6, %cst_77 {dimension_numbers = #tpu.dot_dimension_numbers<[1], [0], [0], [1], [0, 0, 1, 1], [], []>} : vector<2x32xf32>, vector<32x128xf32>, vector<2x128xf32> -> vector<2x128xf32>
    %377 = arith.addf %375, %376 : vector<2x128xf32>
    %378 = vector.extract_strided_slice %377 {offsets = [0, 0], sizes = [2, 32], strides = [1, 1]} : vector<2x128xf32> to vector<2x32xf32>
    %379 = arith.negf %378 : vector<2x32xf32>
    %380 = math.exp %379 : vector<2x32xf32>
    %cst_78 = arith.constant 1.000000e+00 : f32
    %381 = vector.broadcast %cst_78 : f32 to vector<2x32xf32>
    %382 = arith.addf %381, %380 : vector<2x32xf32>
    %383 = arith.divf %381, %382 : vector<2x32xf32>
    %384 = vector.extract_strided_slice %377 {offsets = [0, 32], sizes = [2, 32], strides = [1, 1]} : vector<2x128xf32> to vector<2x32xf32>
    %385 = arith.negf %384 : vector<2x32xf32>
    %386 = math.exp %385 : vector<2x32xf32>
    %cst_79 = arith.constant 1.000000e+00 : f32
    %387 = vector.broadcast %cst_79 : f32 to vector<2x32xf32>
    %388 = arith.addf %387, %386 : vector<2x32xf32>
    %389 = arith.divf %387, %388 : vector<2x32xf32>
    %390 = vector.extract_strided_slice %377 {offsets = [0, 64], sizes = [2, 32], strides = [1, 1]} : vector<2x128xf32> to vector<2x32xf32>
    %391 = math.tanh %390 : vector<2x32xf32>
    %392 = vector.extract_strided_slice %377 {offsets = [0, 96], sizes = [2, 32], strides = [1, 1]} : vector<2x128xf32> to vector<2x32xf32>
    %393 = arith.negf %392 : vector<2x32xf32>
    %394 = math.exp %393 : vector<2x32xf32>
    %cst_80 = arith.constant 1.000000e+00 : f32
    %395 = vector.broadcast %cst_80 : f32 to vector<2x32xf32>
    %396 = arith.addf %395, %394 : vector<2x32xf32>
    %397 = arith.divf %395, %396 : vector<2x32xf32>
    %398 = arith.mulf %389, %344 : vector<2x32xf32>
    %399 = arith.mulf %383, %391 : vector<2x32xf32>
    %400 = arith.addf %398, %399 : vector<2x32xf32>
    %401 = math.tanh %400 : vector<2x32xf32>
    %402 = arith.mulf %397, %401 : vector<2x32xf32>
    %403 = vector.extract_strided_slice %251 {offsets = [0, 128], sizes = [2, 128], strides = [1, 1]} : vector<2x256xf32> to vector<2x128xf32>
    %cst_81 = arith.constant dense<0.000000e+00> : vector<2x128xf32>
    %404 = tpu.matmul %374, %7, %cst_81 {dimension_numbers = #tpu.dot_dimension_numbers<[1], [0], [0], [1], [0, 0, 1, 1], [], []>} : vector<2x32xf32>, vector<32x128xf32>, vector<2x128xf32> -> vector<2x128xf32>
    %405 = arith.addf %403, %404 : vector<2x128xf32>
    %406 = vector.extract_strided_slice %405 {offsets = [0, 0], sizes = [2, 32], strides = [1, 1]} : vector<2x128xf32> to vector<2x32xf32>
    %407 = arith.negf %406 : vector<2x32xf32>
    %408 = math.exp %407 : vector<2x32xf32>
    %cst_82 = arith.constant 1.000000e+00 : f32
    %409 = vector.broadcast %cst_82 : f32 to vector<2x32xf32>
    %410 = arith.addf %409, %408 : vector<2x32xf32>
    %411 = arith.divf %409, %410 : vector<2x32xf32>
    %412 = vector.extract_strided_slice %405 {offsets = [0, 32], sizes = [2, 32], strides = [1, 1]} : vector<2x128xf32> to vector<2x32xf32>
    %413 = arith.negf %412 : vector<2x32xf32>
    %414 = math.exp %413 : vector<2x32xf32>
    %cst_83 = arith.constant 1.000000e+00 : f32
    %415 = vector.broadcast %cst_83 : f32 to vector<2x32xf32>
    %416 = arith.addf %415, %414 : vector<2x32xf32>
    %417 = arith.divf %415, %416 : vector<2x32xf32>
    %418 = vector.extract_strided_slice %405 {offsets = [0, 64], sizes = [2, 32], strides = [1, 1]} : vector<2x128xf32> to vector<2x32xf32>
    %419 = math.tanh %418 : vector<2x32xf32>
    %420 = vector.extract_strided_slice %405 {offsets = [0, 96], sizes = [2, 32], strides = [1, 1]} : vector<2x128xf32> to vector<2x32xf32>
    %421 = arith.negf %420 : vector<2x32xf32>
    %422 = math.exp %421 : vector<2x32xf32>
    %cst_84 = arith.constant 1.000000e+00 : f32
    %423 = vector.broadcast %cst_84 : f32 to vector<2x32xf32>
    %424 = arith.addf %423, %422 : vector<2x32xf32>
    %425 = arith.divf %423, %424 : vector<2x32xf32>
    %426 = arith.mulf %417, %372 : vector<2x32xf32>
    %427 = arith.mulf %411, %419 : vector<2x32xf32>
    %428 = arith.addf %426, %427 : vector<2x32xf32>
    %429 = math.tanh %428 : vector<2x32xf32>
    %430 = arith.mulf %425, %429 : vector<2x32xf32>
    %431 = vector.extract_strided_slice %261 {offsets = [0, 0], sizes = [2, 128], strides = [1, 1]} : vector<2x256xf32> to vector<2x128xf32>
    %cst_85 = arith.constant dense<0.000000e+00> : vector<2x128xf32>
    %432 = tpu.matmul %402, %6, %cst_85 {dimension_numbers = #tpu.dot_dimension_numbers<[1], [0], [0], [1], [0, 0, 1, 1], [], []>} : vector<2x32xf32>, vector<32x128xf32>, vector<2x128xf32> -> vector<2x128xf32>
    %433 = arith.addf %431, %432 : vector<2x128xf32>
    %434 = vector.extract_strided_slice %433 {offsets = [0, 0], sizes = [2, 32], strides = [1, 1]} : vector<2x128xf32> to vector<2x32xf32>
    %435 = arith.negf %434 : vector<2x32xf32>
    %436 = math.exp %435 : vector<2x32xf32>
    %cst_86 = arith.constant 1.000000e+00 : f32
    %437 = vector.broadcast %cst_86 : f32 to vector<2x32xf32>
    %438 = arith.addf %437, %436 : vector<2x32xf32>
    %439 = arith.divf %437, %438 : vector<2x32xf32>
    %440 = vector.extract_strided_slice %433 {offsets = [0, 32], sizes = [2, 32], strides = [1, 1]} : vector<2x128xf32> to vector<2x32xf32>
    %441 = arith.negf %440 : vector<2x32xf32>
    %442 = math.exp %441 : vector<2x32xf32>
    %cst_87 = arith.constant 1.000000e+00 : f32
    %443 = vector.broadcast %cst_87 : f32 to vector<2x32xf32>
    %444 = arith.addf %443, %442 : vector<2x32xf32>
    %445 = arith.divf %443, %444 : vector<2x32xf32>
    %446 = vector.extract_strided_slice %433 {offsets = [0, 64], sizes = [2, 32], strides = [1, 1]} : vector<2x128xf32> to vector<2x32xf32>
    %447 = math.tanh %446 : vector<2x32xf32>
    %448 = vector.extract_strided_slice %433 {offsets = [0, 96], sizes = [2, 32], strides = [1, 1]} : vector<2x128xf32> to vector<2x32xf32>
    %449 = arith.negf %448 : vector<2x32xf32>
    %450 = math.exp %449 : vector<2x32xf32>
    %cst_88 = arith.constant 1.000000e+00 : f32
    %451 = vector.broadcast %cst_88 : f32 to vector<2x32xf32>
    %452 = arith.addf %451, %450 : vector<2x32xf32>
    %453 = arith.divf %451, %452 : vector<2x32xf32>
    %454 = arith.mulf %445, %400 : vector<2x32xf32>
    %455 = arith.mulf %439, %447 : vector<2x32xf32>
    %456 = arith.addf %454, %455 : vector<2x32xf32>
    %457 = math.tanh %456 : vector<2x32xf32>
    %458 = arith.mulf %453, %457 : vector<2x32xf32>
    %459 = vector.extract_strided_slice %246 {offsets = [0, 128], sizes = [2, 128], strides = [1, 1]} : vector<2x256xf32> to vector<2x128xf32>
    %cst_89 = arith.constant dense<0.000000e+00> : vector<2x128xf32>
    %460 = tpu.matmul %430, %7, %cst_89 {dimension_numbers = #tpu.dot_dimension_numbers<[1], [0], [0], [1], [0, 0, 1, 1], [], []>} : vector<2x32xf32>, vector<32x128xf32>, vector<2x128xf32> -> vector<2x128xf32>
    %461 = arith.addf %459, %460 : vector<2x128xf32>
    %462 = vector.extract_strided_slice %461 {offsets = [0, 0], sizes = [2, 32], strides = [1, 1]} : vector<2x128xf32> to vector<2x32xf32>
    %463 = arith.negf %462 : vector<2x32xf32>
    %464 = math.exp %463 : vector<2x32xf32>
    %cst_90 = arith.constant 1.000000e+00 : f32
    %465 = vector.broadcast %cst_90 : f32 to vector<2x32xf32>
    %466 = arith.addf %465, %464 : vector<2x32xf32>
    %467 = arith.divf %465, %466 : vector<2x32xf32>
    %468 = vector.extract_strided_slice %461 {offsets = [0, 32], sizes = [2, 32], strides = [1, 1]} : vector<2x128xf32> to vector<2x32xf32>
    %469 = arith.negf %468 : vector<2x32xf32>
    %470 = math.exp %469 : vector<2x32xf32>
    %cst_91 = arith.constant 1.000000e+00 : f32
    %471 = vector.broadcast %cst_91 : f32 to vector<2x32xf32>
    %472 = arith.addf %471, %470 : vector<2x32xf32>
    %473 = arith.divf %471, %472 : vector<2x32xf32>
    %474 = vector.extract_strided_slice %461 {offsets = [0, 64], sizes = [2, 32], strides = [1, 1]} : vector<2x128xf32> to vector<2x32xf32>
    %475 = math.tanh %474 : vector<2x32xf32>
    %476 = vector.extract_strided_slice %461 {offsets = [0, 96], sizes = [2, 32], strides = [1, 1]} : vector<2x128xf32> to vector<2x32xf32>
    %477 = arith.negf %476 : vector<2x32xf32>
    %478 = math.exp %477 : vector<2x32xf32>
    %cst_92 = arith.constant 1.000000e+00 : f32
    %479 = vector.broadcast %cst_92 : f32 to vector<2x32xf32>
    %480 = arith.addf %479, %478 : vector<2x32xf32>
    %481 = arith.divf %479, %480 : vector<2x32xf32>
    %482 = arith.mulf %473, %428 : vector<2x32xf32>
    %483 = arith.mulf %467, %475 : vector<2x32xf32>
    %484 = arith.addf %482, %483 : vector<2x32xf32>
    %485 = math.tanh %484 : vector<2x32xf32>
    %486 = arith.mulf %481, %485 : vector<2x32xf32>
    %c0_93 = arith.constant 0 : index
    %c0_94 = arith.constant 0 : index
    %487 = vector.load %arg10[%c0_93, %c0_94] : memref<1x32xf32, #tpu.memory_space<vmem>>, vector<1x32xf32>
    %c0_95 = arith.constant 0 : index
    %c0_96 = arith.constant 0 : index
    %488 = vector.load %arg11[%c0_95, %c0_96] : memref<1x32xf32, #tpu.memory_space<vmem>>, vector<1x32xf32>
    %c0_97 = arith.constant 0 : index
    %c0_98 = arith.constant 0 : index
    %489 = vector.load %arg12[%c0_97, %c0_98] : memref<1x32xf32, #tpu.memory_space<vmem>>, vector<1x32xf32>
    %c0_99 = arith.constant 0 : index
    %c0_100 = arith.constant 0 : index
    %490 = vector.load %arg13[%c0_99, %c0_100] : memref<1x32xf32, #tpu.memory_space<vmem>>, vector<1x32xf32>
    %c0_101 = arith.constant 0 : index
    %c0_102 = arith.constant 0 : index
    %491 = vector.load %arg14[%c0_101, %c0_102] : memref<1x32xf32, #tpu.memory_space<vmem>>, vector<1x32xf32>
    %c0_103 = arith.constant 0 : index
    %c0_104 = arith.constant 0 : index
    %492 = vector.load %arg15[%c0_103, %c0_104] : memref<1x32xf32, #tpu.memory_space<vmem>>, vector<1x32xf32>
    %c0_105 = arith.constant 0 : index
    %c0_106 = arith.constant 0 : index
    %493 = vector.load %arg16[%c0_105, %c0_106] : memref<1x1xf32, #tpu.memory_space<vmem>>, vector<1x1xf32>
    %cst_107 = arith.constant dense<0.000000e+00> : vector<2xf32>
    %494 = vector.multi_reduction <add>, %290, %cst_107 [1] : vector<2x32xf32> to vector<2xf32>
    %495 = vector.shape_cast %494 : vector<2xf32> to vector<2x1xf32>
    %cst_108 = arith.constant dense<0.000000e+00> : vector<2xf32>
    %496 = vector.multi_reduction <add>, %486, %cst_108 [1] : vector<2x32xf32> to vector<2xf32>
    %497 = vector.shape_cast %496 : vector<2xf32> to vector<2x1xf32>
    %498 = arith.addf %495, %497 : vector<2x1xf32>
    %cst_109 = arith.constant 1.562500e-02 : f32
    %499 = vector.broadcast %cst_109 : f32 to vector<2x1xf32>
    %500 = arith.mulf %498, %499 : vector<2x1xf32>
    %501 = vector.broadcast %500 : vector<2x1xf32> to vector<2x32xf32>
    %502 = arith.subf %290, %501 : vector<2x32xf32>
    %503 = vector.broadcast %500 : vector<2x1xf32> to vector<2x32xf32>
    %504 = arith.subf %486, %503 : vector<2x32xf32>
    %505 = arith.mulf %502, %502 : vector<2x32xf32>
    %cst_110 = arith.constant dense<0.000000e+00> : vector<2xf32>
    %506 = vector.multi_reduction <add>, %505, %cst_110 [1] : vector<2x32xf32> to vector<2xf32>
    %507 = vector.shape_cast %506 : vector<2xf32> to vector<2x1xf32>
    %508 = arith.mulf %504, %504 : vector<2x32xf32>
    %cst_111 = arith.constant dense<0.000000e+00> : vector<2xf32>
    %509 = vector.multi_reduction <add>, %508, %cst_111 [1] : vector<2x32xf32> to vector<2xf32>
    %510 = vector.shape_cast %509 : vector<2xf32> to vector<2x1xf32>
    %511 = arith.addf %507, %510 : vector<2x1xf32>
    %cst_112 = arith.constant 1.562500e-02 : f32
    %512 = vector.broadcast %cst_112 : f32 to vector<2x1xf32>
    %513 = arith.mulf %511, %512 : vector<2x1xf32>
    %cst_113 = arith.constant 9.99999974E-6 : f32
    %514 = vector.broadcast %cst_113 : f32 to vector<2x1xf32>
    %515 = arith.addf %513, %514 : vector<2x1xf32>
    %516 = math.rsqrt %515 : vector<2x1xf32>
    %517 = vector.broadcast %516 : vector<2x1xf32> to vector<2x32xf32>
    %518 = arith.mulf %502, %517 : vector<2x32xf32>
    %519 = vector.broadcast %487 : vector<1x32xf32> to vector<2x32xf32>
    %520 = arith.mulf %518, %519 : vector<2x32xf32>
    %521 = vector.broadcast %489 : vector<1x32xf32> to vector<2x32xf32>
    %522 = arith.addf %520, %521 : vector<2x32xf32>
    %523 = vector.broadcast %516 : vector<2x1xf32> to vector<2x32xf32>
    %524 = arith.mulf %504, %523 : vector<2x32xf32>
    %525 = vector.broadcast %488 : vector<1x32xf32> to vector<2x32xf32>
    %526 = arith.mulf %524, %525 : vector<2x32xf32>
    %527 = vector.broadcast %490 : vector<1x32xf32> to vector<2x32xf32>
    %528 = arith.addf %526, %527 : vector<2x32xf32>
    %529 = vector.broadcast %491 : vector<1x32xf32> to vector<2x32xf32>
    %530 = arith.mulf %522, %529 : vector<2x32xf32>
    %cst_114 = arith.constant dense<0.000000e+00> : vector<2xf32>
    %531 = vector.multi_reduction <add>, %530, %cst_114 [1] : vector<2x32xf32> to vector<2xf32>
    %532 = vector.shape_cast %531 : vector<2xf32> to vector<2x1xf32>
    %533 = vector.broadcast %492 : vector<1x32xf32> to vector<2x32xf32>
    %534 = arith.mulf %528, %533 : vector<2x32xf32>
    %cst_115 = arith.constant dense<0.000000e+00> : vector<2xf32>
    %535 = vector.multi_reduction <add>, %534, %cst_115 [1] : vector<2x32xf32> to vector<2xf32>
    %536 = vector.shape_cast %535 : vector<2xf32> to vector<2x1xf32>
    %537 = arith.addf %532, %536 : vector<2x1xf32>
    %538 = vector.broadcast %493 : vector<1x1xf32> to vector<2x1xf32>
    %539 = arith.addf %537, %538 : vector<2x1xf32>
    %cst_116 = arith.constant dense<0.000000e+00> : vector<2xf32>
    %540 = vector.multi_reduction <add>, %346, %cst_116 [1] : vector<2x32xf32> to vector<2xf32>
    %541 = vector.shape_cast %540 : vector<2xf32> to vector<2x1xf32>
    %cst_117 = arith.constant dense<0.000000e+00> : vector<2xf32>
    %542 = vector.multi_reduction <add>, %430, %cst_117 [1] : vector<2x32xf32> to vector<2xf32>
    %543 = vector.shape_cast %542 : vector<2xf32> to vector<2x1xf32>
    %544 = arith.addf %541, %543 : vector<2x1xf32>
    %cst_118 = arith.constant 1.562500e-02 : f32
    %545 = vector.broadcast %cst_118 : f32 to vector<2x1xf32>
    %546 = arith.mulf %544, %545 : vector<2x1xf32>
    %547 = vector.broadcast %546 : vector<2x1xf32> to vector<2x32xf32>
    %548 = arith.subf %346, %547 : vector<2x32xf32>
    %549 = vector.broadcast %546 : vector<2x1xf32> to vector<2x32xf32>
    %550 = arith.subf %430, %549 : vector<2x32xf32>
    %551 = arith.mulf %548, %548 : vector<2x32xf32>
    %cst_119 = arith.constant dense<0.000000e+00> : vector<2xf32>
    %552 = vector.multi_reduction <add>, %551, %cst_119 [1] : vector<2x32xf32> to vector<2xf32>
    %553 = vector.shape_cast %552 : vector<2xf32> to vector<2x1xf32>
    %554 = arith.mulf %550, %550 : vector<2x32xf32>
    %cst_120 = arith.constant dense<0.000000e+00> : vector<2xf32>
    %555 = vector.multi_reduction <add>, %554, %cst_120 [1] : vector<2x32xf32> to vector<2xf32>
    %556 = vector.shape_cast %555 : vector<2xf32> to vector<2x1xf32>
    %557 = arith.addf %553, %556 : vector<2x1xf32>
    %cst_121 = arith.constant 1.562500e-02 : f32
    %558 = vector.broadcast %cst_121 : f32 to vector<2x1xf32>
    %559 = arith.mulf %557, %558 : vector<2x1xf32>
    %cst_122 = arith.constant 9.99999974E-6 : f32
    %560 = vector.broadcast %cst_122 : f32 to vector<2x1xf32>
    %561 = arith.addf %559, %560 : vector<2x1xf32>
    %562 = math.rsqrt %561 : vector<2x1xf32>
    %563 = vector.broadcast %562 : vector<2x1xf32> to vector<2x32xf32>
    %564 = arith.mulf %548, %563 : vector<2x32xf32>
    %565 = vector.broadcast %487 : vector<1x32xf32> to vector<2x32xf32>
    %566 = arith.mulf %564, %565 : vector<2x32xf32>
    %567 = vector.broadcast %489 : vector<1x32xf32> to vector<2x32xf32>
    %568 = arith.addf %566, %567 : vector<2x32xf32>
    %569 = vector.broadcast %562 : vector<2x1xf32> to vector<2x32xf32>
    %570 = arith.mulf %550, %569 : vector<2x32xf32>
    %571 = vector.broadcast %488 : vector<1x32xf32> to vector<2x32xf32>
    %572 = arith.mulf %570, %571 : vector<2x32xf32>
    %573 = vector.broadcast %490 : vector<1x32xf32> to vector<2x32xf32>
    %574 = arith.addf %572, %573 : vector<2x32xf32>
    %575 = vector.broadcast %491 : vector<1x32xf32> to vector<2x32xf32>
    %576 = arith.mulf %568, %575 : vector<2x32xf32>
    %cst_123 = arith.constant dense<0.000000e+00> : vector<2xf32>
    %577 = vector.multi_reduction <add>, %576, %cst_123 [1] : vector<2x32xf32> to vector<2xf32>
    %578 = vector.shape_cast %577 : vector<2xf32> to vector<2x1xf32>
    %579 = vector.broadcast %492 : vector<1x32xf32> to vector<2x32xf32>
    %580 = arith.mulf %574, %579 : vector<2x32xf32>
    %cst_124 = arith.constant dense<0.000000e+00> : vector<2xf32>
    %581 = vector.multi_reduction <add>, %580, %cst_124 [1] : vector<2x32xf32> to vector<2xf32>
    %582 = vector.shape_cast %581 : vector<2xf32> to vector<2x1xf32>
    %583 = arith.addf %578, %582 : vector<2x1xf32>
    %584 = vector.broadcast %493 : vector<1x1xf32> to vector<2x1xf32>
    %585 = arith.addf %583, %584 : vector<2x1xf32>
    %cst_125 = arith.constant dense<0.000000e+00> : vector<2xf32>
    %586 = vector.multi_reduction <add>, %402, %cst_125 [1] : vector<2x32xf32> to vector<2xf32>
    %587 = vector.shape_cast %586 : vector<2xf32> to vector<2x1xf32>
    %cst_126 = arith.constant dense<0.000000e+00> : vector<2xf32>
    %588 = vector.multi_reduction <add>, %374, %cst_126 [1] : vector<2x32xf32> to vector<2xf32>
    %589 = vector.shape_cast %588 : vector<2xf32> to vector<2x1xf32>
    %590 = arith.addf %587, %589 : vector<2x1xf32>
    %cst_127 = arith.constant 1.562500e-02 : f32
    %591 = vector.broadcast %cst_127 : f32 to vector<2x1xf32>
    %592 = arith.mulf %590, %591 : vector<2x1xf32>
    %593 = vector.broadcast %592 : vector<2x1xf32> to vector<2x32xf32>
    %594 = arith.subf %402, %593 : vector<2x32xf32>
    %595 = vector.broadcast %592 : vector<2x1xf32> to vector<2x32xf32>
    %596 = arith.subf %374, %595 : vector<2x32xf32>
    %597 = arith.mulf %594, %594 : vector<2x32xf32>
    %cst_128 = arith.constant dense<0.000000e+00> : vector<2xf32>
    %598 = vector.multi_reduction <add>, %597, %cst_128 [1] : vector<2x32xf32> to vector<2xf32>
    %599 = vector.shape_cast %598 : vector<2xf32> to vector<2x1xf32>
    %600 = arith.mulf %596, %596 : vector<2x32xf32>
    %cst_129 = arith.constant dense<0.000000e+00> : vector<2xf32>
    %601 = vector.multi_reduction <add>, %600, %cst_129 [1] : vector<2x32xf32> to vector<2xf32>
    %602 = vector.shape_cast %601 : vector<2xf32> to vector<2x1xf32>
    %603 = arith.addf %599, %602 : vector<2x1xf32>
    %cst_130 = arith.constant 1.562500e-02 : f32
    %604 = vector.broadcast %cst_130 : f32 to vector<2x1xf32>
    %605 = arith.mulf %603, %604 : vector<2x1xf32>
    %cst_131 = arith.constant 9.99999974E-6 : f32
    %606 = vector.broadcast %cst_131 : f32 to vector<2x1xf32>
    %607 = arith.addf %605, %606 : vector<2x1xf32>
    %608 = math.rsqrt %607 : vector<2x1xf32>
    %609 = vector.broadcast %608 : vector<2x1xf32> to vector<2x32xf32>
    %610 = arith.mulf %594, %609 : vector<2x32xf32>
    %611 = vector.broadcast %487 : vector<1x32xf32> to vector<2x32xf32>
    %612 = arith.mulf %610, %611 : vector<2x32xf32>
    %613 = vector.broadcast %489 : vector<1x32xf32> to vector<2x32xf32>
    %614 = arith.addf %612, %613 : vector<2x32xf32>
    %615 = vector.broadcast %608 : vector<2x1xf32> to vector<2x32xf32>
    %616 = arith.mulf %596, %615 : vector<2x32xf32>
    %617 = vector.broadcast %488 : vector<1x32xf32> to vector<2x32xf32>
    %618 = arith.mulf %616, %617 : vector<2x32xf32>
    %619 = vector.broadcast %490 : vector<1x32xf32> to vector<2x32xf32>
    %620 = arith.addf %618, %619 : vector<2x32xf32>
    %621 = vector.broadcast %491 : vector<1x32xf32> to vector<2x32xf32>
    %622 = arith.mulf %614, %621 : vector<2x32xf32>
    %cst_132 = arith.constant dense<0.000000e+00> : vector<2xf32>
    %623 = vector.multi_reduction <add>, %622, %cst_132 [1] : vector<2x32xf32> to vector<2xf32>
    %624 = vector.shape_cast %623 : vector<2xf32> to vector<2x1xf32>
    %625 = vector.broadcast %492 : vector<1x32xf32> to vector<2x32xf32>
    %626 = arith.mulf %620, %625 : vector<2x32xf32>
    %cst_133 = arith.constant dense<0.000000e+00> : vector<2xf32>
    %627 = vector.multi_reduction <add>, %626, %cst_133 [1] : vector<2x32xf32> to vector<2xf32>
    %628 = vector.shape_cast %627 : vector<2xf32> to vector<2x1xf32>
    %629 = arith.addf %624, %628 : vector<2x1xf32>
    %630 = vector.broadcast %493 : vector<1x1xf32> to vector<2x1xf32>
    %631 = arith.addf %629, %630 : vector<2x1xf32>
    %cst_134 = arith.constant dense<0.000000e+00> : vector<2xf32>
    %632 = vector.multi_reduction <add>, %458, %cst_134 [1] : vector<2x32xf32> to vector<2xf32>
    %633 = vector.shape_cast %632 : vector<2xf32> to vector<2x1xf32>
    %cst_135 = arith.constant dense<0.000000e+00> : vector<2xf32>
    %634 = vector.multi_reduction <add>, %318, %cst_135 [1] : vector<2x32xf32> to vector<2xf32>
    %635 = vector.shape_cast %634 : vector<2xf32> to vector<2x1xf32>
    %636 = arith.addf %633, %635 : vector<2x1xf32>
    %cst_136 = arith.constant 1.562500e-02 : f32
    %637 = vector.broadcast %cst_136 : f32 to vector<2x1xf32>
    %638 = arith.mulf %636, %637 : vector<2x1xf32>
    %639 = vector.broadcast %638 : vector<2x1xf32> to vector<2x32xf32>
    %640 = arith.subf %458, %639 : vector<2x32xf32>
    %641 = vector.broadcast %638 : vector<2x1xf32> to vector<2x32xf32>
    %642 = arith.subf %318, %641 : vector<2x32xf32>
    %643 = arith.mulf %640, %640 : vector<2x32xf32>
    %cst_137 = arith.constant dense<0.000000e+00> : vector<2xf32>
    %644 = vector.multi_reduction <add>, %643, %cst_137 [1] : vector<2x32xf32> to vector<2xf32>
    %645 = vector.shape_cast %644 : vector<2xf32> to vector<2x1xf32>
    %646 = arith.mulf %642, %642 : vector<2x32xf32>
    %cst_138 = arith.constant dense<0.000000e+00> : vector<2xf32>
    %647 = vector.multi_reduction <add>, %646, %cst_138 [1] : vector<2x32xf32> to vector<2xf32>
    %648 = vector.shape_cast %647 : vector<2xf32> to vector<2x1xf32>
    %649 = arith.addf %645, %648 : vector<2x1xf32>
    %cst_139 = arith.constant 1.562500e-02 : f32
    %650 = vector.broadcast %cst_139 : f32 to vector<2x1xf32>
    %651 = arith.mulf %649, %650 : vector<2x1xf32>
    %cst_140 = arith.constant 9.99999974E-6 : f32
    %652 = vector.broadcast %cst_140 : f32 to vector<2x1xf32>
    %653 = arith.addf %651, %652 : vector<2x1xf32>
    %654 = math.rsqrt %653 : vector<2x1xf32>
    %655 = vector.broadcast %654 : vector<2x1xf32> to vector<2x32xf32>
    %656 = arith.mulf %640, %655 : vector<2x32xf32>
    %657 = vector.broadcast %487 : vector<1x32xf32> to vector<2x32xf32>
    %658 = arith.mulf %656, %657 : vector<2x32xf32>
    %659 = vector.broadcast %489 : vector<1x32xf32> to vector<2x32xf32>
    %660 = arith.addf %658, %659 : vector<2x32xf32>
    %661 = vector.broadcast %654 : vector<2x1xf32> to vector<2x32xf32>
    %662 = arith.mulf %642, %661 : vector<2x32xf32>
    %663 = vector.broadcast %488 : vector<1x32xf32> to vector<2x32xf32>
    %664 = arith.mulf %662, %663 : vector<2x32xf32>
    %665 = vector.broadcast %490 : vector<1x32xf32> to vector<2x32xf32>
    %666 = arith.addf %664, %665 : vector<2x32xf32>
    %667 = vector.broadcast %491 : vector<1x32xf32> to vector<2x32xf32>
    %668 = arith.mulf %660, %667 : vector<2x32xf32>
    %cst_141 = arith.constant dense<0.000000e+00> : vector<2xf32>
    %669 = vector.multi_reduction <add>, %668, %cst_141 [1] : vector<2x32xf32> to vector<2xf32>
    %670 = vector.shape_cast %669 : vector<2xf32> to vector<2x1xf32>
    %671 = vector.broadcast %492 : vector<1x32xf32> to vector<2x32xf32>
    %672 = arith.mulf %666, %671 : vector<2x32xf32>
    %cst_142 = arith.constant dense<0.000000e+00> : vector<2xf32>
    %673 = vector.multi_reduction <add>, %672, %cst_142 [1] : vector<2x32xf32> to vector<2xf32>
    %674 = vector.shape_cast %673 : vector<2xf32> to vector<2x1xf32>
    %675 = arith.addf %670, %674 : vector<2x1xf32>
    %676 = vector.broadcast %493 : vector<1x1xf32> to vector<2x1xf32>
    %677 = arith.addf %675, %676 : vector<2x1xf32>
    %678 = arith.maximumf %539, %585 : vector<2x1xf32>
    %679 = arith.maximumf %678, %631 : vector<2x1xf32>
    %680 = arith.maximumf %679, %677 : vector<2x1xf32>
    %681 = arith.subf %539, %680 : vector<2x1xf32>
    %682 = math.exp %681 : vector<2x1xf32>
    %683 = arith.subf %585, %680 : vector<2x1xf32>
    %684 = math.exp %683 : vector<2x1xf32>
    %685 = arith.subf %631, %680 : vector<2x1xf32>
    %686 = math.exp %685 : vector<2x1xf32>
    %687 = arith.subf %677, %680 : vector<2x1xf32>
    %688 = math.exp %687 : vector<2x1xf32>
    %689 = arith.addf %682, %684 : vector<2x1xf32>
    %690 = arith.addf %689, %686 : vector<2x1xf32>
    %691 = arith.addf %690, %688 : vector<2x1xf32>
    %cst_143 = arith.constant 1.000000e+00 : f32
    %692 = vector.broadcast %cst_143 : f32 to vector<2x1xf32>
    %693 = arith.divf %692, %691 : vector<2x1xf32>
    %cst_144 = arith.constant 0.000000e+00 : f32
    %694 = vector.broadcast %cst_144 : f32 to vector<2x32xf32>
    %cst_145 = arith.constant 0.000000e+00 : f32
    %695 = vector.broadcast %cst_145 : f32 to vector<2x32xf32>
    %696 = arith.mulf %682, %693 : vector<2x1xf32>
    %697 = vector.broadcast %696 : vector<2x1xf32> to vector<2x32xf32>
    %698 = arith.mulf %697, %522 : vector<2x32xf32>
    %699 = arith.addf %694, %698 : vector<2x32xf32>
    %700 = vector.broadcast %696 : vector<2x1xf32> to vector<2x32xf32>
    %701 = arith.mulf %700, %528 : vector<2x32xf32>
    %702 = arith.addf %695, %701 : vector<2x32xf32>
    %703 = arith.mulf %684, %693 : vector<2x1xf32>
    %704 = vector.broadcast %703 : vector<2x1xf32> to vector<2x32xf32>
    %705 = arith.mulf %704, %568 : vector<2x32xf32>
    %706 = arith.addf %699, %705 : vector<2x32xf32>
    %707 = vector.broadcast %703 : vector<2x1xf32> to vector<2x32xf32>
    %708 = arith.mulf %707, %574 : vector<2x32xf32>
    %709 = arith.addf %702, %708 : vector<2x32xf32>
    %710 = arith.mulf %686, %693 : vector<2x1xf32>
    %711 = vector.broadcast %710 : vector<2x1xf32> to vector<2x32xf32>
    %712 = arith.mulf %711, %614 : vector<2x32xf32>
    %713 = arith.addf %706, %712 : vector<2x32xf32>
    %714 = vector.broadcast %710 : vector<2x1xf32> to vector<2x32xf32>
    %715 = arith.mulf %714, %620 : vector<2x32xf32>
    %716 = arith.addf %709, %715 : vector<2x32xf32>
    %717 = arith.mulf %688, %693 : vector<2x1xf32>
    %718 = vector.broadcast %717 : vector<2x1xf32> to vector<2x32xf32>
    %719 = arith.mulf %718, %660 : vector<2x32xf32>
    %720 = arith.addf %713, %719 : vector<2x32xf32>
    %721 = vector.broadcast %717 : vector<2x1xf32> to vector<2x32xf32>
    %722 = arith.mulf %721, %666 : vector<2x32xf32>
    %723 = arith.addf %716, %722 : vector<2x32xf32>
    %c0_146 = arith.constant 0 : index
    %c0_147 = arith.constant 0 : index
    %724 = vector.load %arg17[%c0_146, %c0_147] : memref<32x256xf32, #tpu.memory_space<vmem>>, vector<32x256xf32>
    %cst_148 = arith.constant dense<0.000000e+00> : vector<2x256xf32>
    %725 = tpu.matmul %720, %724, %cst_148 {dimension_numbers = #tpu.dot_dimension_numbers<[1], [0], [0], [1], [0, 0, 1, 1], [], []>} : vector<2x32xf32>, vector<32x256xf32>, vector<2x256xf32> -> vector<2x256xf32>
    %c0_149 = arith.constant 0 : index
    %c0_150 = arith.constant 0 : index
    %726 = vector.load %arg18[%c0_149, %c0_150] : memref<32x256xf32, #tpu.memory_space<vmem>>, vector<32x256xf32>
    %cst_151 = arith.constant dense<0.000000e+00> : vector<2x256xf32>
    %727 = tpu.matmul %723, %726, %cst_151 {dimension_numbers = #tpu.dot_dimension_numbers<[1], [0], [0], [1], [0, 0, 1, 1], [], []>} : vector<2x32xf32>, vector<32x256xf32>, vector<2x256xf32> -> vector<2x256xf32>
    %728 = arith.addf %725, %727 : vector<2x256xf32>
    %c0_152 = arith.constant 0 : index
    %c0_153 = arith.constant 0 : index
    %729 = vector.load %arg19[%c0_152, %c0_153] : memref<1x256xf32, #tpu.memory_space<vmem>>, vector<1x256xf32>
    %730 = vector.broadcast %729 : vector<1x256xf32> to vector<2x256xf32>
    %731 = arith.addf %728, %730 : vector<2x256xf32>
    %cst_154 = arith.constant 0.000000e+00 : f32
    %732 = vector.broadcast %cst_154 : f32 to vector<2x256xf32>
    %733 = arith.maximumf %731, %732 : vector<2x256xf32>
    %c0_155 = arith.constant 0 : index
    %c0_156 = arith.constant 0 : index
    %734 = vector.load %arg20[%c0_155, %c0_156] : memref<256x10xf32, #tpu.memory_space<vmem>>, vector<256x10xf32>
    %cst_157 = arith.constant dense<0.000000e+00> : vector<2x10xf32>
    %735 = tpu.matmul %733, %734, %cst_157 {dimension_numbers = #tpu.dot_dimension_numbers<[1], [0], [0], [1], [0, 0, 1, 1], [], []>} : vector<2x256xf32>, vector<256x10xf32>, vector<2x10xf32> -> vector<2x10xf32>
    %c0_158 = arith.constant 0 : index
    %c0_159 = arith.constant 0 : index
    %736 = vector.load %arg21[%c0_158, %c0_159] : memref<1x10xf32, #tpu.memory_space<vmem>>, vector<1x10xf32>
    %737 = vector.broadcast %736 : vector<1x10xf32> to vector<2x10xf32>
    %738 = arith.addf %735, %737 : vector<2x10xf32>
    %c0_160 = arith.constant 0 : index
    %c0_161 = arith.constant 0 : index
    %739 = vector.load %arg22[%c0_160, %c0_161] : memref<2x10xf32, #tpu.memory_space<vmem>>, vector<2x10xf32>
    tpu.vector_store %arg22[%c0_160, %c0_161], %738 {strides = array<i32>} : memref<2x10xf32, #tpu.memory_space<vmem>>, vector<2x10xf32>,
    return
  }
}

</mosaic_0001>

<bundles_post_ra>
// kernel: crnn_forward.3
= control target key start
LH: loop header
LB: loop body
LE: loop exit
PB: predicated region body
PF: predicated region fallthrough
CT: control target
= control target key end

     0   :  { %vm288_vm0 = vcmask 1040384   ;;  %vm95_vm1 = vcmask 72704   ;;  %vm1802_vm2 = vmmov 1   ;;  %v3195_v56 = vmov 0.0|0.0   ;;  %s3152_s1 = inlined_call_operand.vmem [shape: f32[9,32], index: 1, kind: input, shape index: {}]   ;;  %s3153_s0 = inlined_call_operand.vmem [shape: f32[512,9], index: 0, kind: input, shape index: {}]   ;;  %s3154_s4 = inlined_call_operand.vmem [shape: f32[32,2], index: 4, kind: input, shape index: {}]   ;;  %s3155_s2 = inlined_call_operand.vmem [shape: f32[1,32], index: 2, kind: input, shape index: {}]   ;;  %s3156_s3 = inlined_call_operand.vmem [shape: f32[1,32], index: 3, kind: input, shape index: {}]   ;;  %s3157_s6 = inlined_call_operand.vmem [shape: f32[2,32], index: 6, kind: input, shape index: {}]   ;;  %s3158_s5 = inlined_call_operand.vmem [shape: f32[1,2], index: 5, kind: input, shape index: {}]   ;;  %s3159_s7 = inlined_call_operand.vmem [shape: f32[1,32], index: 7, kind: input, shape index: {}]   ;;  %s3160_s8 = inlined_call_operand.vmem [shape: f32[512,32], index: 8, kind: output, shape index: {}]  }
   0x1   :  { %v93_v0 = vld [vmem:[%s3152_s1] sm:$0xff]  ;;  %v94_v1 = vld [vmem:[%s3152_s1 + $0x8] sm:$0x1]  ;;  %vm1771_vm3 = vmpackc.low %vm288_vm0, %vm1802_vm2  ;;  %vm1804_vm4 = vmmov 0   ;;  %vm890_vm5 = vcmask 261120   ;;  %vm1040_vm6 = vcmask 1041408  }
   0x2   :  { %v1770_v2 = vpack.c.bf16 %v94_v1, %v93_v0  ;;  %v29_v3 = vld [vmem:[%s3153_s0] sm:$0xff]  ;;  %v30_v4 = vld [vmem:[%s3153_s0 + $0x8] sm:$0xff]  ;;  %v31_v5 = vld [vmem:[%s3153_s0 + $0x10] sm:$0xff]  ;;  %vm1036_vm7 = vcmask 15360  }
   0x3   :  { %1642 = vmatprep.mubr.msk.f32.mxu0 %vm95_vm1, %v29_v3  ;;  %v32_v6 = vld [vmem:[%s3153_s0 + $0x18] sm:$0xff]  ;;  %v33_v7 = vld [vmem:[%s3153_s0 + $0x20] sm:$0xff]  ;;  %v34_v8 = vld [vmem:[%s3153_s0 + $0x28] sm:$0xff] }
   0x4   :  { %1772 = vmatprep.subr.msk.bf16.mxu0 %vm1771_vm3, %v1770_v2  ;;  %1788 = vmatprep.subr.msk.bf16.mxu1 %vm1771_vm3, %v1770_v2  ;;  %v35_v9 = vld [vmem:[%s3153_s0 + $0x30] sm:$0xff]  ;;  %v36_v10 = vld [vmem:[%s3153_s0 + $0x38] sm:$0xff]  ;;  %v37_v11 = vld [vmem:[%s3153_s0 + $0x40] sm:$0xff] }
   0x5   :  { %1775 = vmatpush3.bf16.msk.msra.mxu0 %vm1771_vm3, %v1770_v2  ;;  %1789 = vmatpush3.bf16.msk.msra.mxu1 %vm1771_vm3, %v1770_v2  ;;  %v38_v12 = vld [vmem:[%s3153_s0 + $0x48] sm:$0xff]  ;;  %v39_v13 = vld [vmem:[%s3153_s0 + $0x50] sm:$0xff]  ;;  %v40_v14 = vld [vmem:[%s3153_s0 + $0x58] sm:$0xff] }
   0x6   :  { %v41_v15 = vld [vmem:[%s3153_s0 + $0x60] sm:$0xff]  ;;  %v42_v16 = vld [vmem:[%s3153_s0 + $0x68] sm:$0xff]  ;;  %v43_v17 = vld [vmem:[%s3153_s0 + $0x70] sm:$0xff]  ;;  %1776 = vmatprep.subr.bf16.mxu1 %v3195_v56 }
   0x7   :  { %v44_v18 = vld [vmem:[%s3153_s0 + $0x78] sm:$0xff]  ;;  %v45_v19 = vld [vmem:[%s3153_s0 + $0x80] sm:$0xff]  ;;  %v46_v20 = vld [vmem:[%s3153_s0 + $0x88] sm:$0xff] }
   0x8   :  { %1643 = vmatmul.mubr.msk.f32.vlgmr.msra.gmra.mrb[0].mxu0 %vm95_vm1, %v30_v4  ;;  %v47_v21 = vld [vmem:[%s3153_s0 + $0x90] sm:$0xff]  ;;  %v48_v22 = vld [vmem:[%s3153_s0 + $0x98] sm:$0xff]  ;;  %v49_v23 = vld [vmem:[%s3153_s0 + $0xa0] sm:$0xff] }
   0x9   :  { %1645 = vmatprep.mubr.msk.f32.mxu0 %vm95_vm1, %v31_v5  ;;  %v50_v24 = vld [vmem:[%s3153_s0 + $0xa8] sm:$0xff]  ;;  %v51_v25 = vld [vmem:[%s3153_s0 + $0xb0] sm:$0xff]  ;;  %v52_v26 = vld [vmem:[%s3153_s0 + $0xb8] sm:$0xff] }
   0xa   :  { %v53_v27 = vld [vmem:[%s3153_s0 + $0xc0] sm:$0xff]  ;;  %v54_v28 = vld [vmem:[%s3153_s0 + $0xc8] sm:$0xff]  ;;  %v55_v29 = vld [vmem:[%s3153_s0 + $0xd0] sm:$0xff] }
   0xb   :  { %v56_v30 = vld [vmem:[%s3153_s0 + $0xd8] sm:$0xff]  ;;  %v57_v31 = vld [vmem:[%s3153_s0 + $0xe0] sm:$0xff]  ;;  %v58_v32 = vld [vmem:[%s3153_s0 + $0xe8] sm:$0xff] }
   0xc   :  { %1646 = vmatmul.mubr.msk.f32.gmra.mrb[2].mxu0 %vm95_vm1, %v32_v6  ;;  %v59_v33 = vld [vmem:[%s3153_s0 + $0xf0] sm:$0xff]  ;;  %v60_v34 = vld [vmem:[%s3153_s0 + $0xf8] sm:$0xff]  ;;  %v61_v35 = vld [vmem:[%s3153_s0 + $0x100] sm:$0xff] }
   0xd   :  { %1648 = vmatprep.mubr.msk.f32.mxu0 %vm95_vm1, %v33_v7  ;;  %v62_v36 = vld [vmem:[%s3153_s0 + $0x108] sm:$0xff]  ;;  %v63_v37 = vld [vmem:[%s3153_s0 + $0x110] sm:$0xff]  ;;  %v64_v38 = vld [vmem:[%s3153_s0 + $0x118] sm:$0xff] }
   0xe   :  { %v65_v39 = vld [vmem:[%s3153_s0 + $0x120] sm:$0xff]  ;;  %v66_v40 = vld [vmem:[%s3153_s0 + $0x128] sm:$0xff]  ;;  %v67_v41 = vld [vmem:[%s3153_s0 + $0x130] sm:$0xff] }
   0xf   :  { %1699 = vmatprep.mubr.msk.f32.mxu1 %vm95_vm1, %v67_v41  ;;  %v68_v42 = vld [vmem:[%s3153_s0 + $0x138] sm:$0xff]  ;;  %v69_v43 = vld [vmem:[%s3153_s0 + $0x140] sm:$0xff]  ;;  %v70_v44 = vld [vmem:[%s3153_s0 + $0x148] sm:$0xff] }
  0x10   :  { %1649 = vmatmul.mubr.msk.f32.gmra.mrb[4].mxu0 %vm95_vm1, %v34_v8  ;;  %1700 = vmatmul.mubr.msk.f32.vlgmr.msra.gmra.mrb[0].mxu1 %vm95_vm1, %v68_v42  ;;  %v71_v45 = vld [vmem:[%s3153_s0 + $0x150] sm:$0xff]  ;;  %v72_v46 = vld [vmem:[%s3153_s0 + $0x158] sm:$0xff]  ;;  %v73_v47 = vld [vmem:[%s3153_s0 + $0x160] sm:$0xff] }
  0x11   :  { %1651 = vmatprep.mubr.msk.f32.mxu0 %vm95_vm1, %v35_v9  ;;  %1702 = vmatprep.mubr.msk.f32.mxu1 %vm95_vm1, %v69_v43  ;;  %v74_v48 = vld [vmem:[%s3153_s0 + $0x168] sm:$0xff]  ;;  %v75_v49 = vld [vmem:[%s3153_s0 + $0x170] sm:$0xff]  ;;  %v76_v50 = vld [vmem:[%s3153_s0 + $0x178] sm:$0xff] }
  0x12   :  { %v77_v51 = vld [vmem:[%s3153_s0 + $0x180] sm:$0xff]  ;;  %v78_v52 = vld [vmem:[%s3153_s0 + $0x188] sm:$0xff]  ;;  %v79_v53 = vld [vmem:[%s3153_s0 + $0x190] sm:$0xff] }
  0x13   :  { %v80_v54 = vld [vmem:[%s3153_s0 + $0x198] sm:$0xff]  ;;  %v81_v55 = vld [vmem:[%s3153_s0 + $0x1a0] sm:$0xff]  ;;  %v884_v58 = vld [vmem:[%s3154_s4 + $0x8] sm:$0xff] }
  0x14   :  { %1652 = vmatmul.mubr.msk.f32.gmra.mrb[6].mxu0 %vm95_vm1, %v36_v10  ;;  %1703 = vmatmul.mubr.msk.f32.gmra.mrb[2].mxu1 %vm95_vm1, %v70_v44  ;;  %v883_v57 = vld [vmem:[%s3154_s4] sm:$0xff]  ;;  %v82_v59 = vld [vmem:[%s3153_s0 + $0x1a8] sm:$0xff]  ;;  %v83_v61 = vld [vmem:[%s3153_s0 + $0x1b0] sm:$0xff]  ;;  %v3193_v10 = vmov 0.0  }
  0x15   :  { %1654 = vmatprep.mubr.msk.f32.mxu0 %vm95_vm1, %v37_v11  ;;  %1705 = vmatprep.mubr.msk.f32.mxu1 %vm95_vm1, %v71_v45  ;;  %v2079_v60 = vpack.c.bf16 %v884_v58, %v883_v57  ;;  %v84_v62 = vld [vmem:[%s3153_s0 + $0x1b8] sm:$0xff]  ;;  %v85_v63 = vld [vmem:[%s3153_s0 + $0x1c0] sm:$0xff]  ;;  %v86_v0 = vld [vmem:[%s3153_s0 + $0x1c8] sm:$0xff] }
  0x16   :  { %v87_v1 = vld [vmem:[%s3153_s0 + $0x1d0] sm:$0xff]  ;;  %v88_v2 = vld [vmem:[%s3153_s0 + $0x1d8] sm:$0xff]  ;;  %v89_v3 = vld [vmem:[%s3153_s0 + $0x1e0] sm:$0xff] }
  0x17   :  { %1778 = vmatpush3.bf16.msra.mxu1 %v2079_v60  ;;  %v90_v4 = vld [vmem:[%s3153_s0 + $0x1e8] sm:$0xff]  ;;  %v91_v5 = vld [vmem:[%s3153_s0 + $0x1f0] sm:$0xff]  ;;  %v92_v6 = vld [vmem:[%s3153_s0 + $0x1f8] sm:$0xff] }
  0x18   :  { %1655 = vmatmul.mubr.msk.f32.gmra.mrb[8].mxu0 %vm95_vm1, %v38_v12  ;;  %1706 = vmatmul.mubr.msk.f32.gmra.mrb[4].mxu1 %vm95_vm1, %v72_v46  ;;  %v885_v7 = vld [vmem:[%s3154_s4 + $0x10] sm:$0xff]  ;;  %v886_v8 = vld [vmem:[%s3154_s4 + $0x18] sm:$0xff]  ;;  %v2139_v11 = vld [vmem:[%s3155_s2] ss:$0 sm:$0xff] }
  0x19   :  { %1657 = vmatprep.mubr.msk.f32.mxu0 %vm95_vm1, %v39_v13  ;;  %1708 = vmatprep.mubr.msk.f32.mxu1 %vm95_vm1, %v73_v47  ;;  %v2130_v9 = vpack.c.bf16 %v886_v8, %v885_v7  ;;  %v2144_v13 = vld [vmem:[%s3156_s3] ss:$0 sm:$0xff] }
  0x1a   :  { %1779 = vmatprep.subr.bf16.mxu1 %v3195_v56 }
  0x1b   :  { %1781 = vmatpush3.bf16.msra.mxu1 %v2130_v9 }
  0x1c   :  { %1658 = vmatmul.mubr.msk.f32.gmra.mrb[10].mxu0 %vm95_vm1, %v40_v14  ;;  %1709 = vmatmul.mubr.msk.f32.gmra.mrb[6].mxu1 %vm95_vm1, %v74_v48 }
  0x1d   :  { %1660 = vmatprep.mubr.msk.f32.mxu0 %vm95_vm1, %v41_v15  ;;  %1711 = vmatprep.mubr.msk.f32.mxu1 %vm95_vm1, %v75_v49 }
  0x1e   :  { %1749 = vmatprep.subr.mxu1 %v3193_v10 }
  0x20   :  { %1661 = vmatmul.mubr.msk.f32.gmra.mrb[12].mxu0 %vm95_vm1, %v42_v16  ;;  %1712 = vmatmul.mubr.msk.f32.gmra.mrb[8].mxu1 %vm95_vm1, %v76_v50 }
  0x21   :  { %1663 = vmatprep.mubr.msk.f32.mxu0 %vm95_vm1, %v43_v17  ;;  %1714 = vmatprep.mubr.msk.f32.mxu1 %vm95_vm1, %v77_v51 }
  0x24   :  { %1664 = vmatmul.mubr.msk.f32.gmra.mrb[14].mxu0 %vm95_vm1, %v44_v18  ;;  %1715 = vmatmul.mubr.msk.f32.gmra.mrb[10].mxu1 %vm95_vm1, %v78_v52 }
  0x25   :  { %1666 = vmatprep.mubr.msk.f32.mxu0 %vm95_vm1, %v45_v19  ;;  %1717 = vmatprep.mubr.msk.f32.mxu1 %vm95_vm1, %v79_v53 }
  0x28   :  { %1667 = vmatmul.mubr.msk.f32.gmra.mrb[16].mxu0 %vm95_vm1, %v46_v20  ;;  %1718 = vmatmul.mubr.msk.f32.gmra.mrb[12].mxu1 %vm95_vm1, %v80_v54 }
  0x29   :  { %1669 = vmatprep.mubr.msk.f32.mxu0 %vm95_vm1, %v47_v21  ;;  %1720 = vmatprep.mubr.msk.f32.mxu1 %vm95_vm1, %v81_v55 }
  0x2c   :  { %1670 = vmatmul.mubr.msk.f32.gmra.mrb[18].mxu0 %vm95_vm1, %v48_v22  ;;  %1721 = vmatmul.mubr.msk.f32.gmra.mrb[14].mxu1 %vm95_vm1, %v82_v59 }
  0x2d   :  { %1672 = vmatprep.mubr.msk.f32.mxu0 %vm95_vm1, %v49_v23  ;;  %1723 = vmatprep.mubr.msk.f32.mxu1 %vm95_vm1, %v83_v61 }
  0x30   :  { %1673 = vmatmul.mubr.msk.f32.gmra.mrb[20].mxu0 %vm95_vm1, %v50_v24  ;;  %1724 = vmatmul.mubr.msk.f32.gmra.mrb[16].mxu1 %vm95_vm1, %v84_v62 }
  0x31   :  { %1675 = vmatprep.mubr.msk.f32.mxu0 %vm95_vm1, %v51_v25  ;;  %1726 = vmatprep.mubr.msk.f32.mxu1 %vm95_vm1, %v85_v63 }
  0x34   :  { %1676 = vmatmul.mubr.msk.f32.gmra.mrb[22].mxu0 %vm95_vm1, %v52_v26  ;;  %1727 = vmatmul.mubr.msk.f32.gmra.mrb[18].mxu1 %vm95_vm1, %v86_v0 }
  0x35   :  { %1678 = vmatprep.mubr.msk.f32.mxu0 %vm95_vm1, %v53_v27  ;;  %1729 = vmatprep.mubr.msk.f32.mxu1 %vm95_vm1, %v87_v1 }
  0x38   :  { %1679 = vmatmul.mubr.msk.f32.gmra.mrb[24].mxu0 %vm95_vm1, %v54_v28  ;;  %1730 = vmatmul.mubr.msk.f32.gmra.mrb[20].mxu1 %vm95_vm1, %v88_v2 }
  0x39   :  { %1681 = vmatprep.mubr.msk.f32.mxu0 %vm95_vm1, %v55_v29  ;;  %1732 = vmatprep.mubr.msk.f32.mxu1 %vm95_vm1, %v89_v3 }
  0x3c   :  { %1682 = vmatmul.mubr.msk.f32.gmra.mrb[26].mxu0 %vm95_vm1, %v56_v30  ;;  %1733 = vmatmul.mubr.msk.f32.gmra.mrb[22].mxu1 %vm95_vm1, %v90_v4 }
  0x3d   :  { %1684 = vmatprep.mubr.msk.f32.mxu0 %vm95_vm1, %v57_v31  ;;  %1735 = vmatprep.mubr.msk.f32.mxu1 %vm95_vm1, %v91_v5 }
  0x40   :  { %1685 = vmatmul.mubr.msk.f32.gmra.mrb[28].mxu0 %vm95_vm1, %v58_v32  ;;  %1736 = vmatmul.mubr.msk.f32.gmra.mrb[24].mxu1 %vm95_vm1, %v92_v6 }
  0x41   :  { %1687 = vmatprep.mubr.msk.f32.mxu0 %vm95_vm1, %v59_v33  ;;  %1746 = vmatprep.mubr.msk.f32.mxu1 %vm1804_vm4, %v3193_v10 }
  0x44   :  { %1688 = vmatmul.mubr.msk.f32.gmra.mrb[30].mxu0 %vm95_vm1, %v60_v34 }
  0x45   :  { %1690 = vmatprep.mubr.msk.f32.mxu0 %vm95_vm1, %v61_v35 }
  0x48   :  { %1691 = vmatmul.mubr.msk.f32.gmra.mrb[32].mxu0 %vm95_vm1, %v62_v36 }
  0x49   :  { %1693 = vmatprep.mubr.msk.f32.mxu0 %vm95_vm1, %v63_v37 }
  0x4c   :  { %1694 = vmatmul.mubr.msk.f32.gmra.mrb[34].mxu0 %vm95_vm1, %v64_v38 }
  0x4d   :  { %1696 = vmatprep.mubr.msk.f32.mxu0 %vm95_vm1, %v65_v39 }
  0x50   :  { %1697 = vmatmul.mubr.msk.f32.gmra.mrb[36].mxu0 %vm95_vm1, %v66_v40 }
  0xdb   :  { %v1644_v12 = vpop.f32.mrb[0].mxu0 }
  0xdc   :  { %v685_v14 = vmul.f32 %v1644_v12, %v2139_v11  ;;  %v358_v15 = vpop.f32.mrb[1].mxu0 }
  0xdd   :  { %v684_v16 = vmul.f32 %v2139_v11, %v358_v15 }
  0xde   :  { %v2149_v17 = vadd.f32 %v2144_v13, %v685_v14 }
  0xdf   :  { %v2152_v18 = vadd.f32 %v2144_v13, %v684_v16  ;;  %v1647_v19 = vpop.f32.mrb[2].mxu0 }
  0xe0   :  { %v3191_v20 = vmax.f32 %v2149_v17, 0.0  ;;  %v687_v21 = vmul.f32 %v1647_v19, %v2139_v11  ;;  %v368_v22 = vpop.f32.mrb[3].mxu0 }
  0xe1   :  { %v3192_v23 = vmax.f32 %v2152_v18, 0.0  ;;  %v686_v24 = vmul.f32 %v2139_v11, %v368_v22 }
  0xe2   :  { %v2159_v25 = vadd.f32 %v2144_v13, %v687_v21  ;;  %v892_v26 = vsel %vm890_vm5, %v3191_v20, 0.0 }
  0xe3   :  { %v891_v27 = vsel %vm890_vm5, %v3192_v23, 0.0  ;;  %v2168_v28 = vadd.f32 %v2144_v13, %v686_v24  ;;  %v1650_v29 = vpop.f32.mrb[4].mxu0 }
  0xe4   :  { %v689_v30 = vmul.f32 %v1650_v29, %v2139_v11  ;;  %v378_v31 = vpop.f32.mrb[5].mxu0  ;;  %v3189_v32 = vmax.f32 %v2159_v25, 0.0  ;;  %v893_v35 = vadd.f32 %v892_v26, %v891_v27 }
  0xe5   :  { %v3190_v33 = vmax.f32 %v2168_v28, 0.0  ;;  %v688_v34 = vmul.f32 %v2139_v11, %v378_v31 }
  0xe6   :  { %v2175_v36 = vadd.f32 %v2144_v13, %v689_v30  ;;  %v896_v43 = vsel %vm890_vm5, %v3189_v32, 0.0 }
  0xe7   :  { %v894_v37 = vsel %vm890_vm5, %v3190_v33, 0.0  ;;  %v2181_v38 = vadd.f32 %v2144_v13, %v688_v34  ;;  %v1653_v39 = vpop.f32.mrb[6].mxu0 }
  0xe8   :  { %v895_v40 = vadd.f32 %v894_v37, %v893_v35  ;;  %v691_v41 = vmul.f32 %v1653_v39, %v2139_v11  ;;  %v388_v42 = vpop.f32.mrb[7].mxu0  ;;  %v3187_v44 = vmax.f32 %v2175_v36, 0.0 }
  0xe9   :  { %v3188_v45 = vmax.f32 %v2181_v38, 0.0  ;;  %v690_v46 = vmul.f32 %v2139_v11, %v388_v42 }
  0xea   :  { %v897_v47 = vadd.f32 %v896_v43, %v895_v40  ;;  %v2191_v48 = vadd.f32 %v2144_v13, %v691_v41  ;;  %v900_v55 = vsel %vm890_vm5, %v3187_v44, 0.0 }
  0xeb   :  { %v898_v49 = vsel %vm890_vm5, %v3188_v45, 0.0  ;;  %v2197_v50 = vadd.f32 %v2144_v13, %v690_v46  ;;  %v1656_v51 = vpop.f32.mrb[8].mxu0 }
  0xec   :  { %v899_v52 = vadd.f32 %v898_v49, %v897_v47  ;;  %v693_v53 = vmul.f32 %v1656_v51, %v2139_v11  ;;  %v398_v54 = vpop.f32.mrb[9].mxu0  ;;  %v3185_v57 = vmax.f32 %v2191_v48, 0.0 }
  0xed   :  { %v3186_v58 = vmax.f32 %v2197_v50, 0.0  ;;  %v692_v59 = vmul.f32 %v2139_v11, %v398_v54 }
  0xee   :  { %v901_v61 = vadd.f32 %v900_v55, %v899_v52  ;;  %v2207_v62 = vadd.f32 %v2144_v13, %v693_v53  ;;  %v904_v5 = vsel %vm890_vm5, %v3185_v57, 0.0 }
  0xef   :  { %v902_v63 = vsel %vm890_vm5, %v3186_v58, 0.0  ;;  %v2213_v0 = vadd.f32 %v2144_v13, %v692_v59  ;;  %v1659_v1 = vpop.f32.mrb[10].mxu0 }
  0xf0   :  { %v903_v2 = vadd.f32 %v902_v63, %v901_v61  ;;  %v695_v3 = vmul.f32 %v1659_v1, %v2139_v11  ;;  %v408_v4 = vpop.f32.mrb[11].mxu0  ;;  %v3181_v6 = vmax.f32 %v2207_v62, 0.0 }
  0xf1   :  { %v3184_v7 = vmax.f32 %v2213_v0, 0.0  ;;  %v694_v8 = vmul.f32 %v2139_v11, %v408_v4 }
  0xf2   :  { %v905_v12 = vadd.f32 %v904_v5, %v903_v2  ;;  %v2223_v14 = vadd.f32 %v2144_v13, %v695_v3  ;;  %v908_v26 = vsel %vm890_vm5, %v3181_v6, 0.0 }
  0xf3   :  { %v906_v15 = vsel %vm890_vm5, %v3184_v7, 0.0  ;;  %v2229_v16 = vadd.f32 %v2144_v13, %v694_v8  ;;  %v1662_v19 = vpop.f32.mrb[12].mxu0 }
  0xf4   :  { %v907_v21 = vadd.f32 %v906_v15, %v905_v12  ;;  %v697_v22 = vmul.f32 %v1662_v19, %v2139_v11  ;;  %v418_v24 = vpop.f32.mrb[13].mxu0  ;;  %v3179_v27 = vmax.f32 %v2223_v14, 0.0 }
  0xf5   :  { %v3180_v29 = vmax.f32 %v2229_v16, 0.0  ;;  %v696_v30 = vmul.f32 %v2139_v11, %v418_v24 }
  0xf6   :  { %v909_v31 = vadd.f32 %v908_v26, %v907_v21  ;;  %v2239_v34 = vadd.f32 %v2144_v13, %v697_v22  ;;  %v912_v43 = vsel %vm890_vm5, %v3179_v27, 0.0 }
  0xf7   :  { %v910_v35 = vsel %vm890_vm5, %v3180_v29, 0.0  ;;  %v2245_v37 = vadd.f32 %v2144_v13, %v696_v30  ;;  %v1665_v39 = vpop.f32.mrb[14].mxu0 }
  0xf8   :  { %v911_v40 = vadd.f32 %v910_v35, %v909_v31  ;;  %v699_v41 = vmul.f32 %v1665_v39, %v2139_v11  ;;  %v428_v42 = vpop.f32.mrb[15].mxu0  ;;  %v3176_v46 = vmax.f32 %v2239_v34, 0.0 }
  0xf9   :  { %v3177_v47 = vmax.f32 %v2245_v37, 0.0  ;;  %v698_v49 = vmul.f32 %v2139_v11, %v428_v42 }
  0xfa   :  { %v913_v51 = vadd.f32 %v912_v43, %v911_v40  ;;  %v2255_v52 = vadd.f32 %v2144_v13, %v699_v41  ;;  %v916_v1 = vsel %vm890_vm5, %v3176_v46, 0.0 }
  0xfb   :  { %v914_v53 = vsel %vm890_vm5, %v3177_v47, 0.0  ;;  %v2261_v54 = vadd.f32 %v2144_v13, %v698_v49  ;;  %v1668_v55 = vpop.f32.mrb[16].mxu0 }
  0xfc   :  { %v915_v59 = vadd.f32 %v914_v53, %v913_v51  ;;  %v701_v61 = vmul.f32 %v1668_v55, %v2139_v11  ;;  %v438_v63 = vpop.f32.mrb[17].mxu0  ;;  %v3171_v2 = vmax.f32 %v2255_v52, 0.0 }
  0xfd   :  { %v3172_v3 = vmax.f32 %v2261_v54, 0.0  ;;  %v700_v4 = vmul.f32 %v2139_v11, %v438_v63 }
  0xfe   :  { %v917_v5 = vadd.f32 %v916_v1, %v915_v59  ;;  %v2271_v8 = vadd.f32 %v2144_v13, %v701_v61  ;;  %v920_v26 = vsel %vm890_vm5, %v3171_v2, 0.0 }
  0xff   :  { %v918_v12 = vsel %vm890_vm5, %v3172_v3, 0.0  ;;  %v2277_v15 = vadd.f32 %v2144_v13, %v700_v4  ;;  %v1671_v19 = vpop.f32.mrb[18].mxu0 }
 0x100   :  { %v919_v21 = vadd.f32 %v918_v12, %v917_v5  ;;  %v703_v22 = vmul.f32 %v1671_v19, %v2139_v11  ;;  %v448_v24 = vpop.f32.mrb[19].mxu0  ;;  %v3167_v30 = vmax.f32 %v2271_v8, 0.0 }
 0x101   :  { %v3168_v31 = vmax.f32 %v2277_v15, 0.0  ;;  %v702_v35 = vmul.f32 %v2139_v11, %v448_v24 }
 0x102   :  { %v921_v39 = vadd.f32 %v920_v26, %v919_v21  ;;  %v2287_v40 = vadd.f32 %v2144_v13, %v703_v22  ;;  %v924_v55 = vsel %vm890_vm5, %v3167_v30, 0.0 }
 0x103   :  { %v922_v41 = vsel %vm890_vm5, %v3168_v31, 0.0  ;;  %v2293_v42 = vadd.f32 %v2144_v13, %v702_v35  ;;  %v1674_v43 = vpop.f32.mrb[20].mxu0 }
 0x104   :  { %3248 = vst [vmem:[#allocation2_spill] sm:$0xff] %v2287_v40  ;;  %v923_v49 = vadd.f32 %v922_v41, %v921_v39  ;;  %v705_v51 = vmul.f32 %v1674_v43, %v2139_v11  ;;  %v458_v53 = vpop.f32.mrb[21].mxu0  ;;  %v3163_v59 = vmax.f32 %v2287_v40, 0.0 }
 0x105   :  { %3249 = vst [vmem:[#allocation3_spill] sm:$0xff] %v2293_v42  ;;  %v3164_v61 = vmax.f32 %v2293_v42, 0.0  ;;  %v704_v63 = vmul.f32 %v2139_v11, %v458_v53 }
 0x106   :  { %v925_v1 = vadd.f32 %v924_v55, %v923_v49  ;;  %v2303_v4 = vadd.f32 %v2144_v13, %v705_v51  ;;  %v928_v26 = vsel %vm890_vm5, %v3163_v59, 0.0 }
 0x107   :  { %v926_v5 = vsel %vm890_vm5, %v3164_v61, 0.0  ;;  %v2309_v12 = vadd.f32 %v2144_v13, %v704_v63  ;;  %v1677_v19 = vpop.f32.mrb[22].mxu0 }
 0x108   :  { %3250 = vst [vmem:[#allocation4_spill] sm:$0xff] %v2303_v4  ;;  %v927_v21 = vadd.f32 %v926_v5, %v925_v1  ;;  %v707_v22 = vmul.f32 %v1677_v19, %v2139_v11  ;;  %v468_v24 = vpop.f32.mrb[23].mxu0  ;;  %v3162_v35 = vmax.f32 %v2303_v4, 0.0 }
 0x109   :  { %3251 = vst [vmem:[#allocation5_spill] sm:$0xff] %v2309_v12  ;;  %v3161_v39 = vmax.f32 %v2309_v12, 0.0  ;;  %v706_v41 = vmul.f32 %v2139_v11, %v468_v24 }
 0x10a   :  { %v929_v43 = vadd.f32 %v928_v26, %v927_v21  ;;  %v2319_v49 = vadd.f32 %v2144_v13, %v707_v22  ;;  %v932_v19 = vsel %vm890_vm5, %v3162_v35, 0.0 }
 0x10b   :  { %v930_v51 = vsel %vm890_vm5, %v3161_v39, 0.0  ;;  %v2325_v53 = vadd.f32 %v2144_v13, %v706_v41  ;;  %v1680_v55 = vpop.f32.mrb[24].mxu0 }
 0x10c   :  { %3252 = vst [vmem:[#allocation6_spill] sm:$0xff] %v2319_v49  ;;  %v931_v63 = vadd.f32 %v930_v51, %v929_v43  ;;  %v709_v1 = vmul.f32 %v1680_v55, %v2139_v11  ;;  %v478_v5 = vpop.f32.mrb[25].mxu0  ;;  %v3166_v21 = vmax.f32 %v2319_v49, 0.0 }
 0x10d   :  { %3253 = vst [vmem:[#allocation7_spill] sm:$0xff] %v2325_v53  ;;  %v3165_v22 = vmax.f32 %v2325_v53, 0.0  ;;  %v708_v24 = vmul.f32 %v2139_v11, %v478_v5 }
 0x10e   :  { %v933_v26 = vadd.f32 %v932_v19, %v931_v63  ;;  %v2335_v39 = vadd.f32 %v2144_v13, %v709_v1  ;;  %v936_v5 = vsel %vm890_vm5, %v3166_v21, 0.0 }
 0x10f   :  { %v934_v41 = vsel %vm890_vm5, %v3165_v22, 0.0  ;;  %v2341_v43 = vadd.f32 %v2144_v13, %v708_v24  ;;  %v1683_v51 = vpop.f32.mrb[26].mxu0 }
 0x110   :  { %3254 = vst [vmem:[#allocation8_spill] sm:$0xff] %v2335_v39  ;;  %v935_v55 = vadd.f32 %v934_v41, %v933_v26  ;;  %v711_v35 = vmul.f32 %v1683_v51, %v2139_v11  ;;  %v488_v59 = vpop.f32.mrb[27].mxu0  ;;  %v3170_v63 = vmax.f32 %v2335_v39, 0.0 }
 0x111   :  { %3255 = vst [vmem:[#allocation9_spill] sm:$0xff] %v2341_v43  ;;  %v3169_v1 = vmax.f32 %v2341_v43, 0.0  ;;  %v710_v19 = vmul.f32 %v2139_v11, %v488_v59 }
 0x112   :  { %v937_v61 = vadd.f32 %v936_v5, %v935_v55  ;;  %v2351_v22 = vadd.f32 %v2144_v13, %v711_v35  ;;  %v940_v59 = vsel %vm890_vm5, %v3170_v63, 0.0 }
 0x113   :  { %v938_v24 = vsel %vm890_vm5, %v3169_v1, 0.0  ;;  %v2357_v26 = vadd.f32 %v2144_v13, %v710_v19  ;;  %v1686_v41 = vpop.f32.mrb[28].mxu0 }
 0x114   :  { %3256 = vst [vmem:[#allocation10_spill] sm:$0xff] %v2351_v22  ;;  %v939_v51 = vadd.f32 %v938_v24, %v937_v61  ;;  %v713_v21 = vmul.f32 %v1686_v41, %v2139_v11  ;;  %v498_v30 = vpop.f32.mrb[29].mxu0  ;;  %v3174_v55 = vmax.f32 %v2351_v22, 0.0 }
 0x115   :  { %3257 = vst [vmem:[#allocation11_spill] sm:$0xff] %v2357_v26  ;;  %v3173_v35 = vmax.f32 %v2357_v26, 0.0  ;;  %v712_v5 = vmul.f32 %v2139_v11, %v498_v30 }
 0x116   :  { %v941_v31 = vadd.f32 %v940_v59, %v939_v51  ;;  %v2367_v1 = vadd.f32 %v2144_v13, %v713_v21  ;;  %v944_v30 = vsel %vm890_vm5, %v3174_v55, 0.0 }
 0x117   :  { %v942_v61 = vsel %vm890_vm5, %v3173_v35, 0.0  ;;  %v2373_v19 = vadd.f32 %v2144_v13, %v712_v5  ;;  %v1689_v24 = vpop.f32.mrb[30].mxu0 }
 0x118   :  { %3258 = vst [vmem:[#allocation12_spill] sm:$0xff] %v2367_v1  ;;  %v943_v41 = vadd.f32 %v942_v61, %v941_v31  ;;  %v715_v63 = vmul.f32 %v1689_v24, %v2139_v11  ;;  %v508_v2 = vpop.f32.mrb[31].mxu0  ;;  %v3178_v51 = vmax.f32 %v2367_v1, 0.0 }
 0x119   :  { %3259 = vst [vmem:[#allocation13_spill] sm:$0xff] %v2373_v19  ;;  %v3175_v21 = vmax.f32 %v2373_v19, 0.0  ;;  %v714_v59 = vmul.f32 %v2139_v11, %v508_v2 }
 0x11a   :  { %v945_v3 = vadd.f32 %v944_v30, %v943_v41  ;;  %v2383_v35 = vadd.f32 %v2144_v13, %v715_v63  ;;  %v948_v24 = vsel %vm890_vm5, %v3178_v51, 0.0 }
 0x11b   :  { %v946_v31 = vsel %vm890_vm5, %v3175_v21, 0.0  ;;  %v2389_v5 = vadd.f32 %v2144_v13, %v714_v59  ;;  %v1692_v6 = vpop.f32.mrb[32].mxu0 }
 0x11c   :  { %3260 = vst [vmem:[#allocation14_spill] sm:$0xff] %v2383_v35  ;;  %v947_v61 = vadd.f32 %v946_v31, %v945_v3  ;;  %v3183_v55 = vmax.f32 %v2383_v35, 0.0  ;;  %v717_v1 = vmul.f32 %v1692_v6, %v2139_v11 }
 0x11d   :  { %3261 = vst [vmem:[#allocation15_spill] sm:$0xff] %v2389_v5  ;;  %v3182_v2 = vmax.f32 %v2389_v5, 0.0 }
 0x11e   :  { %v949_v41 = vadd.f32 %v948_v24, %v947_v61  ;;  %v952_v59 = vsel %vm890_vm5, %v3183_v55, 0.0  ;;  %v518_v61 = vpop.f32.mrb[33].mxu0  ;;  %v1701_v55 = vpop.f32.mrb[0].mxu1  ;;  %v2454_v39 = vadd.f32 %v2144_v13, %v717_v1 }
 0x11f   :  { %v950_v63 = vsel %vm890_vm5, %v3182_v2, 0.0  ;;  %v1695_v24 = vpop.f32.mrb[34].mxu0  ;;  %v716_v19 = vmul.f32 %v2139_v11, %v518_v61 }
 0x120   :  { %v951_v30 = vadd.f32 %v950_v63, %v949_v41  ;;  %v528_v41 = vpop.f32.mrb[35].mxu0  ;;  %3262 = vst [vmem:[#allocation16_spill] sm:$0xff] %v2454_v39  ;;  %v3211_v53 = vmax.f32 %v2454_v39, 0.0  ;;  %v719_v6 = vmul.f32 %v1695_v24, %v2139_v11 }
 0x121   :  { %v2457_v43 = vadd.f32 %v2144_v13, %v716_v19  ;;  %v718_v49 = vmul.f32 %v2139_v11, %v528_v41 }
 0x122   :  { %v953_v21 = vadd.f32 %v952_v59, %v951_v30  ;;  %v548_v30 = vpop.f32.mrb[1].mxu1  ;;  %v1189_v12 = vsel %vm890_vm5, %v3211_v53, 0.0  ;;  %v2473_v19 = vadd.f32 %v2144_v13, %v719_v6 }
 0x123   :  { %v1698_v63 = vpop.f32.mrb[36].mxu0  ;;  %v2405_v59 = vpop.f32.mrb[2].mxu1  ;;  %3263 = vst [vmem:[#allocation17_spill] sm:$0xff] %v2457_v43  ;;  %v3213_v4 = vmax.f32 %v2457_v43, 0.0  ;;  %v2464_v61 = vadd.f32 %v2144_v13, %v718_v49 }
 0x124   :  { %v954_v3 = vrot.slane %v953_v21, 4  ;;  %v538_v2 = vpop.f32.mrb[37].mxu0  ;;  %v3217_v24 = vmax.f32 %v2473_v19, 0.0  ;;  %v721_v53 = vmul.f32 %v1698_v63, %v2139_v11 }
 0x125   :  { %v1188_v1 = vsel %vm890_vm5, %v3213_v4, 0.0  ;;  %v3215_v41 = vmax.f32 %v2464_v61, 0.0  ;;  %v720_v40 = vmul.f32 %v2139_v11, %v538_v2  ;;  %v722_v2 = vmul.f32 %v2139_v11, %v548_v30 }
 0x126   :  { %v955_v31 = vadd.f32 %v954_v3, %v953_v21  ;;  %v558_v21 = vpop.f32.mrb[3].mxu1  ;;  %v1190_v42 = vadd.f32 %v1189_v12, %v1188_v1  ;;  %v1193_v6 = vsel %vm890_vm5, %v3217_v24, 0.0  ;;  %v2489_v43 = vadd.f32 %v2144_v13, %v721_v53  ;;  %v2504_v53 = vld [vmem:[%s3157_s6] sm:$0x3] }
 0x127   :  { %v1191_v49 = vsel %vm890_vm5, %v3215_v41, 0.0  ;;  %v2483_v39 = vadd.f32 %v2144_v13, %v720_v40  ;;  %v2499_v63 = vadd.f32 %v2144_v13, %v722_v2  ;;  %v3266_v2 = vmov 0.0|0.0  }
 0x128   :  { %v956_v46 = vrot.slane %v955_v31, 2  ;;  %v1192_v4 = vadd.f32 %v1191_v49, %v1190_v42  ;;  %3264 = vst [vmem:[#allocation18_spill] sm:$0xff] %v2489_v43  ;;  %v3218_v41 = vmax.f32 %v2489_v43, 0.0  ;;  %v723_v42 = vmul.f32 %v1701_v55, %v2139_v11 }
 0x129   :  { %v3216_v12 = vmax.f32 %v2483_v39, 0.0  ;;  %3265 = vst [vmem:[#allocation19_spill] sm:$0xff] %v2499_v63  ;;  %v3220_v55 = vmax.f32 %v2499_v63, 0.0 }
 0x12a   :  { %v957_v47 = vadd.f32 %v956_v46, %v955_v31  ;;  %v2407_v46 = vpop.f32.mrb[4].mxu1  ;;  %v1194_v1 = vadd.f32 %v1193_v6, %v1192_v4  ;;  %v1197_v4 = vsel %vm890_vm5, %v3218_v41, 0.0  ;;  %v2512_v30 = vadd.f32 %v2144_v13, %v723_v42 }
 0x12b   :  { %v1195_v40 = vsel %vm890_vm5, %v3216_v12, 0.0  ;;  %v724_v6 = vmul.f32 %v2139_v11, %v558_v21 }
 0x12c   :  { %v958_v51 = vrot.slane %v957_v47, 1  ;;  %v1196_v49 = vadd.f32 %v1195_v40, %v1194_v1  ;;  %v3223_v24 = vmax.f32 %v2512_v30, 0.0  ;;  %v1199_v1 = vsel %vm890_vm5, %v3220_v55, 0.0 }
 0x12d   :  { %v725_v40 = vmul.f32 %v2405_v59, %v2139_v11  ;;  %v2524_v41 = vadd.f32 %v2144_v13, %v724_v6 }
 0x12e   :  { %v959_v27 = vadd.f32 %v958_v51, %v957_v47  ;;  %v2409_v47 = vpop.f32.mrb[5].mxu1  ;;  %v1198_v12 = vadd.f32 %v1197_v4, %v1196_v49  ;;  %v1201_v21 = vsel %vm890_vm5, %v3223_v24, 0.0 }
 0x12f   :  { %v2530_v43 = vadd.f32 %v2144_v13, %v725_v40  ;;  %v3222_v49 = vmax.f32 %v2524_v41, 0.0  ;;  %v726_v4 = vmul.f32 %v2139_v11, %v2409_v47 }
 0x130   :  { %v961_v29 = vmul.f32 0.00390625, %v959_v27  ;;  %v2411_v27 = vpop.f32.mrb[6].mxu1  ;;  %v1200_v42 = vadd.f32 %v1199_v1, %v1198_v12  ;;  %v727_v12 = vmul.f32 %v2407_v46, %v2139_v11 }
 0x131   :  { %v3225_v63 = vmax.f32 %v2530_v43, 0.0  ;;  %v1203_v59 = vsel %vm890_vm5, %v3222_v49, 0.0  ;;  %v2542_v6 = vadd.f32 %v2144_v13, %v726_v4 }
 0x132   :  { %1747 = vmatmul.mubr.msk.f32.vlgmr.msra.gmra.mrb[26].mxu1 %vm890_vm5, %v961_v29  ;;  %v2413_v29 = vpop.f32.mrb[7].mxu1  ;;  %v1202_v55 = vadd.f32 %v1201_v21, %v1200_v42  ;;  %v2548_v47 = vadd.f32 %v2144_v13, %v727_v12 }
 0x133   :  { %1751 = vmatprep.mubr.msk.f32.mxu1 %vm1804_vm4, %v3193_v10  ;;  %v2415_v51 = vpop.f32.mrb[8].mxu1  ;;  %1750 = vmatpush3.msk.msra.mxu1 %vm1040_vm6, %v2504_v53  ;;  %v1205_v40 = vsel %vm890_vm5, %v3225_v63, 0.0  ;;  %v3224_v42 = vmax.f32 %v2542_v6, 0.0  ;;  %v728_v21 = vmul.f32 %v2139_v11, %v2413_v29 }
 0x134   :  { %v2417_v3 = vpop.f32.mrb[9].mxu1  ;;  %1782 = vmatprep.subr.bf16.mxu1 %v3266_v2  ;;  %v1204_v1 = vadd.f32 %v1203_v59, %v1202_v55  ;;  %v3227_v24 = vmax.f32 %v2548_v47, 0.0  ;;  %v729_v55 = vmul.f32 %v2411_v27, %v2139_v11 }
 0x135   :  { %v2419_v31 = vpop.f32.mrb[10].mxu1  ;;  %v1207_v46 = vsel %vm890_vm5, %v3224_v42, 0.0  ;;  %v2560_v4 = vadd.f32 %v2144_v13, %v728_v21 }
 0x136   :  { %v2421_v7 = vpop.f32.mrb[11].mxu1  ;;  %v1206_v49 = vadd.f32 %v1205_v40, %v1204_v1  ;;  %v1209_v12 = vsel %vm890_vm5, %v3227_v24, 0.0  ;;  %v2566_v29 = vadd.f32 %v2144_v13, %v729_v55  ;;  %v730_v40 = vmul.f32 %v2139_v11, %v2417_v3 }
 0x137   :  { %v2423_v57 = vpop.f32.mrb[12].mxu1  ;;  %v3226_v1 = vmax.f32 %v2560_v4, 0.0 }
 0x138   :  { %v2425_v58 = vpop.f32.mrb[13].mxu1  ;;  %v1208_v59 = vadd.f32 %v1207_v46, %v1206_v49  ;;  %v3229_v63 = vmax.f32 %v2566_v29, 0.0  ;;  %v731_v49 = vmul.f32 %v2415_v51, %v2139_v11  ;;  %v2578_v21 = vadd.f32 %v2144_v13, %v730_v40 }
 0x139   :  { %v2427_v44 = vpop.f32.mrb[14].mxu1  ;;  %v1211_v27 = vsel %vm890_vm5, %v3226_v1, 0.0 }
 0x13a   :  { %v2429_v45 = vpop.f32.mrb[15].mxu1  ;;  %v1210_v42 = vadd.f32 %v1209_v12, %v1208_v59  ;;  %v1213_v55 = vsel %vm890_vm5, %v3229_v63, 0.0  ;;  %v2584_v3 = vadd.f32 %v2144_v13, %v731_v49  ;;  %v3228_v59 = vmax.f32 %v2578_v21, 0.0 }
 0x13b   :  { %v2431_v32 = vpop.f32.mrb[16].mxu1  ;;  %v732_v12 = vmul.f32 %v2139_v11, %v2421_v7 }
 0x13c   :  { %v2433_v33 = vpop.f32.mrb[17].mxu1  ;;  %v1212_v46 = vadd.f32 %v1211_v27, %v1210_v42  ;;  %v3231_v24 = vmax.f32 %v2584_v3, 0.0  ;;  %v1215_v51 = vsel %vm890_vm5, %v3228_v59, 0.0  ;;  %v733_v42 = vmul.f32 %v2419_v31, %v2139_v11 }
 0x13d   :  { %v2435_v20 = vpop.f32.mrb[18].mxu1  ;;  %v2596_v40 = vadd.f32 %v2144_v13, %v732_v12 }
 0x13e   :  { %v2437_v23 = vpop.f32.mrb[19].mxu1  ;;  %v1214_v1 = vadd.f32 %v1213_v55, %v1212_v46  ;;  %v1217_v49 = vsel %vm890_vm5, %v3231_v24, 0.0  ;;  %v2602_v7 = vadd.f32 %v2144_v13, %v733_v42  ;;  %v734_v55 = vmul.f32 %v2139_v11, %v2425_v58 }
 0x13f   :  { %v2439_v10 = vpop.f32.mrb[20].mxu1  ;;  %v3230_v46 = vmax.f32 %v2596_v40, 0.0 }
 0x140   :  { %v2441_v56 = vpop.f32.mrb[21].mxu1  ;;  %v1216_v27 = vadd.f32 %v1215_v51, %v1214_v1  ;;  %v3233_v63 = vmax.f32 %v2602_v7, 0.0  ;;  %v735_v1 = vmul.f32 %v2423_v57, %v2139_v11  ;;  %v2614_v12 = vadd.f32 %v2144_v13, %v734_v55 }
 0x141   :  { %v2443_v35 = vpop.f32.mrb[22].mxu1  ;;  %v1219_v31 = vsel %vm890_vm5, %v3230_v46, 0.0 }
 0x142   :  { %v2445_v5 = vpop.f32.mrb[23].mxu1  ;;  %v1218_v59 = vadd.f32 %v1217_v49, %v1216_v27  ;;  %v1221_v42 = vsel %vm890_vm5, %v3233_v63, 0.0  ;;  %v2620_v58 = vadd.f32 %v2144_v13, %v735_v1  ;;  %v3232_v27 = vmax.f32 %v2614_v12, 0.0 }
 0x143   :  { %v2449_v22 = vpop.f32.mrb[24].mxu1  ;;  %v736_v49 = vmul.f32 %v2139_v11, %v2429_v45 }
 0x144   :  { %v2451_v26 = vpop.f32.mrb[25].mxu1  ;;  %v1220_v51 = vadd.f32 %v1219_v31, %v1218_v59  ;;  %v3235_v24 = vmax.f32 %v2620_v58, 0.0  ;;  %v1223_v57 = vsel %vm890_vm5, %v3232_v27, 0.0  ;;  %v737_v59 = vmul.f32 %v2427_v44, %v2139_v11 }
 0x145   :  { %v2632_v55 = vadd.f32 %v2144_v13, %v736_v49 }
 0x146   :  { %v1222_v46 = vadd.f32 %v1221_v42, %v1220_v51  ;;  %v1225_v1 = vsel %vm890_vm5, %v3235_v24, 0.0  ;;  %v2638_v45 = vadd.f32 %v2144_v13, %v737_v59  ;;  %v738_v42 = vmul.f32 %v2139_v11, %v2433_v33 }
 0x147   :  { %v3234_v51 = vmax.f32 %v2632_v55, 0.0 }
 0x148   :  { %v1224_v31 = vadd.f32 %v1223_v57, %v1222_v46  ;;  %v3237_v63 = vmax.f32 %v2638_v45, 0.0  ;;  %v739_v46 = vmul.f32 %v2431_v32, %v2139_v11  ;;  %v2650_v49 = vadd.f32 %v2144_v13, %v738_v42 }
 0x149   :  { %v1227_v44 = vsel %vm890_vm5, %v3234_v51, 0.0 }
 0x14a   :  { %v1226_v27 = vadd.f32 %v1225_v1, %v1224_v31  ;;  %v1229_v59 = vsel %vm890_vm5, %v3237_v63, 0.0  ;;  %v2656_v33 = vadd.f32 %v2144_v13, %v739_v46  ;;  %v3236_v31 = vmax.f32 %v2650_v49, 0.0 }
 0x14b   :  { %v740_v1 = vmul.f32 %v2139_v11, %v2437_v23 }
 0x14c   :  { %v1228_v57 = vadd.f32 %v1227_v44, %v1226_v27  ;;  %v3239_v24 = vmax.f32 %v2656_v33, 0.0  ;;  %v1231_v32 = vsel %vm890_vm5, %v3236_v31, 0.0  ;;  %v741_v27 = vmul.f32 %v2435_v20, %v2139_v11 }
 0x14d   :  { %v2668_v42 = vadd.f32 %v2144_v13, %v740_v1 }
 0x14e   :  { %v1230_v51 = vadd.f32 %v1229_v59, %v1228_v57  ;;  %v1233_v46 = vsel %vm890_vm5, %v3239_v24, 0.0  ;;  %v2674_v23 = vadd.f32 %v2144_v13, %v741_v27  ;;  %v742_v59 = vmul.f32 %v2139_v11, %v2441_v56 }
 0x14f   :  { %v3238_v57 = vmax.f32 %v2668_v42, 0.0 }
 0x150   :  { %v1232_v44 = vadd.f32 %v1231_v32, %v1230_v51  ;;  %v3241_v63 = vmax.f32 %v2674_v23, 0.0  ;;  %v743_v51 = vmul.f32 %v2439_v10, %v2139_v11  ;;  %v2686_v1 = vadd.f32 %v2144_v13, %v742_v59 }
 0x151   :  { %v1235_v20 = vsel %vm890_vm5, %v3238_v57, 0.0 }
 0x152   :  { %v1234_v31 = vadd.f32 %v1233_v46, %v1232_v44  ;;  %v1237_v27 = vsel %vm890_vm5, %v3241_v63, 0.0  ;;  %v2692_v56 = vadd.f32 %v2144_v13, %v743_v51  ;;  %v3240_v44 = vmax.f32 %v2686_v1, 0.0 }
 0x153   :  { %v744_v46 = vmul.f32 %v2139_v11, %v2445_v5 }
 0x154   :  { %v1236_v32 = vadd.f32 %v1235_v20, %v1234_v31  ;;  %v3242_v24 = vmax.f32 %v2692_v56, 0.0  ;;  %v1239_v10 = vsel %vm890_vm5, %v3240_v44, 0.0  ;;  %v745_v31 = vmul.f32 %v2443_v35, %v2139_v11 }
 0x155   :  { %v2704_v59 = vadd.f32 %v2144_v13, %v744_v46 }
 0x156   :  { %v1238_v57 = vadd.f32 %v1237_v27, %v1236_v32  ;;  %v1241_v51 = vsel %vm890_vm5, %v3242_v24, 0.0  ;;  %v2710_v5 = vadd.f32 %v2144_v13, %v745_v31  ;;  %v746_v27 = vmul.f32 %v2139_v11, %v2451_v26 }
 0x157   :  { %v3244_v32 = vmax.f32 %v2704_v59, 0.0 }
 0x158   :  { %v1240_v20 = vadd.f32 %v1239_v10, %v1238_v57  ;;  %3267 = vst [vmem:[#allocation20_spill] sm:$0xff] %v2710_v5  ;;  %v3243_v63 = vmax.f32 %v2710_v5, 0.0  ;;  %v747_v57 = vmul.f32 %v2449_v22, %v2139_v11  ;;  %v2722_v46 = vadd.f32 %v2144_v13, %v746_v27 }
 0x159   :  { %v1243_v35 = vsel %vm890_vm5, %v3244_v32, 0.0 }
 0x15a   :  { %v1242_v44 = vadd.f32 %v1241_v51, %v1240_v20  ;;  %3268 = vst [vmem:[#allocation21_spill] sm:$0xff] %v2722_v46  ;;  %v1245_v31 = vsel %vm890_vm5, %v3243_v63, 0.0  ;;  %v2728_v26 = vadd.f32 %v2144_v13, %v747_v57  ;;  %v3247_v20 = vmax.f32 %v2722_v46, 0.0  ;;  %v887_v13 = vld [vmem:[%s3158_s5] sm:$0x1] }
 0x15c   :  { %v1244_v10 = vadd.f32 %v1243_v35, %v1242_v44  ;;  %v882_v24 = vmax.f32 %v2728_v26, 0.0  ;;  %v1247_v11 = vsel %vm890_vm5, %v3247_v20, 0.0 }
 0x15e   :  { %v1246_v51 = vadd.f32 %v1245_v31, %v1244_v10  ;;  %v1249_v44 = vsel %vm890_vm5, %v882_v24, 0.0 }
 0x160   :  { %v1248_v22 = vadd.f32 %v1247_v11, %v1246_v51  ;;  %v3269_v51 = vmov 0.0  }
 0x162   :  { %v1250_v27 = vadd.f32 %v1249_v44, %v1248_v22 }
 0x164   :  { %v1251_v35 = vrot.slane %v1250_v27, 4 }
 0x166   :  { %v1252_v63 = vadd.f32 %v1251_v35, %v1250_v27  ;;  %v1120_v35 = vlaneseq }
 0x168   :  { %v1253_v32 = vrot.slane %v1252_v63, 2 }
 0x16a   :  { %v1254_v57 = vadd.f32 %v1253_v32, %v1252_v63 }
 0x16c   :  { %v1255_v46 = vrot.slane %v1254_v57, 1 }
 0x16e   :  { %v1256_v11 = vadd.f32 %v1255_v46, %v1254_v57  ;;  %v2760_v57 = vshrl.u32 %v1120_v35, 7 }
 0x170   :  { %v1257_v22 = vmul.f32 0.00390625, %v1256_v11  ;;  %v3270_v11 = vmax.f32 %v2152_v18, 0.0  ;;  %v3277_v18 = vmax.f32 %v2191_v48, 0.0 }
 0x205   :  { %v1031_v10 = vpop.f32.mrb[26].mxu1 }
 0x206   :  { %v1032_v31 = vadd.f32 %v1031_v10, %v887_v13  ;;  %v1748_v5 = vpop.f32.mrb[27].mxu1  ;;  %v1122_v10 = vsub.s32 0, %v2760_v57  ;;  %v3325_v57 = vld [vmem:[#allocation19_spill] sm:$0xff] }
 0x208   :  { %v1035_v20 = vmax.f32 %v1032_v31, 0.0 }
 0x20a   :  { %1752 = vmatmul.mubr.msk.f32.vlgmr.msra.gmra.mrb[28].mxu1 %vm1036_vm7, %v1035_v20 }
 0x20b   :  { %1784 = vmatpush3.bf16.msra.mxu1 %v2079_v60  ;;  %1762 = vmatprep.mubr.msk.f32.mxu1 %vm1804_vm4, %v3269_v51  ;;  %v2756_v60 = vld [vmem:[%s3159_s7] sm:$0x1] }
 0x20c   :  { %1785 = vmatprep.subr.bf16.mxu1 %v3266_v2 }
 0x20f   :  { %1787 = vmatpush3.bf16.msra.mxu1 %v2130_v9 }
 0x210   :  { %1765 = vmatprep.subr.mxu1 %v3269_v51 }
 0x212   :  { %1763 = vmatmul.mubr.msk.f32.vlgmr.msra.gmra.mrb[30].mxu1 %vm890_vm5, %v1257_v22 }
 0x213   :  { %1766 = vmatpush3.msk.msra.mxu1 %vm1040_vm6, %v2504_v53  ;;  %1767 = vmatprep.mubr.msk.f32.mxu1 %vm1804_vm4, %v3269_v51 }
 0x2dd   :  { %v1110_v63 = vpop.f32.mrb[28].mxu1 }
 0x2de   :  { %v1111_v2 = vadd.f32 %v1110_v63, %v2756_v60  ;;  %v1753_v9 = vpop.f32.mrb[29].mxu1 }
 0x2e0   :  { %v1553_v5 = vmul.f32 -1.442695, %v1111_v2  ;;  %v3272_v2 = vmax.f32 %v2168_v28, 0.0  ;;  %v3279_v28 = vmax.f32 %v2207_v62, 0.0 }
 0x2e2   :  { %1794 = vpow2.f32 %v1553_v5  ;;  %v3273_v5 = vmax.f32 %v2159_v25, 0.0  ;;  %v3280_v25 = vmax.f32 %v2229_v16, 0.0  ;;  %v3285_v16 = vmax.f32 %v2255_v52, 0.0 }
 0x2e3   :  { %v3287_v52 = vmax.f32 %v2271_v8, 0.0  ;;  %v3292_v8 = vld [vmem:[#allocation5_spill] sm:$0xff] }
 0x2e5   :  { %v1327_v32 = vpop.f32.mrb[30].mxu1 }
 0x2e6   :  { %v1328_v46 = vadd.f32 %v1327_v32, %v887_v13  ;;  %v1764_v20 = vpop.f32.mrb[31].mxu1  ;;  %v3271_v13 = vmax.f32 %v2149_v17, 0.0  ;;  %v3278_v17 = vmax.f32 %v2213_v0, 0.0  ;;  %v3284_v0 = vmax.f32 %v2261_v54, 0.0 }
 0x2e8   :  { %v1331_v44 = vmax.f32 %v1328_v46, 0.0  ;;  %v3274_v46 = vmax.f32 %v2181_v38, 0.0  ;;  %v3281_v38 = vmax.f32 %v2223_v14, 0.0 }
 0x2ea   :  { %1768 = vmatmul.mubr.msk.f32.vlgmr.msra.gmra.mrb[32].mxu1 %vm1036_vm7, %v1331_v44  ;;  %v3275_v44 = vmax.f32 %v2175_v36, 0.0  ;;  %v3282_v36 = vmax.f32 %v2245_v37, 0.0 }
 0x2ec   :  { %v1795_v53 = vpop.eup %1794 }
 0x2ed   :  { %v1117_v27 = vadd.f32 1.0, %v1795_v53 }
 0x2ef   :  { %1796 = vrcp.f32 %v1117_v27  ;;  %v3276_v27 = vmax.f32 %v2197_v50, 0.0  ;;  %v3283_v50 = vmax.f32 %v2239_v34, 0.0  ;;  %v3286_v34 = vmax.f32 %v2277_v15, 0.0 }
 0x2f0   :  { %v3293_v15 = vmax.f32 %v3292_v8, 0.0  ;;  %v3312_v8 = vld [vmem:[#allocation15_spill] sm:$0xff] }
 0x2f9   :  { %v1797_v31 = vpop.eup %1796 }
 0x2fa   :  { %v1123_v51 = vrot.slane %v1797_v31, %v1122_v10 }
 0x2fc   :  { %v1124_v22 = vmul.f32 %v1123_v51, %v3270_v11  ;;  %v1125_v63 = vmul.f32 %v1123_v51, %v3271_v13  ;;  %v1126_v9 = vmul.f32 %v1123_v51, %v3272_v2  ;;  %v1127_v32 = vmul.f32 %v1123_v51, %v3273_v5 }
 0x2fd   :  { %v1128_v20 = vmul.f32 %v1123_v51, %v3274_v46  ;;  %v1129_v53 = vmul.f32 %v1123_v51, %v3275_v44  ;;  %v1130_v35 = vmul.f32 %v1123_v51, %v3276_v27  ;;  %v1131_v31 = vmul.f32 %v1123_v51, %v3277_v18  ;;  %v3290_v46 = vld [vmem:[#allocation2_spill] sm:$0xff]  ;;  %v3294_v27 = vld [vmem:[#allocation4_spill] sm:$0xff] }
 0x2fe   :  { %v1132_v11 = vmul.f32 %v1123_v51, %v3278_v17  ;;  %v1133_v13 = vmul.f32 %v1123_v51, %v3279_v28  ;;  %v1134_v2 = vmul.f32 %v1123_v51, %v3280_v25  ;;  %v1135_v5 = vmul.f32 %v1123_v51, %v3281_v38  ;;  %1156 = vst.msk [vmem:[%s3160_s8] sm:$0xff] %vm890_vm5, %v1124_v22  ;;  %v3298_v28 = vld [vmem:[#allocation6_spill] sm:$0xff] }
 0x2ff   :  { %1157 = vst.msk [vmem:[%s3160_s8 + $0x8] sm:$0xff] %vm890_vm5, %v1125_v63  ;;  %1158 = vst.msk [vmem:[%s3160_s8 + $0x10] sm:$0xff] %vm890_vm5, %v1126_v9  ;;  %v1136_v48 = vmul.f32 %v1123_v51, %v3282_v36  ;;  %v1137_v62 = vmul.f32 %v1123_v51, %v3283_v50  ;;  %v1138_v14 = vmul.f32 %v1123_v51, %v3284_v0  ;;  %v3288_v63 = vld [vmem:[#allocation3_spill] sm:$0xff]  ;;  %v3302_v36 = vld [vmem:[#allocation8_spill] sm:$0xff] }
 0x300   :  { %1159 = vst.msk [vmem:[%s3160_s8 + $0x18] sm:$0xff] %vm890_vm5, %v1127_v32  ;;  %v1139_v22 = vmul.f32 %v1123_v51, %v3285_v16  ;;  %1160 = vst.msk [vmem:[%s3160_s8 + $0x20] sm:$0xff] %vm890_vm5, %v1128_v20  ;;  %v1140_v37 = vmul.f32 %v1123_v51, %v3286_v34  ;;  %v1141_v54 = vmul.f32 %v1123_v51, %v3287_v52  ;;  %v3289_v9 = vmax.f32 %v3288_v63, 0.0  ;;  %v3304_v0 = vld [vmem:[#allocation11_spill] sm:$0xff] }
 0x301   :  { %1161 = vst.msk [vmem:[%s3160_s8 + $0x28] sm:$0xff] %vm890_vm5, %v1129_v53  ;;  %1162 = vst.msk [vmem:[%s3160_s8 + $0x30] sm:$0xff] %vm890_vm5, %v1130_v35  ;;  %v3291_v20 = vmax.f32 %v3290_v46, 0.0  ;;  %v1144_v53 = vmul.f32 %v1123_v51, %v3293_v15  ;;  %v3295_v35 = vmax.f32 %v3294_v27, 0.0  ;;  %v3305_v16 = vmax.f32 %v3304_v0, 0.0  ;;  %v3310_v46 = vld [vmem:[#allocation12_spill] sm:$0xff] }
 0x302   :  { %1163 = vst.msk [vmem:[%s3160_s8 + $0x38] sm:$0xff] %vm890_vm5, %v1131_v31  ;;  %v1142_v32 = vmul.f32 %v1123_v51, %v3289_v9  ;;  %1164 = vst.msk [vmem:[%s3160_s8 + $0x40] sm:$0xff] %vm890_vm5, %v1132_v11  ;;  %v3296_v31 = vld [vmem:[#allocation7_spill] sm:$0xff]  ;;  %v3313_v15 = vmax.f32 %v3312_v8, 0.0 }
 0x303   :  { %v1143_v44 = vmul.f32 %v1123_v51, %v3291_v20  ;;  %1165 = vst.msk [vmem:[%s3160_s8 + $0x48] sm:$0xff] %vm890_vm5, %v1133_v13  ;;  %1166 = vst.msk [vmem:[%s3160_s8 + $0x50] sm:$0xff] %vm890_vm5, %v1134_v2  ;;  %v1145_v18 = vmul.f32 %v1123_v51, %v3295_v35  ;;  %v3297_v17 = vmax.f32 %v3296_v31, 0.0  ;;  %v3299_v13 = vmax.f32 %v3298_v28, 0.0  ;;  %v3300_v2 = vld [vmem:[#allocation9_spill] sm:$0xff] }
 0x304   :  { %1167 = vst.msk [vmem:[%s3160_s8 + $0x58] sm:$0xff] %vm890_vm5, %v1135_v5  ;;  %1168 = vst.msk [vmem:[%s3160_s8 + $0x60] sm:$0xff] %vm890_vm5, %v1136_v48  ;;  %v3301_v38 = vmax.f32 %v3300_v2, 0.0  ;;  %v3303_v48 = vmax.f32 %v3302_v36, 0.0  ;;  %v1150_v34 = vmul.f32 %v1123_v51, %v3305_v16  ;;  %v1154_v27 = vmul.f32 %v1123_v51, %v3313_v15 }
 0x305   :  { %v1146_v11 = vmul.f32 %v1123_v51, %v3297_v17  ;;  %v1147_v25 = vmul.f32 %v1123_v51, %v3299_v13  ;;  %1169 = vst.msk [vmem:[%s3160_s8 + $0x68] sm:$0xff] %vm890_vm5, %v1137_v62  ;;  %1170 = vst.msk [vmem:[%s3160_s8 + $0x70] sm:$0xff] %vm890_vm5, %v1138_v14  ;;  %v3306_v62 = vld [vmem:[#allocation10_spill] sm:$0xff]  ;;  %v3308_v14 = vld [vmem:[#allocation13_spill] sm:$0xff]  ;;  %v3322_v16 = vmax.f32 %v2483_v39, 0.0  ;;  %v3331_v39 = vmax.f32 %v2548_v47, 0.0 }
 0x306   :  { %1171 = vst.msk [vmem:[%s3160_s8 + $0x78] sm:$0xff] %vm890_vm5, %v1139_v22  ;;  %v1148_v5 = vmul.f32 %v1123_v51, %v3301_v38  ;;  %v1149_v50 = vmul.f32 %v1123_v51, %v3303_v48  ;;  %v3307_v52 = vmax.f32 %v3306_v62, 0.0  ;;  %1172 = vst.msk [vmem:[%s3160_s8 + $0x80] sm:$0xff] %vm890_vm5, %v1140_v37  ;;  %v3309_v22 = vmax.f32 %v3308_v14, 0.0  ;;  %v3316_v13 = vld [vmem:[#allocation17_spill] sm:$0xff]  ;;  %v3318_v38 = vld [vmem:[#allocation16_spill] sm:$0xff] }
 0x307   :  { %1173 = vst.msk [vmem:[%s3160_s8 + $0x88] sm:$0xff] %vm890_vm5, %v1141_v54  ;;  %1174 = vst.msk [vmem:[%s3160_s8 + $0x90] sm:$0xff] %vm890_vm5, %v1142_v32  ;;  %v3311_v37 = vmax.f32 %v3310_v46, 0.0  ;;  %v3314_v54 = vld [vmem:[#allocation14_spill] sm:$0xff]  ;;  %v3320_v48 = vmax.f32 %v2464_v61, 0.0  ;;  %v3328_v46 = vmax.f32 %v2524_v41, 0.0 }
 0x308   :  { %v1151_v63 = vmul.f32 %v1123_v51, %v3307_v52  ;;  %1175 = vst.msk [vmem:[%s3160_s8 + $0x98] sm:$0xff] %vm890_vm5, %v1143_v44  ;;  %v1152_v9 = vmul.f32 %v1123_v51, %v3309_v22  ;;  %v3315_v35 = vmax.f32 %v3314_v54, 0.0  ;;  %1176 = vst.msk [vmem:[%s3160_s8 + $0xa0] sm:$0xff] %vm890_vm5, %v1144_v53  ;;  %v3323_v62 = vld [vmem:[#allocation18_spill] sm:$0xff]  ;;  %v3327_v22 = vmax.f32 %v2512_v30, 0.0 }
 0x309   :  { %v1153_v20 = vmul.f32 %v1123_v51, %v3311_v37  ;;  %1177 = vst.msk [vmem:[%s3160_s8 + $0xa8] sm:$0xff] %vm890_vm5, %v1145_v18  ;;  %1178 = vst.msk [vmem:[%s3160_s8 + $0xb0] sm:$0xff] %vm890_vm5, %v1146_v11  ;;  %v3324_v52 = vmax.f32 %v3323_v62, 0.0  ;;  %v3329_v61 = vmax.f32 %v2530_v43, 0.0  ;;  %v3332_v43 = vmax.f32 %v2560_v4, 0.0 }
 0x30a   :  { %v1155_v31 = vmul.f32 %v1123_v51, %v3315_v35  ;;  %1179 = vst.msk [vmem:[%s3160_s8 + $0xb8] sm:$0xff] %vm890_vm5, %v1147_v25  ;;  %1180 = vst.msk [vmem:[%s3160_s8 + $0xc0] sm:$0xff] %vm890_vm5, %v1148_v5  ;;  %v3317_v25 = vmax.f32 %v3316_v13, 0.0  ;;  %v3319_v5 = vmax.f32 %v3318_v38, 0.0  ;;  %v3333_v30 = vmax.f32 %v2566_v29, 0.0 }
 0x30b   :  { %1181 = vst.msk [vmem:[%s3160_s8 + $0xc8] sm:$0xff] %vm890_vm5, %v1149_v50  ;;  %1182 = vst.msk [vmem:[%s3160_s8 + $0xd0] sm:$0xff] %vm890_vm5, %v1150_v34  ;;  %v3334_v47 = vmax.f32 %v2578_v21, 0.0  ;;  %v3335_v54 = vmax.f32 %v2584_v3, 0.0  ;;  %v3336_v4 = vmax.f32 %v2596_v40, 0.0  ;;  %v3337_v21 = vmax.f32 %v2602_v7, 0.0 }
 0x30c   :  { %1183 = vst.msk [vmem:[%s3160_s8 + $0xd8] sm:$0xff] %vm890_vm5, %v1151_v63  ;;  %1184 = vst.msk [vmem:[%s3160_s8 + $0xe0] sm:$0xff] %vm890_vm5, %v1152_v9  ;;  %v3340_v40 = vmax.f32 %v2632_v55, 0.0  ;;  %v3344_v55 = vmax.f32 %v2668_v42, 0.0  ;;  %v3346_v13 = vmax.f32 %v2686_v1, 0.0  ;;  %v3348_v42 = vmax.f32 %v2704_v59, 0.0 }
 0x30d   :  { %1185 = vst.msk [vmem:[%s3160_s8 + $0xe8] sm:$0xff] %vm890_vm5, %v1153_v20  ;;  %1186 = vst.msk [vmem:[%s3160_s8 + $0xf0] sm:$0xff] %vm890_vm5, %v1154_v27  ;;  %v3349_v1 = vld [vmem:[#allocation20_spill] sm:$0xff] }
 0x30e   :  { %1187 = vst.msk [vmem:[%s3160_s8 + $0xf8] sm:$0xff] %vm890_vm5, %v1155_v31  ;;  %v3338_v31 = vmax.f32 %v2614_v12, 0.0  ;;  %v3341_v12 = vmax.f32 %v2638_v45, 0.0 }
 0x3bd   :  { %v1401_v51 = vpop.f32.mrb[32].mxu1 }
 0x3be   :  { %v1402_v32 = vadd.f32 %v1401_v51, %v2756_v60  ;;  %v1769_v44 = vpop.f32.mrb[33].mxu1  ;;  %v3321_v60 = vmax.f32 %v2473_v19, 0.0  ;;  %v3330_v19 = vmax.f32 %v2542_v6, 0.0 }
 0x3c0   :  { %v1557_v53 = vmul.f32 -1.442695, %v1402_v32  ;;  %v3339_v32 = vmax.f32 %v2620_v58, 0.0 }
 0x3c2   :  { %1798 = vpow2.f32 %v1557_v53  ;;  %v3342_v53 = vmax.f32 %v2650_v49, 0.0  ;;  %v3345_v49 = vmax.f32 %v2674_v23, 0.0 }
 0x3cc   :  { %v1799_v18 = vpop.eup %1798 }
 0x3cd   :  { %v1408_v17 = vadd.f32 1.0, %v1799_v18 }
 0x3cf   :  { %1800 = vrcp.f32 %v1408_v17  ;;  %v3343_v17 = vmax.f32 %v2656_v33, 0.0 }
 0x3d9   :  { %v1801_v11 = vpop.eup %1800 }
 0x3da   :  { %v1414_v28 = vrot.slane %v1801_v11, %v1122_v10  ;;  %v3326_v10 = vmax.f32 %v3325_v57, 0.0 }
 0x3dc   :  { %v1415_v2 = vmul.f32 %v1414_v28, %v3317_v25  ;;  %v1416_v36 = vmul.f32 %v1414_v28, %v3319_v5  ;;  %v1417_v50 = vmul.f32 %v1414_v28, %v3320_v48  ;;  %v1418_v0 = vmul.f32 %v1414_v28, %v3321_v60 }
 0x3dd   :  { %v1419_v34 = vmul.f32 %v1414_v28, %v3322_v16  ;;  %v1420_v63 = vmul.f32 %v1414_v28, %v3324_v52  ;;  %v1421_v14 = vmul.f32 %v1414_v28, %v3326_v10  ;;  %v1422_v9 = vmul.f32 %v1414_v28, %v3327_v22 }
 0x3de   :  { %v1423_v37 = vmul.f32 %v1414_v28, %v3328_v46  ;;  %v1424_v20 = vmul.f32 %v1414_v28, %v3329_v61  ;;  %v1425_v8 = vmul.f32 %v1414_v28, %v3330_v19  ;;  %v1426_v15 = vmul.f32 %v1414_v28, %v3331_v39  ;;  %1447 = vst.msk [vmem:[%s3160_s8 + $0x100] sm:$0xff] %vm890_vm5, %v1415_v2 }
 0x3df   :  { %1448 = vst.msk [vmem:[%s3160_s8 + $0x108] sm:$0xff] %vm890_vm5, %v1416_v36  ;;  %1449 = vst.msk [vmem:[%s3160_s8 + $0x110] sm:$0xff] %vm890_vm5, %v1417_v50  ;;  %v1427_v41 = vmul.f32 %v1414_v28, %v3332_v43  ;;  %v1428_v6 = vmul.f32 %v1414_v28, %v3333_v30  ;;  %v1429_v27 = vmul.f32 %v1414_v28, %v3334_v47  ;;  %v3347_v2 = vmax.f32 %v2692_v56, 0.0  ;;  %v3351_v36 = vld [vmem:[#allocation21_spill] sm:$0xff] }
 0x3e0   :  { %1450 = vst.msk [vmem:[%s3160_s8 + $0x118] sm:$0xff] %vm890_vm5, %v1418_v0  ;;  %v1430_v35 = vmul.f32 %v1414_v28, %v3335_v54  ;;  %1451 = vst.msk [vmem:[%s3160_s8 + $0x120] sm:$0xff] %vm890_vm5, %v1419_v34  ;;  %v1431_v29 = vmul.f32 %v1414_v28, %v3336_v4  ;;  %v1432_v3 = vmul.f32 %v1414_v28, %v3337_v21  ;;  %v3350_v56 = vmax.f32 %v3349_v1, 0.0 }
 0x3e1   :  { %1452 = vst.msk [vmem:[%s3160_s8 + $0x128] sm:$0xff] %vm890_vm5, %v1420_v63  ;;  %1453 = vst.msk [vmem:[%s3160_s8 + $0x130] sm:$0xff] %vm890_vm5, %v1421_v14  ;;  %v1433_v51 = vmul.f32 %v1414_v28, %v3338_v31  ;;  %v1434_v44 = vmul.f32 %v1414_v28, %v3339_v32  ;;  %v1435_v7 = vmul.f32 %v1414_v28, %v3340_v40  ;;  %v3352_v48 = vmax.f32 %v3351_v36, 0.0 }
 0x3e2   :  { %1454 = vst.msk [vmem:[%s3160_s8 + $0x138] sm:$0xff] %vm890_vm5, %v1422_v9  ;;  %1455 = vst.msk [vmem:[%s3160_s8 + $0x140] sm:$0xff] %vm890_vm5, %v1423_v37  ;;  %v1436_v58 = vmul.f32 %v1414_v28, %v3341_v12  ;;  %v1437_v18 = vmul.f32 %v1414_v28, %v3342_v53  ;;  %v1438_v11 = vmul.f32 %v1414_v28, %v3343_v17 }
 0x3e3   :  { %1456 = vst.msk [vmem:[%s3160_s8 + $0x148] sm:$0xff] %vm890_vm5, %v1424_v20  ;;  %1457 = vst.msk [vmem:[%s3160_s8 + $0x150] sm:$0xff] %vm890_vm5, %v1425_v8  ;;  %v1439_v45 = vmul.f32 %v1414_v28, %v3344_v55  ;;  %v1440_v33 = vmul.f32 %v1414_v28, %v3345_v49  ;;  %v1441_v25 = vmul.f32 %v1414_v28, %v3346_v13 }
 0x3e4   :  { %1458 = vst.msk [vmem:[%s3160_s8 + $0x158] sm:$0xff] %vm890_vm5, %v1426_v15  ;;  %1459 = vst.msk [vmem:[%s3160_s8 + $0x160] sm:$0xff] %vm890_vm5, %v1427_v41  ;;  %v1442_v38 = vmul.f32 %v1414_v28, %v3347_v2  ;;  %v1443_v23 = vmul.f32 %v1414_v28, %v3348_v42  ;;  %v1444_v5 = vmul.f32 %v1414_v28, %v3350_v56 }
 0x3e5   :  { %1460 = vst.msk [vmem:[%s3160_s8 + $0x168] sm:$0xff] %vm890_vm5, %v1428_v6  ;;  %1461 = vst.msk [vmem:[%s3160_s8 + $0x170] sm:$0xff] %vm890_vm5, %v1429_v27  ;;  %v1445_v50 = vmul.f32 %v1414_v28, %v3352_v48  ;;  %v1446_v60 = vmul.f32 %v1414_v28, %v882_v24 }
 0x3e6   :  { %1462 = vst.msk [vmem:[%s3160_s8 + $0x178] sm:$0xff] %vm890_vm5, %v1430_v35  ;;  %1463 = vst.msk [vmem:[%s3160_s8 + $0x180] sm:$0xff] %vm890_vm5, %v1431_v29 }
 0x3e7   :  { %1464 = vst.msk [vmem:[%s3160_s8 + $0x188] sm:$0xff] %vm890_vm5, %v1432_v3  ;;  %1465 = vst.msk [vmem:[%s3160_s8 + $0x190] sm:$0xff] %vm890_vm5, %v1433_v51 }
 0x3e8   :  { %1466 = vst.msk [vmem:[%s3160_s8 + $0x198] sm:$0xff] %vm890_vm5, %v1434_v44  ;;  %1467 = vst.msk [vmem:[%s3160_s8 + $0x1a0] sm:$0xff] %vm890_vm5, %v1435_v7 }
 0x3e9   :  { %1468 = vst.msk [vmem:[%s3160_s8 + $0x1a8] sm:$0xff] %vm890_vm5, %v1436_v58  ;;  %1469 = vst.msk [vmem:[%s3160_s8 + $0x1b0] sm:$0xff] %vm890_vm5, %v1437_v18 }
 0x3ea   :  { %1470 = vst.msk [vmem:[%s3160_s8 + $0x1b8] sm:$0xff] %vm890_vm5, %v1438_v11  ;;  %1471 = vst.msk [vmem:[%s3160_s8 + $0x1c0] sm:$0xff] %vm890_vm5, %v1439_v45 }
 0x3eb   :  { %1472 = vst.msk [vmem:[%s3160_s8 + $0x1c8] sm:$0xff] %vm890_vm5, %v1440_v33  ;;  %1473 = vst.msk [vmem:[%s3160_s8 + $0x1d0] sm:$0xff] %vm890_vm5, %v1441_v25 }
 0x3ec   :  { %1474 = vst.msk [vmem:[%s3160_s8 + $0x1d8] sm:$0xff] %vm890_vm5, %v1442_v38  ;;  %1475 = vst.msk [vmem:[%s3160_s8 + $0x1e0] sm:$0xff] %vm890_vm5, %v1443_v23 }
 0x3ed   :  { %1476 = vst.msk [vmem:[%s3160_s8 + $0x1e8] sm:$0xff] %vm890_vm5, %v1444_v5  ;;  %1477 = vst.msk [vmem:[%s3160_s8 + $0x1f0] sm:$0xff] %vm890_vm5, %v1445_v50 }
 0x3ee   :  { %1478 = vst.msk [vmem:[%s3160_s8 + $0x1f8] sm:$0xff] %vm890_vm5, %v1446_v60 }

// kernel: crnn_forward.4
= control target key start
LH: loop header
LB: loop body
LE: loop exit
PB: predicated region body
PF: predicated region fallthrough
CT: control target
= control target key end

     0   :  { %vm113_vm0 = vcmask 261120   ;;  %vm1230_vm1 = vmmov 0   ;;  %vm525_vm2 = vcmask 523264   ;;  %vm627_vm3 = vcmask 1043456   ;;  %s1859_s1 = inlined_call_operand.vmem [shape: f32[288,64], index: 1, kind: input, shape index: {}]   ;;  %s1860_s0 = inlined_call_operand.vmem [shape: f32[128,288], index: 0, kind: input, shape index: {}]   ;;  %s1861_s4 = inlined_call_operand.vmem [shape: f32[64,4], index: 4, kind: input, shape index: {}]   ;;  %s1862_s2 = inlined_call_operand.vmem [shape: f32[1,64], index: 2, kind: input, shape index: {}]   ;;  %s1863_s3 = inlined_call_operand.vmem [shape: f32[1,64], index: 3, kind: input, shape index: {}]   ;;  %s1864_s6 = inlined_call_operand.vmem [shape: f32[4,64], index: 6, kind: input, shape index: {}]   ;;  %s1865_s5 = inlined_call_operand.vmem [shape: f32[1,4], index: 5, kind: input, shape index: {}]   ;;  %s1866_s7 = inlined_call_operand.vmem [shape: f32[1,64], index: 7, kind: input, shape index: {}]   ;;  %s1867_s8 = inlined_call_operand.vmem [shape: f32[128,64], index: 8, kind: output, shape index: {}]  }
   0x1   :  { %v93_v0 = vld [vmem:[%s1859_s1 + $0x80] sm:$0xff]  ;;  %v94_v1 = vld [vmem:[%s1859_s1 + $0x88] sm:$0xff]  ;;  %v95_v5 = vld [vmem:[%s1859_s1 + $0x90] sm:$0xff]  ;;  %vm623_vm4 = vcmask 31744  }
   0x2   :  { %v77_v2 = vld [vmem:[%s1859_s1] sm:$0xff]  ;;  %v1154_v3 = vpack.c.bf16 %v94_v1, %v93_v0  ;;  %v78_v4 = vld [vmem:[%s1859_s1 + $0x8] sm:$0xff]  ;;  %v96_v6 = vld [vmem:[%s1859_s1 + $0x98] sm:$0xff] }
   0x3   :  { %v1156_v7 = vpack.c.bf16 %v78_v4, %v77_v2  ;;  %v1158_v8 = vpack.c.bf16 %v96_v6, %v95_v5  ;;  %v79_v9 = vld [vmem:[%s1859_s1 + $0x10] sm:$0xff]  ;;  %v80_v10 = vld [vmem:[%s1859_s1 + $0x18] sm:$0xff]  ;;  %v97_v11 = vld [vmem:[%s1859_s1 + $0xa0] sm:$0xff] }
   0x4   :  { %1155 = vmatprep.subr.bf16.mxu0 %v1154_v3  ;;  %v98_v12 = vld [vmem:[%s1859_s1 + $0xa8] sm:$0xff]  ;;  %v1160_v13 = vpack.c.bf16 %v80_v10, %v79_v9  ;;  %v81_v15 = vld [vmem:[%s1859_s1 + $0x20] sm:$0xff]  ;;  %v99_v17 = vld [vmem:[%s1859_s1 + $0xb0] sm:$0xff] }
   0x5   :  { %1157 = vmatpush3.bf16.msra.mxu0 %v1156_v7  ;;  %v1162_v14 = vpack.c.bf16 %v98_v12, %v97_v11  ;;  %v82_v16 = vld [vmem:[%s1859_s1 + $0x28] sm:$0xff]  ;;  %v100_v18 = vld [vmem:[%s1859_s1 + $0xb8] sm:$0xff]  ;;  %v83_v20 = vld [vmem:[%s1859_s1 + $0x30] sm:$0xff] }
   0x6   :  { %1159 = vmatprep.subr.bf16.mxu0 %v1158_v8  ;;  %v1164_v19 = vpack.c.bf16 %v82_v16, %v81_v15  ;;  %v1166_v21 = vpack.c.bf16 %v100_v18, %v99_v17  ;;  %v84_v22 = vld [vmem:[%s1859_s1 + $0x38] sm:$0xff]  ;;  %v109_v23 = vld [vmem:[%s1859_s1 + $0x100] sm:$0xff]  ;;  %v110_v24 = vld [vmem:[%s1859_s1 + $0x108] sm:$0xff] }
   0x7   :  { %v101_v25 = vld [vmem:[%s1859_s1 + $0xc0] sm:$0xff]  ;;  %v102_v26 = vld [vmem:[%s1859_s1 + $0xc8] sm:$0xff]  ;;  %v1186_v27 = vpack.c.bf16 %v110_v24, %v109_v23  ;;  %v111_v28 = vld [vmem:[%s1859_s1 + $0x110] sm:$0xff]  ;;  %v1168_v30 = vpack.c.bf16 %v84_v22, %v83_v20 }
   0x8   :  { %v112_v29 = vld [vmem:[%s1859_s1 + $0x118] sm:$0xff]  ;;  %v30_v32 = vld [vmem:[%s1860_s0 + $0x8] sm:$0xff]  ;;  %v31_v33 = vld [vmem:[%s1860_s0 + $0x10] sm:$0xff]  ;;  %v1170_v34 = vpack.c.bf16 %v102_v26, %v101_v25 }
   0x9   :  { %1161 = vmatpush3.bf16.msra.mxu0 %v1160_v13  ;;  %1187 = vmatprep.subr.bf16.mxu1 %v1186_v27  ;;  %v1190_v31 = vpack.c.bf16 %v112_v29, %v111_v28  ;;  %v85_v35 = vld [vmem:[%s1859_s1 + $0x40] sm:$0xff]  ;;  %v86_v36 = vld [vmem:[%s1859_s1 + $0x48] sm:$0xff]  ;;  %v103_v37 = vld [vmem:[%s1859_s1 + $0xd0] sm:$0xff] }
   0xa   :  { %1163 = vmatprep.subr.bf16.mxu0 %v1162_v14  ;;  %1189 = vmatpush3.bf16.msra.mxu1 %v1186_v27  ;;  %v104_v38 = vld [vmem:[%s1859_s1 + $0xd8] sm:$0xff]  ;;  %v1172_v39 = vpack.c.bf16 %v86_v36, %v85_v35  ;;  %v87_v41 = vld [vmem:[%s1859_s1 + $0x50] sm:$0xff]  ;;  %v34_v43 = vld [vmem:[%s1860_s0 + $0x28] sm:$0xff] }
   0xb   :  { %1191 = vmatprep.subr.bf16.mxu1 %v1190_v31  ;;  %226 = vmatprep.mubr.f32.mxu0 %v30_v32  ;;  %v1174_v40 = vpack.c.bf16 %v104_v38, %v103_v37  ;;  %v88_v42 = vld [vmem:[%s1859_s1 + $0x58] sm:$0xff]  ;;  %v105_v44 = vld [vmem:[%s1859_s1 + $0xe0] sm:$0xff]  ;;  %v106_v45 = vld [vmem:[%s1859_s1 + $0xe8] sm:$0xff]  ;;  %v1229_v38 = vmov 0.0|0.0  }
   0xc   :  { %1082 = vmatprep.mubr.msk.f32.mxu1 %vm113_vm0, %v31_v33  ;;  %v37_v46 = vld [vmem:[%s1860_s0 + $0x40] sm:$0xff]  ;;  %v1176_v47 = vpack.c.bf16 %v88_v42, %v87_v41  ;;  %v1178_v48 = vpack.c.bf16 %v106_v45, %v105_v44  ;;  %v90_v50 = vld [vmem:[%s1859_s1 + $0x68] sm:$0xff]  ;;  %v40_v51 = vld [vmem:[%s1860_s0 + $0x58] sm:$0xff] }
   0xd   :  { %1165 = vmatpush3.bf16.msra.mxu0 %v1164_v19  ;;  %v89_v49 = vld [vmem:[%s1859_s1 + $0x60] sm:$0xff]  ;;  %v107_v52 = vld [vmem:[%s1859_s1 + $0xf0] sm:$0xff]  ;;  %v108_v53 = vld [vmem:[%s1859_s1 + $0xf8] sm:$0xff] }
   0xe   :  { %1167 = vmatprep.subr.bf16.mxu0 %v1166_v21  ;;  %1193 = vmatpush3.bf16.msra.mxu1 %v1190_v31  ;;  %v43_v54 = vld [vmem:[%s1860_s0 + $0x70] sm:$0xff]  ;;  %v1180_v55 = vpack.c.bf16 %v90_v50, %v89_v49  ;;  %v1182_v56 = vpack.c.bf16 %v108_v53, %v107_v52  ;;  %v92_v58 = vld [vmem:[%s1859_s1 + $0x78] sm:$0xff]  ;;  %v46_v59 = vld [vmem:[%s1860_s0 + $0x88] sm:$0xff] }
   0xf   :  { %v91_v57 = vld [vmem:[%s1859_s1 + $0x70] sm:$0xff]  ;;  %v49_v60 = vld [vmem:[%s1860_s0 + $0xa0] sm:$0xff]  ;;  %v52_v62 = vld [vmem:[%s1860_s0 + $0xb8] sm:$0xff]  ;;  %1194 = vmatprep.subr.bf16.mxu1 %v1229_v38 }
  0x10   :  { %v1184_v61 = vpack.c.bf16 %v92_v58, %v91_v57  ;;  %v29_v63 = vld [vmem:[%s1860_s0] sm:$0xff]  ;;  %v32_v1 = vld [vmem:[%s1860_s0 + $0x18] sm:$0xff]  ;;  %v35_v3 = vld [vmem:[%s1860_s0 + $0x30] sm:$0xff] }
  0x11   :  { %1169 = vmatpush3.bf16.msra.mxu0 %v1168_v30  ;;  %1083 = vmatmul.mubr.msk.f32.vlgmr.msra.gmra.mrb[0].mxu1 %vm113_vm0, %v34_v43  ;;  %v33_v0 = vld [vmem:[%s1860_s0 + $0x20] sm:$0xff]  ;;  %v36_v2 = vld [vmem:[%s1860_s0 + $0x38] sm:$0xff]  ;;  %v39_v4 = vld [vmem:[%s1860_s0 + $0x50] sm:$0xff] }
  0x12   :  { %1171 = vmatprep.subr.bf16.mxu0 %v1170_v34  ;;  %1085 = vmatprep.mubr.msk.f32.mxu1 %vm113_vm0, %v37_v46  ;;  %v38_v5 = vld [vmem:[%s1860_s0 + $0x48] sm:$0xff]  ;;  %v41_v7 = vld [vmem:[%s1860_s0 + $0x60] sm:$0xff]  ;;  %v44_v9 = vld [vmem:[%s1860_s0 + $0x78] sm:$0xff] }
  0x13   :  { %v42_v6 = vld [vmem:[%s1860_s0 + $0x68] sm:$0xff]  ;;  %v45_v8 = vld [vmem:[%s1860_s0 + $0x80] sm:$0xff]  ;;  %v48_v10 = vld [vmem:[%s1860_s0 + $0x98] sm:$0xff] }
  0x14   :  { %v47_v11 = vld [vmem:[%s1860_s0 + $0x90] sm:$0xff]  ;;  %v50_v13 = vld [vmem:[%s1860_s0 + $0xa8] sm:$0xff]  ;;  %v53_v15 = vld [vmem:[%s1860_s0 + $0xc0] sm:$0xff] }
  0x15   :  { %1173 = vmatpush3.bf16.msra.mxu0 %v1172_v39  ;;  %1086 = vmatmul.mubr.msk.f32.gmra.mrb[2].mxu1 %vm113_vm0, %v40_v51  ;;  %v51_v12 = vld [vmem:[%s1860_s0 + $0xb0] sm:$0xff]  ;;  %v54_v14 = vld [vmem:[%s1860_s0 + $0xc8] sm:$0xff]  ;;  %v57_v16 = vld [vmem:[%s1860_s0 + $0xe0] sm:$0xff]  ;;  %v1231_v51 = vmov 0.0  }
  0x16   :  { %1175 = vmatprep.subr.bf16.mxu0 %v1174_v40  ;;  %1088 = vmatprep.mubr.msk.f32.mxu1 %vm113_vm0, %v43_v54  ;;  %v56_v17 = vld [vmem:[%s1860_s0 + $0xd8] sm:$0xff]  ;;  %v59_v19 = vld [vmem:[%s1860_s0 + $0xf0] sm:$0xff]  ;;  %v62_v21 = vld [vmem:[%s1860_s0 + $0x108] sm:$0xff] }
  0x17   :  { %v60_v18 = vld [vmem:[%s1860_s0 + $0xf8] sm:$0xff]  ;;  %v63_v20 = vld [vmem:[%s1860_s0 + $0x110] sm:$0xff]  ;;  %v66_v22 = vld [vmem:[%s1860_s0 + $0x128] sm:$0xff] }
  0x18   :  { %v55_v23 = vld [vmem:[%s1860_s0 + $0xd0] sm:$0xff]  ;;  %v65_v24 = vld [vmem:[%s1860_s0 + $0x120] sm:$0xff]  ;;  %v58_v25 = vld [vmem:[%s1860_s0 + $0xe8] sm:$0xff] }
  0x19   :  { %1177 = vmatpush3.bf16.msra.mxu0 %v1176_v47  ;;  %1089 = vmatmul.mubr.msk.f32.gmra.mrb[4].mxu1 %vm113_vm0, %v46_v59  ;;  %v69_v26 = vld [vmem:[%s1860_s0 + $0x140] sm:$0xff]  ;;  %v68_v28 = vld [vmem:[%s1860_s0 + $0x138] sm:$0xff]  ;;  %v67_v31 = vld [vmem:[%s1860_s0 + $0x130] sm:$0xff] }
  0x1a   :  { %1179 = vmatprep.subr.bf16.mxu0 %v1178_v48  ;;  %1091 = vmatprep.mubr.msk.f32.mxu1 %vm113_vm0, %v49_v60  ;;  %v61_v27 = vld [vmem:[%s1860_s0 + $0x100] sm:$0xff]  ;;  %v64_v29 = vld [vmem:[%s1860_s0 + $0x118] sm:$0xff]  ;;  %v71_v32 = vld [vmem:[%s1860_s0 + $0x150] sm:$0xff] }
  0x1b   :  { %v72_v30 = vld [vmem:[%s1860_s0 + $0x158] sm:$0xff]  ;;  %v70_v33 = vld [vmem:[%s1860_s0 + $0x148] sm:$0xff]  ;;  %v75_v34 = vld [vmem:[%s1860_s0 + $0x170] sm:$0xff] }
  0x1c   :  { %v73_v35 = vld [vmem:[%s1860_s0 + $0x160] sm:$0xff]  ;;  %v74_v36 = vld [vmem:[%s1860_s0 + $0x168] sm:$0xff]  ;;  %v76_v37 = vld [vmem:[%s1860_s0 + $0x178] sm:$0xff] }
  0x1d   :  { %1181 = vmatpush3.bf16.msra.mxu0 %v1180_v55  ;;  %1092 = vmatmul.mubr.msk.f32.gmra.mrb[6].mxu1 %vm113_vm0, %v52_v62  ;;  %v514_v39 = vld [vmem:[%s1861_s4] sm:$0xff]  ;;  %v515_v40 = vld [vmem:[%s1861_s4 + $0x8] sm:$0xff]  ;;  %v516_v42 = vld [vmem:[%s1861_s4 + $0x10] sm:$0xff] }
  0x1e   :  { %1183 = vmatprep.subr.bf16.mxu0 %v1182_v56  ;;  %1094 = vmatprep.mubr.msk.f32.mxu1 %vm113_vm0, %v55_v23  ;;  %v1552_v41 = vpack.c.bf16 %v515_v40, %v514_v39  ;;  %v517_v43 = vld [vmem:[%s1861_s4 + $0x18] sm:$0xff]  ;;  %v518_v45 = vld [vmem:[%s1861_s4 + $0x20] sm:$0xff]  ;;  %v519_v46 = vld [vmem:[%s1861_s4 + $0x28] sm:$0xff] }
  0x1f   :  { %v1562_v44 = vpack.c.bf16 %v517_v43, %v516_v42  ;;  %v1572_v47 = vpack.c.bf16 %v519_v46, %v518_v45  ;;  %v520_v48 = vld [vmem:[%s1861_s4 + $0x30] sm:$0xff]  ;;  %v521_v49 = vld [vmem:[%s1861_s4 + $0x38] sm:$0xff] }
  0x20   :  { %1196 = vmatpush3.bf16.msra.mxu1 %v1552_v41  ;;  %v1582_v50 = vpack.c.bf16 %v521_v49, %v520_v48 }
  0x21   :  { %1185 = vmatpush3.bf16.msra.mxu0 %v1184_v61  ;;  %1095 = vmatmul.mubr.msk.f32.gmra.mrb[8].mxu1 %vm113_vm0, %v58_v25 }
  0x22   :  { %1097 = vmatprep.mubr.msk.f32.mxu1 %vm113_vm0, %v61_v27  ;;  %1197 = vmatprep.subr.bf16.mxu1 %v1229_v38 }
  0x24   :  { %227 = vmatmul.mubr.f32.vlgmr.msra.gmra.mrb[0].mxu0 %v29_v63  ;;  %1199 = vmatpush3.bf16.msra.mxu1 %v1562_v44 }
  0x25   :  { %231 = vmatprep.mubr.f32.mxu0 %v33_v0  ;;  %1098 = vmatmul.mubr.msk.f32.gmra.mrb[10].mxu1 %vm113_vm0, %v64_v29 }
  0x26   :  { %1100 = vmatprep.mubr.msk.f32.mxu1 %vm113_vm0, %v67_v31  ;;  %1200 = vmatprep.subr.bf16.mxu1 %v1229_v38 }
  0x28   :  { %232 = vmatmul.mubr.f32.gmra.mrb[2].mxu0 %v32_v1  ;;  %1202 = vmatpush3.bf16.msra.mxu1 %v1572_v47 }
  0x29   :  { %236 = vmatprep.mubr.f32.mxu0 %v36_v2  ;;  %1101 = vmatmul.mubr.msk.f32.gmra.mrb[12].mxu1 %vm113_vm0, %v70_v33 }
  0x2a   :  { %1103 = vmatprep.mubr.msk.f32.mxu1 %vm113_vm0, %v73_v35  ;;  %1203 = vmatprep.subr.bf16.mxu1 %v1229_v38 }
  0x2c   :  { %237 = vmatmul.mubr.f32.gmra.mrb[4].mxu0 %v35_v3  ;;  %1205 = vmatpush3.bf16.msra.mxu1 %v1582_v50 }
  0x2d   :  { %241 = vmatprep.mubr.f32.mxu0 %v39_v4  ;;  %1104 = vmatmul.mubr.msk.f32.gmra.mrb[14].mxu1 %vm113_vm0, %v76_v37 }
  0x2e   :  { %1122 = vmatprep.mubr.msk.f32.mxu1 %vm1230_vm1, %v1231_v51  ;;  %1125 = vmatprep.subr.mxu1 %v1231_v51 }
  0x30   :  { %242 = vmatmul.mubr.f32.gmra.mrb[6].mxu0 %v38_v5 }
  0x31   :  { %246 = vmatprep.mubr.f32.mxu0 %v42_v6 }
  0x34   :  { %247 = vmatmul.mubr.f32.gmra.mrb[8].mxu0 %v41_v7  ;;  %v1593_v7 = vld [vmem:[%s1862_s2] ss:$0 sm:$0xff] }
  0x35   :  { %251 = vmatprep.mubr.f32.mxu0 %v45_v8 }
  0x38   :  { %252 = vmatmul.mubr.f32.gmra.mrb[10].mxu0 %v44_v9 }
  0x39   :  { %256 = vmatprep.mubr.f32.mxu0 %v48_v10 }
  0x3c   :  { %257 = vmatmul.mubr.f32.gmra.mrb[12].mxu0 %v47_v11 }
  0x3d   :  { %261 = vmatprep.mubr.f32.mxu0 %v51_v12 }
  0x40   :  { %262 = vmatmul.mubr.f32.gmra.mrb[14].mxu0 %v50_v13 }
  0x41   :  { %266 = vmatprep.mubr.f32.mxu0 %v54_v14  ;;  %v1600_v14 = vld [vmem:[%s1863_s3] ss:$0 sm:$0xff] }
  0x44   :  { %267 = vmatmul.mubr.f32.gmra.mrb[16].mxu0 %v53_v15 }
  0x45   :  { %271 = vmatprep.mubr.f32.mxu0 %v57_v16 }
  0x48   :  { %272 = vmatmul.mubr.f32.gmra.mrb[18].mxu0 %v56_v17 }
  0x49   :  { %276 = vmatprep.mubr.f32.mxu0 %v60_v18 }
  0x4c   :  { %277 = vmatmul.mubr.f32.gmra.mrb[20].mxu0 %v59_v19 }
  0x4d   :  { %281 = vmatprep.mubr.f32.mxu0 %v63_v20 }
  0x50   :  { %282 = vmatmul.mubr.f32.gmra.mrb[22].mxu0 %v62_v21 }
  0x51   :  { %286 = vmatprep.mubr.f32.mxu0 %v66_v22 }
  0x54   :  { %287 = vmatmul.mubr.f32.gmra.mrb[24].mxu0 %v65_v24 }
  0x55   :  { %291 = vmatprep.mubr.f32.mxu0 %v69_v26 }
  0x58   :  { %292 = vmatmul.mubr.f32.gmra.mrb[26].mxu0 %v68_v28 }
  0x59   :  { %296 = vmatprep.mubr.f32.mxu0 %v72_v30 }
  0x5c   :  { %297 = vmatmul.mubr.f32.gmra.mrb[28].mxu0 %v71_v32 }
  0x5d   :  { %301 = vmatprep.mubr.f32.mxu0 %v75_v34 }
  0x60   :  { %302 = vmatmul.mubr.f32.gmra.mrb[30].mxu0 %v74_v36 }
  0xe4   :  { %v1084_v52 = vpop.f32.mrb[0].mxu1 }
  0xe5   :  { %v373_v53 = vpop.f32.mrb[1].mxu1 }
  0xe8   :  { %v1087_v54 = vpop.f32.mrb[2].mxu1 }
  0xe9   :  { %v383_v55 = vpop.f32.mrb[3].mxu1 }
  0xec   :  { %v1090_v56 = vpop.f32.mrb[4].mxu1 }
  0xed   :  { %v393_v57 = vpop.f32.mrb[5].mxu1 }
  0xf0   :  { %v1588_v58 = vpop.f32.mrb[6].mxu1 }
  0xf1   :  { %v403_v59 = vpop.f32.mrb[7].mxu1 }
  0xf7   :  { %v984_v60 = vpop.f32.mrb[0].mxu0 }
  0xf8   :  { %v985_v61 = vpop.f32.mrb[1].mxu0 }
  0xf9   :  { %v986_v62 = vadd.f32 %v985_v61, %v984_v60 }
  0xfb   :  { %v374_v63 = vadd.f32 %v986_v62, %v373_v53  ;;  %v987_v0 = vpop.f32.mrb[2].mxu0 }
  0xfc   :  { %v988_v1 = vpop.f32.mrb[3].mxu0 }
  0xfd   :  { %v989_v2 = vadd.f32 %v988_v1, %v987_v0  ;;  %v459_v13 = vmul.f32 %v1593_v7, %v374_v63 }
  0xff   :  { %v379_v3 = vadd.f32 %v1084_v52, %v989_v2  ;;  %v990_v4 = vpop.f32.mrb[4].mxu0  ;;  %v1608_v22 = vadd.f32 %v1600_v14, %v459_v13 }
 0x100   :  { %v991_v5 = vpop.f32.mrb[5].mxu0 }
 0x101   :  { %v992_v6 = vadd.f32 %v991_v5, %v990_v4  ;;  %v460_v11 = vmul.f32 %v1593_v7, %v379_v3  ;;  %v498_v31 = vmax.f32 %v1608_v22, 0.0 }
 0x103   :  { %v384_v8 = vadd.f32 %v992_v6, %v383_v55  ;;  %v993_v9 = vpop.f32.mrb[6].mxu0  ;;  %v1604_v19 = vadd.f32 %v1600_v14, %v460_v11  ;;  %v526_v43 = vsel %vm525_vm2, %v498_v31, 0.0 }
 0x104   :  { %v994_v10 = vpop.f32.mrb[7].mxu0 }
 0x105   :  { %v995_v12 = vadd.f32 %v994_v10, %v993_v9  ;;  %v461_v15 = vmul.f32 %v1593_v7, %v384_v8  ;;  %v499_v27 = vmax.f32 %v1604_v19, 0.0 }
 0x107   :  { %v389_v16 = vadd.f32 %v1087_v54, %v995_v12  ;;  %v996_v17 = vpop.f32.mrb[8].mxu0  ;;  %v1611_v23 = vadd.f32 %v1600_v14, %v461_v15  ;;  %v527_v37 = vsel %vm525_vm2, %v499_v27, 0.0 }
 0x108   :  { %v997_v18 = vpop.f32.mrb[9].mxu0  ;;  %v528_v53 = vadd.f32 %v527_v37, %v526_v43  ;;  %v1096_v43 = vpop.f32.mrb[8].mxu1 }
 0x109   :  { %v462_v20 = vmul.f32 %v1593_v7, %v389_v16  ;;  %v998_v21 = vadd.f32 %v997_v18, %v996_v17  ;;  %v500_v32 = vmax.f32 %v1611_v23, 0.0 }
 0x10b   :  { %v394_v24 = vadd.f32 %v998_v21, %v393_v57  ;;  %v999_v25 = vpop.f32.mrb[10].mxu0  ;;  %v1615_v28 = vadd.f32 %v1600_v14, %v462_v20  ;;  %v529_v45 = vsel %vm525_vm2, %v500_v32, 0.0 }
 0x10c   :  { %v1000_v26 = vpop.f32.mrb[11].mxu0  ;;  %v530_v61 = vadd.f32 %v529_v45, %v528_v53 }
 0x10d   :  { %v463_v29 = vmul.f32 %v1593_v7, %v394_v24  ;;  %v1001_v30 = vadd.f32 %v1000_v26, %v999_v25  ;;  %v501_v39 = vmax.f32 %v1615_v28, 0.0 }
 0x10f   :  { %v1621_v33 = vadd.f32 %v1600_v14, %v463_v29  ;;  %v399_v34 = vadd.f32 %v1090_v56, %v1001_v30  ;;  %v1002_v35 = vpop.f32.mrb[12].mxu0  ;;  %v531_v55 = vsel %vm525_vm2, %v501_v39, 0.0 }
 0x110   :  { %v1003_v36 = vpop.f32.mrb[13].mxu0  ;;  %v532_v1 = vadd.f32 %v531_v55, %v530_v61 }
 0x111   :  { %v464_v40 = vmul.f32 %v1593_v7, %v399_v34  ;;  %v1004_v42 = vadd.f32 %v1003_v36, %v1002_v35  ;;  %v502_v46 = vmax.f32 %v1621_v33, 0.0 }
 0x113   :  { %v1636_v48 = vadd.f32 %v1600_v14, %v464_v40  ;;  %v404_v49 = vadd.f32 %v1004_v42, %v403_v59  ;;  %v1005_v52 = vpop.f32.mrb[14].mxu0  ;;  %v533_v62 = vsel %vm525_vm2, %v502_v46, 0.0 }
 0x114   :  { %v1006_v54 = vpop.f32.mrb[15].mxu0  ;;  %v534_v8 = vadd.f32 %v533_v62, %v532_v1 }
 0x115   :  { %v503_v56 = vmax.f32 %v1636_v48, 0.0  ;;  %v465_v57 = vmul.f32 %v1593_v7, %v404_v49  ;;  %v1007_v60 = vadd.f32 %v1006_v54, %v1005_v52  ;;  %v413_v52 = vpop.f32.mrb[9].mxu1 }
 0x117   :  { %v1647_v63 = vadd.f32 %v1600_v14, %v465_v57  ;;  %v409_v59 = vadd.f32 %v1588_v58, %v1007_v60  ;;  %v1008_v0 = vpop.f32.mrb[16].mxu0  ;;  %v535_v3 = vsel %vm525_vm2, %v503_v56, 0.0  ;;  %v1099_v57 = vpop.f32.mrb[10].mxu1 }
 0x118   :  { %v1009_v2 = vpop.f32.mrb[17].mxu0  ;;  %v536_v58 = vadd.f32 %v535_v3, %v534_v8  ;;  %v423_v62 = vpop.f32.mrb[11].mxu1 }
 0x119   :  { %v504_v4 = vmax.f32 %v1647_v63, 0.0  ;;  %v466_v5 = vmul.f32 %v1593_v7, %v409_v59  ;;  %v1010_v6 = vadd.f32 %v1009_v2, %v1008_v0  ;;  %v1102_v2 = vpop.f32.mrb[12].mxu1 }
 0x11a   :  { %v433_v8 = vpop.f32.mrb[13].mxu1 }
 0x11b   :  { %v537_v9 = vsel %vm525_vm2, %v504_v4, 0.0  ;;  %v1659_v10 = vadd.f32 %v1600_v14, %v466_v5  ;;  %v1011_v26 = vpop.f32.mrb[18].mxu0  ;;  %v414_v54 = vadd.f32 %v1010_v6, %v413_v52 }
 0x11c   :  { %v538_v12 = vadd.f32 %v537_v9, %v536_v58  ;;  %v1012_v29 = vpop.f32.mrb[19].mxu0 }
 0x11d   :  { %v505_v11 = vmax.f32 %v1659_v10, 0.0  ;;  %v1013_v30 = vadd.f32 %v1012_v29, %v1011_v26 }
 0x11f   :  { %v539_v13 = vsel %vm525_vm2, %v505_v11, 0.0  ;;  %v1014_v34 = vpop.f32.mrb[20].mxu0  ;;  %v419_v49 = vadd.f32 %v1096_v43, %v1013_v30 }
 0x120   :  { %v540_v15 = vadd.f32 %v539_v13, %v538_v12  ;;  %v1015_v35 = vpop.f32.mrb[21].mxu0 }
 0x121   :  { %v1016_v36 = vadd.f32 %v1015_v35, %v1014_v34 }
 0x122   :  { %v541_v16 = vrot.slane %v540_v15, 4 }
 0x123   :  { %v1017_v37 = vpop.f32.mrb[22].mxu0  ;;  %v424_v0 = vadd.f32 %v1016_v36, %v423_v62 }
 0x124   :  { %v542_v17 = vadd.f32 %v541_v16, %v540_v15  ;;  %v1018_v40 = vpop.f32.mrb[23].mxu0  ;;  %v1105_v15 = vpop.f32.mrb[14].mxu1 }
 0x125   :  { %v1019_v42 = vadd.f32 %v1018_v40, %v1017_v37  ;;  %v469_v30 = vmul.f32 %v1593_v7, %v424_v0 }
 0x126   :  { %v543_v18 = vrot.slane %v542_v17, 2 }
 0x127   :  { %v1020_v45 = vpop.f32.mrb[24].mxu0  ;;  %v429_v61 = vadd.f32 %v1099_v57, %v1019_v42  ;;  %v1689_v37 = vadd.f32 %v1600_v14, %v469_v30 }
 0x128   :  { %v544_v20 = vadd.f32 %v543_v18, %v542_v17  ;;  %v1021_v53 = vpop.f32.mrb[25].mxu0  ;;  %v443_v17 = vpop.f32.mrb[15].mxu1 }
 0x129   :  { %v1022_v55 = vadd.f32 %v1021_v53, %v1020_v45  ;;  %v470_v36 = vmul.f32 %v1593_v7, %v429_v61  ;;  %v508_v45 = vmax.f32 %v1689_v37, 0.0 }
 0x12a   :  { %v545_v21 = vrot.slane %v544_v20, 1 }
 0x12b   :  { %v1023_v60 = vpop.f32.mrb[26].mxu0  ;;  %v434_v58 = vadd.f32 %v1022_v55, %v433_v8  ;;  %v1698_v43 = vadd.f32 %v1600_v14, %v470_v36 }
 0x12c   :  { %v546_v24 = vadd.f32 %v545_v21, %v544_v20  ;;  %v1024_v59 = vpop.f32.mrb[27].mxu0  ;;  %v1671_v21 = vld [vmem:[%s1864_s6] sm:$0xf] }
 0x12d   :  { %v1025_v1 = vadd.f32 %v1024_v59, %v1023_v60  ;;  %v509_v53 = vmax.f32 %v1698_v43, 0.0 }
 0x12e   :  { %v548_v25 = vmul.f32 0.015625, %v546_v24  ;;  %v468_v24 = vmul.f32 %v1593_v7, %v419_v49  ;;  %v471_v49 = vmul.f32 %v1593_v7, %v434_v58 }
 0x12f   :  { %v1026_v3 = vpop.f32.mrb[28].mxu0  ;;  %v439_v5 = vadd.f32 %v1102_v2, %v1025_v1  ;;  %v732_v61 = vsel %vm525_vm2, %v509_v53, 0.0 }
 0x130   :  { %1123 = vmatmul.mubr.msk.f32.vlgmr.msra.gmra.mrb[16].mxu1 %vm525_vm2, %v548_v25  ;;  %v1027_v9 = vpop.f32.mrb[29].mxu0  ;;  %v467_v25 = vmul.f32 %v1593_v7, %v414_v54  ;;  %v1679_v26 = vadd.f32 %v1600_v14, %v468_v24  ;;  %v730_v54 = vsel %vm525_vm2, %v508_v45, 0.0  ;;  %v1708_v57 = vadd.f32 %v1600_v14, %v471_v49 }
 0x131   :  { %1127 = vmatprep.mubr.msk.f32.mxu1 %vm1230_vm1, %v1231_v51  ;;  %v1028_v12 = vadd.f32 %v1027_v9, %v1026_v3  ;;  %1126 = vmatpush3.msk.msra.mxu1 %vm627_vm3, %v1671_v21  ;;  %v472_v55 = vmul.f32 %v1593_v7, %v439_v5 }
 0x132   :  { %1206 = vmatprep.subr.bf16.mxu1 %v1229_v38  ;;  %v1682_v29 = vadd.f32 %v1600_v14, %v467_v25  ;;  %v507_v34 = vmax.f32 %v1679_v26, 0.0  ;;  %v510_v59 = vmax.f32 %v1708_v57, 0.0 }
 0x133   :  { %v1029_v13 = vpop.f32.mrb[30].mxu0  ;;  %v444_v18 = vadd.f32 %v1028_v12, %v443_v17  ;;  %v1714_v62 = vadd.f32 %v1600_v14, %v472_v55 }
 0x134   :  { %v1030_v16 = vpop.f32.mrb[31].mxu0  ;;  %v506_v35 = vmax.f32 %v1682_v29, 0.0  ;;  %v728_v40 = vsel %vm525_vm2, %v507_v34, 0.0  ;;  %v734_v3 = vsel %vm525_vm2, %v510_v59, 0.0 }
 0x135   :  { %v1031_v6 = vadd.f32 %v1030_v16, %v1029_v13  ;;  %v473_v0 = vmul.f32 %v1593_v7, %v444_v18  ;;  %v511_v2 = vmax.f32 %v1714_v62, 0.0 }
 0x136   :  { %v727_v42 = vsel %vm525_vm2, %v506_v35, 0.0 }
 0x137   :  { %v449_v20 = vadd.f32 %v1105_v15, %v1031_v6  ;;  %v729_v52 = vadd.f32 %v728_v40, %v727_v42  ;;  %v1724_v8 = vadd.f32 %v1600_v14, %v473_v0  ;;  %v736_v58 = vsel %vm525_vm2, %v511_v2, 0.0 }
 0x139   :  { %v731_v60 = vadd.f32 %v730_v54, %v729_v52  ;;  %v474_v5 = vmul.f32 %v1593_v7, %v449_v20  ;;  %v512_v13 = vmax.f32 %v1724_v8, 0.0 }
 0x13b   :  { %v733_v1 = vadd.f32 %v732_v61, %v731_v60  ;;  %v1730_v12 = vadd.f32 %v1600_v14, %v474_v5  ;;  %v738_v7 = vsel %vm525_vm2, %v512_v13, 0.0  ;;  %v522_v14 = vld [vmem:[%s1865_s5] sm:$0x1] }
 0x13d   :  { %v735_v9 = vadd.f32 %v734_v3, %v733_v1  ;;  %v513_v16 = vmax.f32 %v1730_v12, 0.0  ;;  %v707_v1 = vlaneseq }
 0x13f   :  { %v737_v15 = vadd.f32 %v736_v58, %v735_v9  ;;  %v740_v6 = vsel %vm525_vm2, %v513_v16, 0.0  ;;  %v708_v9 = vshrl.u32 %v707_v1, 7 }
 0x141   :  { %v739_v17 = vadd.f32 %v738_v7, %v737_v15 }
 0x143   :  { %v741_v18 = vadd.f32 %v740_v6, %v739_v17 }
 0x145   :  { %v742_v20 = vrot.slane %v741_v18, 4 }
 0x147   :  { %v743_v24 = vadd.f32 %v742_v20, %v741_v18 }
 0x149   :  { %v744_v40 = vrot.slane %v743_v24, 2 }
 0x14b   :  { %v745_v49 = vadd.f32 %v744_v40, %v743_v24 }
 0x14d   :  { %v746_v52 = vrot.slane %v745_v49, 1 }
 0x14f   :  { %v747_v54 = vadd.f32 %v746_v52, %v745_v49 }
 0x151   :  { %v748_v55 = vmul.f32 0.015625, %v747_v54 }
 0x203   :  { %v618_v25 = vpop.f32.mrb[16].mxu1 }
 0x204   :  { %v619_v30 = vadd.f32 %v618_v25, %v522_v14  ;;  %v1124_v36 = vpop.f32.mrb[17].mxu1 }
 0x206   :  { %v622_v42 = vmax.f32 %v619_v30, 0.0 }
 0x208   :  { %1128 = vmatmul.mubr.msk.f32.vlgmr.msra.gmra.mrb[18].mxu1 %vm623_vm4, %v622_v42 }
 0x209   :  { %1208 = vmatpush3.bf16.msra.mxu1 %v1552_v41  ;;  %1146 = vmatprep.mubr.msk.f32.mxu1 %vm1230_vm1, %v1231_v51  ;;  %v524_v41 = vld [vmem:[%s1866_s7] sm:$0x1] }
 0x20a   :  { %1209 = vmatprep.subr.bf16.mxu1 %v1229_v38 }
 0x20d   :  { %1211 = vmatpush3.bf16.msra.mxu1 %v1562_v44 }
 0x20e   :  { %1212 = vmatprep.subr.bf16.mxu1 %v1229_v38 }
 0x211   :  { %1214 = vmatpush3.bf16.msra.mxu1 %v1572_v47 }
 0x212   :  { %1215 = vmatprep.subr.bf16.mxu1 %v1229_v38 }
 0x215   :  { %1217 = vmatpush3.bf16.msra.mxu1 %v1582_v50 }
 0x216   :  { %1149 = vmatprep.subr.mxu1 %v1231_v51 }
 0x218   :  { %1147 = vmatmul.mubr.msk.f32.vlgmr.msra.gmra.mrb[20].mxu1 %vm525_vm2, %v748_v55 }
 0x219   :  { %1150 = vmatpush3.msk.msra.mxu1 %vm627_vm3, %v1671_v21  ;;  %1151 = vmatprep.mubr.msk.f32.mxu1 %vm1230_vm1, %v1231_v51  ;;  %v709_v51 = vsub.s32 0, %v708_v9 }
 0x2db   :  { %v697_v44 = vpop.f32.mrb[18].mxu1 }
 0x2dc   :  { %v698_v38 = vadd.f32 %v697_v44, %v524_v41  ;;  %v1129_v47 = vpop.f32.mrb[19].mxu1 }
 0x2de   :  { %v947_v60 = vmul.f32 -1.442695, %v698_v38 }
 0x2e0   :  { %1221 = vpow2.f32 %v947_v60 }
 0x2ea   :  { %v1222_v50 = vpop.eup %1221 }
 0x2eb   :  { %v704_v61 = vadd.f32 1.0, %v1222_v50  ;;  %v818_v0 = vpop.f32.mrb[20].mxu1 }
 0x2ec   :  { %v819_v3 = vadd.f32 %v818_v0, %v522_v14  ;;  %v1148_v5 = vpop.f32.mrb[21].mxu1 }
 0x2ed   :  { %1223 = vrcp.f32 %v704_v61 }
 0x2ee   :  { %v822_v21 = vmax.f32 %v819_v3, 0.0 }
 0x2f0   :  { %1152 = vmatmul.mubr.msk.f32.vlgmr.msra.gmra.mrb[22].mxu1 %vm623_vm4, %v822_v21 }
 0x2f7   :  { %v1224_v58 = vpop.eup %1223 }
 0x2f8   :  { %v710_v15 = vrot.slane %v1224_v58, %v709_v51 }
 0x2fa   :  { %v711_v7 = vmul.f32 %v710_v15, %v498_v31  ;;  %v712_v17 = vmul.f32 %v710_v15, %v499_v27  ;;  %v713_v6 = vmul.f32 %v710_v15, %v500_v32  ;;  %v714_v18 = vmul.f32 %v710_v15, %v501_v39 }
 0x2fb   :  { %v715_v20 = vmul.f32 %v710_v15, %v502_v46  ;;  %v716_v14 = vmul.f32 %v710_v15, %v503_v56  ;;  %v717_v24 = vmul.f32 %v710_v15, %v504_v4  ;;  %v718_v22 = vmul.f32 %v710_v15, %v505_v11 }
 0x2fc   :  { %719 = vst.msk [vmem:[%s1867_s8] sm:$0xff] %vm525_vm2, %v711_v7  ;;  %720 = vst.msk [vmem:[%s1867_s8 + $0x8] sm:$0xff] %vm525_vm2, %v712_v17 }
 0x2fd   :  { %721 = vst.msk [vmem:[%s1867_s8 + $0x10] sm:$0xff] %vm525_vm2, %v713_v6  ;;  %722 = vst.msk [vmem:[%s1867_s8 + $0x18] sm:$0xff] %vm525_vm2, %v714_v18 }
 0x2fe   :  { %723 = vst.msk [vmem:[%s1867_s8 + $0x20] sm:$0xff] %vm525_vm2, %v715_v20  ;;  %724 = vst.msk [vmem:[%s1867_s8 + $0x28] sm:$0xff] %vm525_vm2, %v716_v14 }
 0x2ff   :  { %725 = vst.msk [vmem:[%s1867_s8 + $0x30] sm:$0xff] %vm525_vm2, %v717_v24  ;;  %726 = vst.msk [vmem:[%s1867_s8 + $0x38] sm:$0xff] %vm525_vm2, %v718_v22 }
 0x3c3   :  { %v892_v19 = vpop.f32.mrb[22].mxu1 }
 0x3c4   :  { %v893_v23 = vadd.f32 %v892_v19, %v524_v41  ;;  %v1153_v27 = vpop.f32.mrb[23].mxu1 }
 0x3c6   :  { %v951_v28 = vmul.f32 -1.442695, %v893_v23 }
 0x3c8   :  { %1225 = vpow2.f32 %v951_v28 }
 0x3d2   :  { %v1226_v31 = vpop.eup %1225 }
 0x3d3   :  { %v899_v32 = vadd.f32 1.0, %v1226_v31 }
 0x3d5   :  { %1227 = vrcp.f32 %v899_v32 }
 0x3df   :  { %v1228_v33 = vpop.eup %1227 }
 0x3e0   :  { %v905_v39 = vrot.slane %v1228_v33, %v709_v51 }
 0x3e2   :  { %v906_v46 = vmul.f32 %v905_v39, %v506_v35  ;;  %v907_v48 = vmul.f32 %v905_v39, %v507_v34  ;;  %v908_v56 = vmul.f32 %v905_v39, %v508_v45  ;;  %v909_v63 = vmul.f32 %v905_v39, %v509_v53 }
 0x3e3   :  { %v910_v4 = vmul.f32 %v905_v39, %v510_v59  ;;  %v911_v10 = vmul.f32 %v905_v39, %v511_v2  ;;  %v912_v11 = vmul.f32 %v905_v39, %v512_v13  ;;  %v913_v29 = vmul.f32 %v905_v39, %v513_v16 }
 0x3e4   :  { %914 = vst.msk [vmem:[%s1867_s8 + $0x40] sm:$0xff] %vm525_vm2, %v906_v46  ;;  %915 = vst.msk [vmem:[%s1867_s8 + $0x48] sm:$0xff] %vm525_vm2, %v907_v48 }
 0x3e5   :  { %916 = vst.msk [vmem:[%s1867_s8 + $0x50] sm:$0xff] %vm525_vm2, %v908_v56  ;;  %917 = vst.msk [vmem:[%s1867_s8 + $0x58] sm:$0xff] %vm525_vm2, %v909_v63 }
 0x3e6   :  { %918 = vst.msk [vmem:[%s1867_s8 + $0x60] sm:$0xff] %vm525_vm2, %v910_v4  ;;  %919 = vst.msk [vmem:[%s1867_s8 + $0x68] sm:$0xff] %vm525_vm2, %v911_v10 }
 0x3e7   :  { %920 = vst.msk [vmem:[%s1867_s8 + $0x70] sm:$0xff] %vm525_vm2, %v912_v11  ;;  %921 = vst.msk [vmem:[%s1867_s8 + $0x78] sm:$0xff] %vm525_vm2, %v913_v29 }

// kernel: crnn_forward.5
= control target key start
LH: loop header
LB: loop body
LE: loop exit
PB: predicated region body
PF: predicated region fallthrough
CT: control target
= control target key end

     0   :  { %s5056_s0 = inlined_call_operand.vmem [shape: f32[8,256], index: 0, kind: input, shape index: {}]   ;;  %s5057_s1 = inlined_call_operand.vmem [shape: f32[256,256], index: 1, kind: input, shape index: {}]   ;;  %s5058_s2 = inlined_call_operand.vmem [shape: f32[32,128], index: 2, kind: input, shape index: {}]   ;;  %s5059_s3 = inlined_call_operand.vmem [shape: f32[32,128], index: 3, kind: input, shape index: {}]   ;;  %s5060_s4 = inlined_call_operand.vmem [shape: f32[1,256], index: 4, kind: input, shape index: {}]   ;;  %s5061_s5 = inlined_call_operand.vmem [shape: f32[32,256], index: 5, kind: input, shape index: {}]   ;;  %s5062_s6 = inlined_call_operand.vmem [shape: f32[32,256], index: 6, kind: input, shape index: {}]   ;;  %s5063_s7 = inlined_call_operand.vmem [shape: f32[32,128], index: 7, kind: input, shape index: {}]   ;;  %s5064_s8 = inlined_call_operand.vmem [shape: f32[32,128], index: 8, kind: input, shape index: {}]   ;;  %s5065_s9 = inlined_call_operand.vmem [shape: f32[1,256], index: 9, kind: input, shape index: {}]   ;;  %s5066_s10 = inlined_call_operand.vmem [shape: f32[1,32], index: 10, kind: input, shape index: {}]   ;;  %s5067_s11 = inlined_call_operand.vmem [shape: f32[1,32], index: 11, kind: input, shape index: {}]   ;;  %s5068_s12 = inlined_call_operand.vmem [shape: f32[1,32], index: 12, kind: input, shape index: {}]   ;;  %s5069_s13 = inlined_call_operand.vmem [shape: f32[1,32], index: 13, kind: input, shape index: {}]   ;;  %s5070_s14 = inlined_call_operand.vmem [shape: f32[1,32], index: 14, kind: input, shape index: {}]   ;;  %s5071_s15 = inlined_call_operand.vmem [shape: f32[1,32], index: 15, kind: input, shape index: {}]   ;;  %s5072_s16 = inlined_call_operand.<no memory space> [shape: f32[1,1], index: 16, kind: input, shape index: {}]   ;;  %s5073_s17 = inlined_call_operand.vmem [shape: f32[32,256], index: 17, kind: input, shape index: {}]   ;;  %s5074_s18 = inlined_call_operand.vmem [shape: f32[32,256], index: 18, kind: input, shape index: {}]   ;;  %s5075_s19 = inlined_call_operand.vmem [shape: f32[1,256], index: 19, kind: input, shape index: {}]   ;;  %s5076_s20 = inlined_call_operand.vmem [shape: f32[256,10], index: 20, kind: input, shape index: {}]   ;;  %s5077_s21 = inlined_call_operand.vmem [shape: f32[1,10], index: 21, kind: input, shape index: {}]   ;;  %s5078_s22 = inlined_call_operand.hbm [shape: f32[2,10], index: 22, kind: output, shape index: {}]  }
   0x1   :  { %5085 = sst [smem:[#allocation6_spill]] %s5056_s0  ;;  %v27_v0 = vstv %s5072_s16 }
   0x2   :  { %5086 = sst [smem:[#allocation7_spill]] %s5057_s1  ;;  %28 = vst [vmem:[#allocation2] sm:$0x1] %v27_v0 }
   0x3   :  { %5087 = sst [smem:[#allocation8_spill]] %s5058_s2 }
   0x4   :  { %5088 = sst [smem:[#allocation9_spill]] %s5059_s3 }
   0x5   :  { %5089 = sst [smem:[#allocation10_spill]] %s5060_s4 }
   0x6   :  { %5090 = sst [smem:[#allocation11_spill]] %s5061_s5 }
   0x7   :  { %5091 = sst [smem:[#allocation12_spill]] %s5062_s6 }
   0x8   :  { %s5092_s4 = sld [smem:[#allocation7_spill]]  ;;  %v3939_v8 = vmov 0.0|0.0   ;;  %vm3940_vm0 = vmmov 0   ;;  %v3941_v9 = vmov 0.0   ;;  %s5093_s2 = sld [smem:[#allocation9_spill]] }
   0x9   :  { %3547 = vmatprep.subr.bf16.mxu1 %v3939_v8  ;;  %3320 = vmatprep.mubr.msk.f32.mxu1 %vm3940_vm0, %v3941_v9  ;;  %s5094_s27 = sld [smem:[#allocation6_spill]] }
   0xe   :  { %v111_v1 = vld [vmem:[%s5092_s4 + $0x8] sm:$0xff]  ;;  %v113_v2 = vld [vmem:[%s5092_s4 + $0x18] sm:$0xff]  ;;  %v110_v3 = vld [vmem:[%s5092_s4] sm:$0xff] }
   0xf   :  { %v3477_v4 = vpack.c.bf16 %v113_v2, %v111_v1  ;;  %v112_v5 = vld [vmem:[%s5092_s4 + $0x10] sm:$0xff]  ;;  %v115_v6 = vld [vmem:[%s5092_s4 + $0x28] sm:$0xff]  ;;  %v117_v7 = vld [vmem:[%s5092_s4 + $0x38] sm:$0xff] }
  0x10   :  { %v3479_v10 = vpack.c.bf16 %v112_v5, %v110_v3  ;;  %v3481_v11 = vpack.c.bf16 %v117_v7, %v115_v6  ;;  %v114_v12 = vld [vmem:[%s5092_s4 + $0x20] sm:$0xff]  ;;  %v116_v13 = vld [vmem:[%s5092_s4 + $0x30] sm:$0xff]  ;;  %v119_v14 = vld [vmem:[%s5092_s4 + $0x48] sm:$0xff] }
  0x11   :  { %3478 = vmatprep.subr.bf16.mxu0 %v3477_v4  ;;  %v121_v15 = vld [vmem:[%s5092_s4 + $0x58] sm:$0xff]  ;;  %v3483_v16 = vpack.c.bf16 %v116_v13, %v114_v12  ;;  %v118_v18 = vld [vmem:[%s5092_s4 + $0x40] sm:$0xff]  ;;  %v120_v19 = vld [vmem:[%s5092_s4 + $0x50] sm:$0xff] }
  0x12   :  { %3480 = vmatpush1.bf16.msra.mxu0 %v3479_v10  ;;  %v3485_v17 = vpack.c.bf16 %v121_v15, %v119_v14  ;;  %v123_v20 = vld [vmem:[%s5092_s4 + $0x68] sm:$0xff]  ;;  %v125_v21 = vld [vmem:[%s5092_s4 + $0x78] sm:$0xff]  ;;  %v3487_v22 = vpack.c.bf16 %v120_v19, %v118_v18  ;;  %v122_v24 = vld [vmem:[%s5092_s4 + $0x60] sm:$0xff] }
  0x13   :  { %3482 = vmatprep.subr.bf16.mxu0 %v3481_v11  ;;  %v3489_v23 = vpack.c.bf16 %v125_v21, %v123_v20  ;;  %v124_v25 = vld [vmem:[%s5092_s4 + $0x70] sm:$0xff]  ;;  %v127_v26 = vld [vmem:[%s5092_s4 + $0x88] sm:$0xff]  ;;  %v129_v27 = vld [vmem:[%s5092_s4 + $0x98] sm:$0xff] }
  0x14   :  { %v3491_v28 = vpack.c.bf16 %v124_v25, %v122_v24  ;;  %v3493_v29 = vpack.c.bf16 %v129_v27, %v127_v26  ;;  %v126_v30 = vld [vmem:[%s5092_s4 + $0x80] sm:$0xff]  ;;  %v128_v31 = vld [vmem:[%s5092_s4 + $0x90] sm:$0xff]  ;;  %v131_v32 = vld [vmem:[%s5092_s4 + $0xa8] sm:$0xff] }
  0x15   :  { %v133_v33 = vld [vmem:[%s5092_s4 + $0xb8] sm:$0xff]  ;;  %v3495_v34 = vpack.c.bf16 %v128_v31, %v126_v30  ;;  %v130_v36 = vld [vmem:[%s5092_s4 + $0xa0] sm:$0xff]  ;;  %v132_v37 = vld [vmem:[%s5092_s4 + $0xb0] sm:$0xff] }
  0x16   :  { %3484 = vmatpush1.bf16.msra.mxu0 %v3483_v16  ;;  %v3497_v35 = vpack.c.bf16 %v133_v33, %v131_v32  ;;  %v135_v38 = vld [vmem:[%s5092_s4 + $0xc8] sm:$0xff]  ;;  %v137_v39 = vld [vmem:[%s5092_s4 + $0xd8] sm:$0xff]  ;;  %v3499_v40 = vpack.c.bf16 %v132_v37, %v130_v36  ;;  %v134_v41 = vld [vmem:[%s5092_s4 + $0xc0] sm:$0xff] }
  0x17   :  { %3486 = vmatprep.subr.bf16.mxu0 %v3485_v17  ;;  %v96_v42 = vld [vmem:[%s5093_s2] sm:$0xff]  ;;  %v97_v43 = vld [vmem:[%s5093_s2 + $0x8] sm:$0xff]  ;;  %v3501_v44 = vpack.c.bf16 %v137_v39, %v135_v38  ;;  %v136_v45 = vld [vmem:[%s5092_s4 + $0xd0] sm:$0xff] }
  0x18   :  { %v139_v46 = vld [vmem:[%s5092_s4 + $0xe8] sm:$0xff]  ;;  %v141_v47 = vld [vmem:[%s5092_s4 + $0xf8] sm:$0xff]  ;;  %v4164_v48 = vpack.c.bf16 %v97_v43, %v96_v42  ;;  %v98_v49 = vld [vmem:[%s5093_s2 + $0x10] sm:$0xff]  ;;  %v3503_v53 = vpack.c.bf16 %v136_v45, %v134_v41 }
  0x19   :  { %v99_v50 = vld [vmem:[%s5093_s2 + $0x18] sm:$0xff]  ;;  %v109_v51 = vld [vmem:[%s5094_s27 + $0x8] sm:$0xff]  ;;  %v138_v54 = vld [vmem:[%s5092_s4 + $0xe0] sm:$0xff]  ;;  %v3505_v55 = vpack.c.bf16 %v141_v47, %v139_v46 }
  0x1a   :  { %3488 = vmatpush1.bf16.msra.mxu0 %v3487_v22  ;;  %3549 = vmatpush3.bf16.msra.mxu1 %v4164_v48  ;;  %v4176_v52 = vpack.c.bf16 %v99_v50, %v98_v49  ;;  %v140_v56 = vld [vmem:[%s5092_s4 + $0xf0] sm:$0xff]  ;;  %v143_v57 = vld [vmem:[%s5092_s4 + $0x108] sm:$0xff] }
  0x1b   :  { %3490 = vmatprep.subr.bf16.mxu0 %v3489_v23  ;;  %249 = vmatprep.mubr.f32.mxu0 %v109_v51 }
  0x1c   :  { %3550 = vmatprep.subr.bf16.mxu1 %v3939_v8 }
  0x1e   :  { %3492 = vmatpush1.bf16.msra.mxu0 %v3491_v28 }
  0x1f   :  { %3494 = vmatprep.subr.bf16.mxu0 %v3493_v29 }
  0x22   :  { %3496 = vmatpush1.bf16.msra.mxu0 %v3495_v34 }
  0x23   :  { %3498 = vmatprep.subr.bf16.mxu0 %v3497_v35 }
  0x26   :  { %3500 = vmatpush1.bf16.msra.mxu0 %v3499_v40 }
  0x27   :  { %3502 = vmatprep.subr.bf16.mxu0 %v3501_v44 }
  0x28   :  { %29 = vsyncpa [#allocation4], 0  ;;  %v145_v58 = vld [vmem:[%s5092_s4 + $0x118] sm:$0xff]  ;;  %s5095_s6 = sld [smem:[#allocation8_spill]]  ;;  %3552 = vmatpush3.bf16.msra.mxu1 %v4176_v52  ;;  %v3507_v61 = vpack.c.bf16 %v140_v56, %v138_v54  ;;  %v142_v63 = vld [vmem:[%s5092_s4 + $0x100] sm:$0xff]  ;;  %s5096_s24 = sld [smem:[#allocation10_spill]] }
  0x29   :  { %3553 = vmatprep.subr.bf16.mxu1 %v3939_v8  ;;  %v3509_v62 = vpack.c.bf16 %v145_v58, %v143_v57  ;;  %v144_v0 = vld [vmem:[%s5092_s4 + $0x110] sm:$0xff]  ;;  %v147_v1 = vld [vmem:[%s5092_s4 + $0x128] sm:$0xff]  ;;  %v149_v3 = vld [vmem:[%s5092_s4 + $0x138] sm:$0xff]  ;;  %s3942_s25 = smov 64   ;;  %s3943_s16 = smov 32   ;;  %vm256_vm1 = vcmask 261120  }
  0x2a   :  { %3504 = vmatpush1.bf16.msra.mxu0 %v3503_v53  ;;  %v3511_v6 = vpack.c.bf16 %v144_v0, %v142_v63  ;;  %v3513_v7 = vpack.c.bf16 %v149_v3, %v147_v1  ;;  %v146_v10 = vld [vmem:[%s5092_s4 + $0x120] sm:$0xff]  ;;  %v148_v11 = vld [vmem:[%s5092_s4 + $0x130] sm:$0xff]  ;;  %v151_v13 = vld [vmem:[%s5092_s4 + $0x148] sm:$0xff]  ;;  %s5097_s28 = sld [smem:[#allocation12_spill]]  ;;  %s5098_s30 = sld [smem:[#allocation11_spill]]  ;;  %vm2487_vm2 = vcmask 254976  }
  0x2b   :  { %3506 = vmatprep.subr.bf16.mxu0 %v3505_v55  ;;  %3321 = vmatmul.mubr.f32.vlgmr.msra.gmra.mrb[0].mxu1 %v3941_v9  ;;  %v153_v14 = vld [vmem:[%s5092_s4 + $0x158] sm:$0xff]  ;;  %v3515_v15 = vpack.c.bf16 %v148_v11, %v146_v10  ;;  %v150_v17 = vld [vmem:[%s5092_s4 + $0x140] sm:$0xff]  ;;  %v152_v18 = vld [vmem:[%s5092_s4 + $0x150] sm:$0xff]  ;;  %v175_v55 = vlaneseq  ;;  %vm3124_vm3 = vcmask 74752  }
  0x2c   :  { %3331 = vmatprep.mubr.msk.f32.mxu1 %vm3940_vm0, %v3941_v9  ;;  %v3517_v16 = vpack.c.bf16 %v153_v14, %v151_v13  ;;  %v155_v19 = vld [vmem:[%s5092_s4 + $0x168] sm:$0xff]  ;;  %v157_v20 = vld [vmem:[%s5092_s4 + $0x178] sm:$0xff]  ;;  %v3519_v21 = vpack.c.bf16 %v152_v18, %v150_v17  ;;  %v154_v23 = vld [vmem:[%s5092_s4 + $0x160] sm:$0xff] }
  0x2d   :  { %v3521_v22 = vpack.c.bf16 %v157_v20, %v155_v19  ;;  %v156_v24 = vld [vmem:[%s5092_s4 + $0x170] sm:$0xff]  ;;  %v159_v25 = vld [vmem:[%s5092_s4 + $0x188] sm:$0xff]  ;;  %v161_v26 = vld [vmem:[%s5092_s4 + $0x198] sm:$0xff]  ;;  %v176_v56 = vshrl.u32 %v175_v55, 7 }
  0x2e   :  { %v92_v59 = vld [vmem:[%s5095_s6] sm:$0xff]  ;;  %v93_v60 = vld [vmem:[%s5095_s6 + $0x8] sm:$0xff]  ;;  %v94_v4 = vld [vmem:[%s5095_s6 + $0x10] sm:$0xff]  ;;  %3508 = vmatpush1.bf16.msra.mxu0 %v3507_v61  ;;  %v3523_v27 = vpack.c.bf16 %v156_v24, %v154_v23  ;;  %v3525_v28 = vpack.c.bf16 %v161_v26, %v159_v25 }
  0x2f   :  { %v4208_v2 = vpack.c.bf16 %v93_v60, %v92_v59  ;;  %v95_v5 = vld [vmem:[%s5095_s6 + $0x18] sm:$0xff]  ;;  %3510 = vmatprep.subr.bf16.mxu0 %v3509_v62  ;;  %v158_v29 = vld [vmem:[%s5092_s4 + $0x180] sm:$0xff]  ;;  %v160_v30 = vld [vmem:[%s5092_s4 + $0x190] sm:$0xff]  ;;  %v4317_v57 = vsub.s32 0, %v176_v56  ;;  %v4319_v58 = vsub.s32 1, %v176_v56 }
  0x30   :  { %v4230_v12 = vpack.c.bf16 %v95_v5, %v94_v4  ;;  %v163_v31 = vld [vmem:[%s5092_s4 + $0x1a8] sm:$0xff]  ;;  %v165_v32 = vld [vmem:[%s5092_s4 + $0x1b8] sm:$0xff]  ;;  %v3527_v33 = vpack.c.bf16 %v160_v30, %v158_v29  ;;  %v162_v35 = vld [vmem:[%s5092_s4 + $0x1a0] sm:$0xff] }
  0x31   :  { %3555 = vmatpush3.bf16.msra.mxu1 %v4208_v2  ;;  %v3529_v34 = vpack.c.bf16 %v165_v32, %v163_v31  ;;  %v164_v36 = vld [vmem:[%s5092_s4 + $0x1b0] sm:$0xff]  ;;  %v167_v37 = vld [vmem:[%s5092_s4 + $0x1c8] sm:$0xff]  ;;  %v169_v38 = vld [vmem:[%s5092_s4 + $0x1d8] sm:$0xff] }
  0x32   :  { %3556 = vmatprep.subr.bf16.mxu1 %v3939_v8  ;;  %3512 = vmatpush1.bf16.msra.mxu0 %v3511_v6  ;;  %v3531_v39 = vpack.c.bf16 %v164_v36, %v162_v35  ;;  %v3533_v40 = vpack.c.bf16 %v169_v38, %v167_v37  ;;  %v166_v41 = vld [vmem:[%s5092_s4 + $0x1c0] sm:$0xff]  ;;  %v168_v42 = vld [vmem:[%s5092_s4 + $0x1d0] sm:$0xff]  ;;  %v171_v43 = vld [vmem:[%s5092_s4 + $0x1e8] sm:$0xff] }
  0x33   :  { %3514 = vmatprep.subr.bf16.mxu0 %v3513_v7  ;;  %v173_v44 = vld [vmem:[%s5092_s4 + $0x1f8] sm:$0xff]  ;;  %v3535_v45 = vpack.c.bf16 %v168_v42, %v166_v41  ;;  %v170_v47 = vld [vmem:[%s5092_s4 + $0x1e0] sm:$0xff]  ;;  %v172_v49 = vld [vmem:[%s5092_s4 + $0x1f0] sm:$0xff] }
  0x34   :  { %v3537_v46 = vpack.c.bf16 %v173_v44, %v171_v43  ;;  %v3539_v50 = vpack.c.bf16 %v172_v49, %v170_v47  ;;  %v108_v51 = vld [vmem:[%s5094_s27] sm:$0xff] }
  0x35   :  { %3558 = vmatpush3.bf16.msra.mxu1 %v4230_v12  ;;  %v74_v59 = vld [vmem:[%s5096_s24] sm:$0x3] }
  0x36   :  { %3559 = vmatprep.subr.bf16.mxu1 %v3939_v8  ;;  %3516 = vmatpush1.bf16.msra.mxu0 %v3515_v15  ;;  %v178_v62 = vrot.slane %v74_v59, %v4317_v57  ;;  %v182_v63 = vrot.slane %v74_v59, %v4319_v58 }
  0x37   :  { %3518 = vmatprep.subr.bf16.mxu0 %v3517_v16 }
  0x3a   :  { %3520 = vmatpush1.bf16.msra.mxu0 %v3519_v21 }
  0x3b   :  { %3522 = vmatprep.subr.bf16.mxu0 %v3521_v22 }
  0x3e   :  { %3524 = vmatpush1.bf16.msra.mxu0 %v3523_v27 }
  0x3f   :  { %3526 = vmatprep.subr.bf16.mxu0 %v3525_v28 }
  0x42   :  { %3528 = vmatpush1.bf16.msra.mxu0 %v3527_v33 }
  0x43   :  { %3530 = vmatprep.subr.bf16.mxu0 %v3529_v34 }
  0x46   :  { %3532 = vmatpush1.bf16.msra.mxu0 %v3531_v39 }
  0x47   :  { %3534 = vmatprep.subr.bf16.mxu0 %v3533_v40 }
  0x4a   :  { %3536 = vmatpush1.bf16.msra.mxu0 %v3535_v45 }
  0x4b   :  { %3538 = vmatprep.subr.bf16.mxu0 %v3537_v46 }
  0x4e   :  { %3540 = vmatpush1.bf16.msra.mxu0 %v3539_v50 }
  0x4f   :  { %3541 = vmatprep.subr.bf16.mxu0 %v3939_v8 }
  0x51   :  { %250 = vmatmul.mubr.f32.vlgmr.msra.gmra.mrb[0].mxu0 %v108_v51 }
  0x52   :  { %3543 = vmatpush3.bf16.msra.mxu0 %v4208_v2  ;;  %3309 = vmatprep.mubr.msk.f32.mxu0 %vm3940_vm0, %v3941_v9 }
  0x53   :  { %3544 = vmatprep.subr.bf16.mxu0 %v3939_v8 }
  0x56   :  { %3546 = vmatpush3.bf16.msra.mxu0 %v4230_v12 }
  0x59   :  { %3310 = vmatmul.mubr.f32.vlgmr.msra.gmra.mrb[2].mxu0 %v3941_v9 }
  0x5a   :  { %1160 = vmatprep.mubr.f32.mxu0 %v3941_v9 }
  0xfe   :  { %v421_v53 = vpop.f32.mrb[0].mxu1 }
  0xff   :  { %v3322_v54 = vpop.f32.mrb[1].mxu1  ;;  %v426_v3 = vrot.slane %v421_v53, 2 }
 0x124   :  { %v251_v60 = vpop.f32.mrb[0].mxu0 }
 0x125   :  { %v253_v61 = vpop.f32.mrb[1].mxu0  ;;  %v4326_v0 = vadd.f32 %v251_v60, %v178_v62 }
 0x126   :  { %v4328_v1 = vadd.f32 %v253_v61, %v182_v63 }
 0x128   :  { %v428_v7 = vadd.f32 %v426_v3, %v4328_v1 }
 0x12a   :  { %v3141_v14 = vmul.f32 -1.442695, %v428_v7 }
 0x12c   :  { %v326_v4 = vpop.f32.mrb[2].mxu0 }
 0x12d   :  { %v330_v5 = vadd.f32 %v326_v4, %v4326_v0  ;;  %v3311_v6 = vpop.f32.mrb[3].mxu0 }
 0x12f   :  { %3769 = vtanh.f32 %v330_v5  ;;  %v3140_v13 = vmul.f32 -1.442695, %v330_v5 }
 0x130   :  { %3771 = vtanh.f32 %v428_v7 }
 0x131   :  { %3773 = vpow2.f32 %v3140_v13 }
 0x132   :  { %3775 = vpow2.f32 %v3141_v14 }
 0x139   :  { %v3770_v10 = vpop.eup %3769 }
 0x13a   :  { %340 = vrot.lane.b32.xlu0 %v3770_v10, %s3942_s25  ;;  %v3772_v11 = vpop.eup %3771 }
 0x13b   :  { %v3774_v15 = vpop.eup %3773 }
 0x13c   :  { %v334_v16 = vadd.f32 1.0, %v3774_v15  ;;  %v3776_v17 = vpop.eup %3775 }
 0x13d   :  { %v432_v18 = vadd.f32 1.0, %v3776_v17 }
 0x13e   :  { %438 = vrot.lane.b32.xlu0 %v3772_v11, %s3942_s25  ;;  %3777 = vrcp.f32 %v334_v16 }
 0x13f   :  { %3779 = vrcp.f32 %v432_v18 }
 0x148   :  { %v3778_v19 = vpop.eup %3777 }
 0x149   :  { %v3780_v22 = vpop.eup %3779  ;;  %v338_v25 = vmul.f32 0.0, %v3778_v19 }
 0x14a   :  { %v436_v28 = vmul.f32 0.0, %v3780_v22 }
 0x1ac   :  { %v341_v20 = vpop.permute.xlu0 %340 }
 0x1ad   :  { %v343_v21 = vmul.f32 %v3778_v19, %v341_v20 }
 0x1af   :  { %345 = vrot.lane.b32.xlu1 %v343_v21, %s3943_s16 }
 0x1b0   :  { %v439_v23 = vpop.permute.xlu0 %438 }
 0x1b1   :  { %v441_v24 = vmul.f32 %v3780_v22, %v439_v23 }
 0x1b3   :  { %443 = vrot.lane.b32.xlu1 %v441_v24, %s3943_s16 }
 0x221   :  { %v346_v26 = vpop.permute.xlu1 %345 }
 0x222   :  { %v4336_v27 = vadd.f32 %v346_v26, %v338_v25 }
 0x224   :  { %3781 = vtanh.f32 %v4336_v27  ;;  %v540_v5 = vrot.slane %v4336_v27, 6 }
 0x225   :  { %v444_v29 = vpop.permute.xlu1 %443 }
 0x226   :  { %v4339_v30 = vadd.f32 %v444_v29, %v436_v28 }
 0x228   :  { %3783 = vtanh.f32 %v4339_v30  ;;  %v647_v11 = vrot.slane %v4339_v30, 2 }
 0x22e   :  { %v3782_v31 = vpop.eup %3781 }
 0x22f   :  { %351 = vrot.lane.b32.xlu0 %v3782_v31, %s3942_s25 }
 0x232   :  { %v3784_v32 = vpop.eup %3783 }
 0x233   :  { %449 = vrot.lane.b32.xlu1 %v3784_v32, %s3942_s25 }
 0x2a1   :  { %v352_v33 = vpop.permute.xlu0 %351 }
 0x2a2   :  { %v354_v34 = vmul.f32 %v3778_v19, %v352_v33 }
 0x2a4   :  { %454 = vrot.lane.b32.xlu0 %v354_v34, %s3943_s16 }
 0x2a5   :  { %v450_v35 = vpop.permute.xlu1 %449 }
 0x2a6   :  { %v452_v36 = vmul.f32 %v3780_v22, %v450_v35 }
 0x2a8   :  { %v560_v37 = vrot.slane %v452_v36, 6 }
 0x2aa   :  { %561 = vrot.lane.b32.xlu1 %v560_v37, %s3943_s16 }
 0x316   :  { %v4346_v38 = vpop.permute.xlu0 %454 }
 0x317   :  { %3332 = vmatmul.mubr.msk.f32.vlgmr.msra.gmra.mrb[2].mxu1 %vm256_vm1, %v4346_v38 }
 0x318   :  { %3561 = vmatpush3.bf16.msra.mxu1 %v4164_v48  ;;  %3342 = vmatprep.mubr.msk.f32.mxu1 %vm3940_vm0, %v3941_v9 }
 0x319   :  { %3562 = vmatprep.subr.bf16.mxu1 %v3939_v8 }
 0x31c   :  { %3564 = vmatpush3.bf16.msra.mxu1 %v4176_v52  ;;  %v4355_v39 = vpop.permute.xlu1 %561 }
 0x31d   :  { %3565 = vmatprep.subr.bf16.mxu1 %v3939_v8 }
 0x31f   :  { %3343 = vmatmul.mubr.msk.f32.vlgmr.msra.gmra.mrb[4].mxu1 %vm256_vm1, %v4355_v39 }
 0x320   :  { %3567 = vmatpush3.bf16.msra.mxu1 %v4208_v2  ;;  %3353 = vmatprep.mubr.msk.f32.mxu1 %vm3940_vm0, %v3941_v9 }
 0x321   :  { %3568 = vmatprep.subr.bf16.mxu1 %v3939_v8 }
 0x324   :  { %3570 = vmatpush3.bf16.msra.mxu1 %v4230_v12 }
 0x325   :  { %3571 = vmatprep.subr.bf16.mxu1 %v3939_v8 }
 0x3ea   :  { %v524_v40 = vpop.f32.mrb[2].mxu1 }
 0x3eb   :  { %v529_v41 = vrot.slane %v524_v40, 6  ;;  %v3333_v42 = vpop.f32.mrb[3].mxu1 }
 0x3ed   :  { %v531_v43 = vadd.f32 %v529_v41, %v4326_v0 }
 0x3ef   :  { %3785 = vtanh.f32 %v531_v43  ;;  %v3143_v51 = vmul.f32 -1.442695, %v531_v43 }
 0x3f2   :  { %v631_v44 = vpop.f32.mrb[4].mxu1 }
 0x3f3   :  { %v636_v45 = vrot.slane %v631_v44, 4  ;;  %v3344_v46 = vpop.f32.mrb[5].mxu1 }
 0x3f5   :  { %v638_v47 = vadd.f32 %v636_v45, %v4328_v1 }
 0x3f7   :  { %3787 = vtanh.f32 %v638_v47  ;;  %v3145_v53 = vmul.f32 -1.442695, %v638_v47 }
 0x3f8   :  { %3789 = vpow2.f32 %v3143_v51 }
 0x3f9   :  { %v3786_v49 = vpop.eup %3785  ;;  %3791 = vpow2.f32 %v3145_v53 }
 0x3fa   :  { %544 = vrot.lane.b32.xlu0 %v3786_v49, %s3942_s25 }
 0x401   :  { %v3788_v50 = vpop.eup %3787 }
 0x402   :  { %651 = vrot.lane.b32.xlu1 %v3788_v50, %s3942_s25  ;;  %v3790_v54 = vpop.eup %3789 }
 0x403   :  { %v535_v55 = vadd.f32 1.0, %v3790_v54  ;;  %v3792_v56 = vpop.eup %3791 }
 0x404   :  { %v642_v59 = vadd.f32 1.0, %v3792_v56 }
 0x405   :  { %3793 = vrcp.f32 %v535_v55 }
 0x406   :  { %3795 = vrcp.f32 %v642_v59 }
 0x40f   :  { %v3794_v60 = vpop.eup %3793 }
 0x410   :  { %v3796_v63 = vpop.eup %3795  ;;  %v542_v6 = vmul.f32 %v3794_v60, %v540_v5  ;;  %v85_v5 = vld [vmem:[%s5097_s28 + $0x10] sm:$0xff] }
 0x411   :  { %v649_v13 = vmul.f32 %v3796_v63, %v647_v11  ;;  %v88_v11 = vld [vmem:[%s5097_s28 + $0x28] sm:$0xff] }
 0x46c   :  { %v545_v61 = vpop.permute.xlu0 %544 }
 0x46d   :  { %v547_v62 = vmul.f32 %v3794_v60, %v545_v61 }
 0x46f   :  { %549 = vrot.lane.b32.xlu0 %v547_v62, %s3943_s16  ;;  %v84_v62 = vld [vmem:[%s5097_s28 + $0x8] sm:$0xff] }
 0x474   :  { %v652_v3 = vpop.permute.xlu1 %651 }
 0x475   :  { %v654_v4 = vmul.f32 %v3796_v63, %v652_v3 }
 0x477   :  { %656 = vrot.lane.b32.xlu1 %v654_v4, %s3943_s16  ;;  %v83_v4 = vld [vmem:[%s5097_s28] sm:$0xff] }
 0x4e1   :  { %v550_v7 = vpop.permute.xlu0 %549 }
 0x4e2   :  { %v4373_v10 = vadd.f32 %v550_v7, %v542_v6  ;;  %v4434_v6 = vpack.c.bf16 %v85_v5, %v83_v4 }
 0x4e4   :  { %3797 = vtanh.f32 %v4373_v10  ;;  %v754_v49 = vrot.slane %v4373_v10, 6 }
 0x4e9   :  { %v657_v14 = vpop.permute.xlu1 %656 }
 0x4ea   :  { %v4377_v15 = vadd.f32 %v657_v14, %v649_v13  ;;  %v90_v13 = vld [vmem:[%s5097_s28 + $0x38] sm:$0xff] }
 0x4eb   :  { %v4444_v14 = vpack.c.bf16 %v90_v13, %v88_v11 }
 0x4ec   :  { %3799 = vtanh.f32 %v4377_v15  ;;  %v861_v54 = vrot.slane %v4377_v15, 2  ;;  %v87_v15 = vld [vmem:[%s5097_s28 + $0x20] sm:$0xff] }
 0x4ee   :  { %v3798_v16 = vpop.eup %3797 }
 0x4ef   :  { %555 = vrot.lane.b32.xlu0 %v3798_v16, %s3942_s25  ;;  %v89_v16 = vld [vmem:[%s5097_s28 + $0x30] sm:$0xff] }
 0x4f6   :  { %v3800_v17 = vpop.eup %3799 }
 0x4f7   :  { %662 = vrot.lane.b32.xlu1 %v3800_v17, %s3942_s25 }
 0x561   :  { %v556_v18 = vpop.permute.xlu0 %555 }
 0x562   :  { %v558_v19 = vmul.f32 %v3794_v60, %v556_v18  ;;  %v4452_v18 = vpack.c.bf16 %v89_v16, %v87_v15 }
 0x564   :  { %v667_v20 = vrot.slane %v558_v19, 2  ;;  %v76_v19 = vld [vmem:[%s5098_s30 + $0x8] sm:$0xff] }
 0x566   :  { %668 = vrot.lane.b32.xlu0 %v667_v20, %s3943_s16  ;;  %v78_v20 = vld [vmem:[%s5098_s30 + $0x18] sm:$0xff] }
 0x569   :  { %v663_v21 = vpop.permute.xlu1 %662 }
 0x56a   :  { %v665_v22 = vmul.f32 %v3796_v63, %v663_v21  ;;  %v86_v63 = vld [vmem:[%s5097_s28 + $0x18] sm:$0xff]  ;;  %v4463_v21 = vpack.c.bf16 %v78_v20, %v76_v19  ;;  %s3944_s28 = smov 96  }
 0x56b   :  { %v4426_v3 = vpack.c.bf16 %v86_v63, %v84_v62 }
 0x56c   :  { %v774_v23 = vrot.slane %v665_v22, 4 }
 0x56d   :  { %3590 = vmatprep.subr.bf16.mxu0 %v4426_v3 }
 0x56e   :  { %775 = vrot.lane.b32.xlu1 %v774_v23, %s3943_s16  ;;  %3592 = vmatpush1.bf16.msra.mxu0 %v4434_v6 }
 0x56f   :  { %3594 = vmatprep.subr.bf16.mxu0 %v4444_v14 }
 0x572   :  { %3596 = vmatpush1.bf16.msra.mxu0 %v4452_v18 }
 0x573   :  { %3598 = vmatprep.subr.bf16.mxu0 %v4463_v21 }
 0x5d8   :  { %v4384_v24 = vpop.permute.xlu0 %668 }
 0x5d9   :  { %3354 = vmatmul.mubr.msk.f32.vlgmr.msra.gmra.mrb[6].mxu1 %vm256_vm1, %v4384_v24 }
 0x5da   :  { %3573 = vmatpush3.bf16.msra.mxu1 %v4164_v48  ;;  %3364 = vmatprep.mubr.msk.f32.mxu1 %vm3940_vm0, %v3941_v9 }
 0x5db   :  { %3574 = vmatprep.subr.bf16.mxu1 %v3939_v8 }
 0x5de   :  { %3576 = vmatpush3.bf16.msra.mxu1 %v4176_v52 }
 0x5df   :  { %3577 = vmatprep.subr.bf16.mxu1 %v3939_v8 }
 0x5e0   :  { %v4394_v25 = vpop.permute.xlu1 %775 }
 0x5e1   :  { %3365 = vmatmul.mubr.msk.f32.vlgmr.msra.gmra.mrb[8].mxu1 %vm256_vm1, %v4394_v25 }
 0x5e2   :  { %3579 = vmatpush3.bf16.msra.mxu1 %v4208_v2  ;;  %3375 = vmatprep.mubr.msk.f32.mxu1 %vm3940_vm0, %v3941_v9 }
 0x5e3   :  { %3580 = vmatprep.subr.bf16.mxu1 %v3939_v8 }
 0x5e6   :  { %3582 = vmatpush3.bf16.msra.mxu1 %v4230_v12 }
 0x5e7   :  { %3583 = vmatprep.subr.bf16.mxu1 %v3939_v8 }
 0x6ac   :  { %v738_v26 = vpop.f32.mrb[6].mxu1 }
 0x6ad   :  { %v743_v27 = vrot.slane %v738_v26, 4  ;;  %v3355_v28 = vpop.f32.mrb[7].mxu1 }
 0x6af   :  { %v745_v29 = vadd.f32 %v743_v27, %v4326_v0 }
 0x6b1   :  { %3801 = vtanh.f32 %v745_v29  ;;  %v3147_v12 = vmul.f32 -1.442695, %v745_v29  ;;  %v77_v29 = vld [vmem:[%s5098_s30 + $0x10] sm:$0xff] }
 0x6b4   :  { %v845_v30 = vpop.f32.mrb[8].mxu1 }
 0x6b5   :  { %v850_v31 = vrot.slane %v845_v30, 6  ;;  %v3366_v32 = vpop.f32.mrb[9].mxu1  ;;  %v82_v30 = vld [vmem:[%s5098_s30 + $0x38] sm:$0xff] }
 0x6b7   :  { %v852_v2 = vadd.f32 %v850_v31, %v4328_v1 }
 0x6b9   :  { %3803 = vtanh.f32 %v852_v2  ;;  %v3149_v35 = vmul.f32 -1.442695, %v852_v2  ;;  %v79_v2 = vld [vmem:[%s5098_s30 + $0x20] sm:$0xff] }
 0x6ba   :  { %3805 = vpow2.f32 %v3147_v12 }
 0x6bb   :  { %v3802_v33 = vpop.eup %3801  ;;  %3807 = vpow2.f32 %v3149_v35 }
 0x6bc   :  { %758 = vrot.lane.b32.xlu0 %v3802_v33, %s3942_s25  ;;  %v81_v33 = vld [vmem:[%s5098_s30 + $0x30] sm:$0xff] }
 0x6c3   :  { %v3804_v34 = vpop.eup %3803 }
 0x6c4   :  { %865 = vrot.lane.b32.xlu1 %v3804_v34, %s3942_s25  ;;  %v3806_v36 = vpop.eup %3805  ;;  %v4507_v34 = vpack.c.bf16 %v81_v33, %v79_v2 }
 0x6c5   :  { %v749_v37 = vadd.f32 1.0, %v3806_v36  ;;  %v3808_v40 = vpop.eup %3807 }
 0x6c6   :  { %v856_v41 = vadd.f32 1.0, %v3808_v40 }
 0x6c7   :  { %3809 = vrcp.f32 %v749_v37 }
 0x6c8   :  { %3811 = vrcp.f32 %v856_v41 }
 0x6d1   :  { %v3810_v42 = vpop.eup %3809 }
 0x6d2   :  { %v3812_v45 = vpop.eup %3811  ;;  %v756_v50 = vmul.f32 %v3810_v42, %v754_v49 }
 0x6d3   :  { %v863_v55 = vmul.f32 %v3812_v45, %v861_v54 }
 0x72e   :  { %v759_v43 = vpop.permute.xlu0 %758 }
 0x72f   :  { %v761_v44 = vmul.f32 %v3810_v42, %v759_v43 }
 0x731   :  { %763 = vrot.lane.b32.xlu0 %v761_v44, %s3943_s16 }
 0x736   :  { %v866_v46 = vpop.permute.xlu1 %865 }
 0x737   :  { %v868_v47 = vmul.f32 %v3812_v45, %v866_v46 }
 0x739   :  { %870 = vrot.lane.b32.xlu1 %v868_v47, %s3943_s16 }
 0x7a3   :  { %v764_v51 = vpop.permute.xlu0 %763 }
 0x7a4   :  { %v4411_v53 = vadd.f32 %v764_v51, %v756_v50 }
 0x7a6   :  { %3813 = vtanh.f32 %v4411_v53 }
 0x7ab   :  { %v871_v56 = vpop.permute.xlu1 %870 }
 0x7ac   :  { %v4415_v59 = vadd.f32 %v871_v56, %v863_v55 }
 0x7ae   :  { %3815 = vtanh.f32 %v4415_v59  ;;  %v1072_v5 = vrot.slane %v4415_v59, 2  ;;  %v104_v59 = vld [vmem:[%s5064_s8] sm:$0xff] }
 0x7b0   :  { %v3814_v60 = vpop.eup %3813 }
 0x7b1   :  { %769 = vrot.lane.b32.xlu0 %v3814_v60, %s3942_s25 }
 0x7b8   :  { %v3816_v61 = vpop.eup %3815 }
 0x7b9   :  { %876 = vrot.lane.b32.xlu1 %v3816_v61, %s3942_s25  ;;  %v968_v61 = vrot.slane %v4411_v53, 6 }
 0x823   :  { %v770_v7 = vpop.permute.xlu0 %769 }
 0x824   :  { %v772_v10 = vmul.f32 %v3810_v42, %v770_v7 }
 0x826   :  { %v881_v17 = vrot.slane %v772_v10, 4 }
 0x828   :  { %882 = vrot.lane.b32.xlu0 %v881_v17, %s3943_s16 }
 0x82b   :  { %v877_v22 = vpop.permute.xlu1 %876 }
 0x82c   :  { %v879_v23 = vmul.f32 %v3812_v45, %v877_v22  ;;  %v105_v22 = vld [vmem:[%s5064_s8 + $0x8] sm:$0xff] }
 0x82e   :  { %v988_v26 = vrot.slane %v879_v23, 2  ;;  %v4549_v23 = vpack.c.bf16 %v105_v22, %v104_v59 }
 0x830   :  { %989 = vrot.lane.b32.xlu1 %v988_v26, %s3943_s16  ;;  %v106_v26 = vld [vmem:[%s5064_s8 + $0x10] sm:$0xff] }
 0x89a   :  { %v4467_v27 = vpop.permute.xlu0 %882 }
 0x89b   :  { %3376 = vmatmul.mubr.msk.f32.vlgmr.msra.gmra.mrb[10].mxu1 %vm256_vm1, %v4467_v27 }
 0x89c   :  { %3585 = vmatpush3.bf16.msra.mxu1 %v4164_v48  ;;  %3386 = vmatprep.mubr.msk.f32.mxu1 %vm3940_vm0, %v3941_v9  ;;  %v75_v48 = vld [vmem:[%s5098_s30] sm:$0xff] }
 0x89d   :  { %3586 = vmatprep.subr.bf16.mxu1 %v3939_v8  ;;  %v4494_v31 = vpack.c.bf16 %v77_v29, %v75_v48 }
 0x8a0   :  { %3588 = vmatpush3.bf16.msra.mxu1 %v4176_v52  ;;  %v80_v52 = vld [vmem:[%s5098_s30 + $0x28] sm:$0xff] }
 0x8a1   :  { %3606 = vmatprep.subr.bf16.mxu1 %v4426_v3  ;;  %v4497_v32 = vpack.c.bf16 %v82_v30, %v80_v52  ;;  %v91_v30 = vld [vmem:[%s5065_s9] sm:$0x3] }
 0x8a2   :  { %v990_v28 = vpop.permute.xlu1 %989 }
 0x8a3   :  { %3387 = vmatmul.mubr.msk.f32.vlgmr.msra.gmra.mrb[12].mxu1 %vm256_vm1, %v990_v28 }
 0x8a4   :  { %3608 = vmatpush1.bf16.msra.mxu1 %v4434_v6  ;;  %1315 = vmatprep.mubr.f32.mxu1 %v3941_v9 }
 0x8a5   :  { %3610 = vmatprep.subr.bf16.mxu1 %v4444_v14 }
 0x8a8   :  { %3612 = vmatpush1.bf16.msra.mxu1 %v4452_v18 }
 0x8a9   :  { %3614 = vmatprep.subr.bf16.mxu1 %v4463_v21 }
 0x8ab   :  { %3156 = vmatmul.mubr.msk.f32.vlgmr.msra.gmra.mrb[14].mxu1 %vm256_vm1, %v990_v28  ;;  %v107_v28 = vld [vmem:[%s5064_s8 + $0x18] sm:$0xff]  ;;  %s3946_s8 = smov [#allocation3]  }
 0x8ac   :  { %3616 = vmatpush1.bf16.msra.mxu1 %v4494_v31  ;;  %1386 = vmatprep.mubr.f32.mxu1 %v3941_v9  ;;  %v4559_v29 = vpack.c.bf16 %v107_v28, %v106_v26 }
 0x8ad   :  { %3618 = vmatprep.subr.bf16.mxu1 %v4497_v32 }
 0x8b0   :  { %3620 = vmatpush1.bf16.msra.mxu1 %v4507_v34 }
 0x8b1   :  { %3638 = vmatprep.subr.bf16.mxu1 %v4426_v3 }
 0x8b3   :  { %3157 = vmatmul.mubr.msk.f32.vlgmr.msra.gmra.mrb[14].mxu1 %vm256_vm1, %v4384_v24 }
 0x8b4   :  { %3640 = vmatpush1.bf16.msra.mxu1 %v4434_v6  ;;  %1603 = vmatprep.mubr.f32.mxu1 %v3941_v9 }
 0x8b5   :  { %3642 = vmatprep.subr.bf16.mxu1 %v4444_v14 }
 0x8b8   :  { %3644 = vmatpush1.bf16.msra.mxu1 %v4452_v18 }
 0x8b9   :  { %3646 = vmatprep.subr.bf16.mxu1 %v4463_v21 }
 0x8bb   :  { %3160 = vmatmul.mubr.msk.f32.vlgmr.msra.gmra.mrb[16].mxu1 %vm256_vm1, %v4355_v39 }
 0x8bc   :  { %3648 = vmatpush1.bf16.msra.mxu1 %v4494_v31  ;;  %1680 = vmatprep.mubr.f32.mxu1 %v3941_v9 }
 0x8bd   :  { %3650 = vmatprep.subr.bf16.mxu1 %v4497_v32 }
 0x8c0   :  { %3652 = vmatpush1.bf16.msra.mxu1 %v4507_v34 }
 0x8c1   :  { %3659 = vmatprep.subr.bf16.mxu1 %v3939_v8 }
 0x96e   :  { %v952_v24 = vpop.f32.mrb[10].mxu1 }
 0x96f   :  { %v957_v12 = vrot.slane %v952_v24, 2  ;;  %v3377_v35 = vpop.f32.mrb[11].mxu1 }
 0x971   :  { %v959_v36 = vadd.f32 %v957_v12, %v4326_v0 }
 0x973   :  { %3817 = vtanh.f32 %v959_v36  ;;  %v3151_v45 = vmul.f32 -1.442695, %v959_v36 }
 0x976   :  { %v1059_v37 = vpop.f32.mrb[12].mxu1 }
 0x977   :  { %v1063_v40 = vadd.f32 %v1059_v37, %v4328_v1  ;;  %v3388_v39 = vpop.f32.mrb[13].mxu1 }
 0x979   :  { %3819 = vtanh.f32 %v1063_v40  ;;  %v3153_v46 = vmul.f32 -1.442695, %v1063_v40  ;;  %v4639_v40 = vrot.slane %v91_v30, %v4317_v57 }
 0x97a   :  { %3821 = vpow2.f32 %v3151_v45 }
 0x97b   :  { %3823 = vpow2.f32 %v3153_v46 }
 0x97d   :  { %v3818_v41 = vpop.eup %3817 }
 0x97e   :  { %972 = vrot.lane.b32.xlu1 %v3818_v41, %s3942_s25 }
 0x983   :  { %v3820_v42 = vpop.eup %3819 }
 0x984   :  { %1076 = vrot.lane.b32.xlu0 %v3820_v42, %s3942_s25  ;;  %v3822_v0 = vpop.eup %3821 }
 0x985   :  { %v963_v47 = vadd.f32 1.0, %v3822_v0  ;;  %v3824_v49 = vpop.eup %3823 }
 0x986   :  { %v4531_v43 = vpop.f32.mrb[14].mxu1  ;;  %v1067_v1 = vadd.f32 1.0, %v3824_v49 }
 0x987   :  { %v4533_v44 = vpop.f32.mrb[15].mxu1  ;;  %3825 = vrcp.f32 %v963_v47 }
 0x988   :  { %3827 = vrcp.f32 %v1067_v1 }
 0x991   :  { %v3826_v50 = vpop.eup %3825 }
 0x992   :  { %v3828_v55 = vpop.eup %3827  ;;  %v970_v62 = vmul.f32 %v3826_v50, %v968_v61 }
 0x993   :  { %v1074_v7 = vmul.f32 %v3828_v55, %v1072_v5 }
 0x9f0   :  { %v973_v51 = vpop.permute.xlu1 %972 }
 0x9f1   :  { %v975_v54 = vmul.f32 %v3826_v50, %v973_v51 }
 0x9f3   :  { %977 = vrot.lane.b32.xlu1 %v975_v54, %s3943_s16 }
 0x9f6   :  { %v1077_v56 = vpop.permute.xlu0 %1076 }
 0x9f7   :  { %v1079_v60 = vmul.f32 %v3828_v55, %v1077_v56 }
 0x9f9   :  { %1081 = vrot.lane.b32.xlu0 %v1079_v60, %s3943_s16 }
 0xa65   :  { %v978_v63 = vpop.permute.xlu1 %977 }
 0xa66   :  { %v980_v4 = vadd.f32 %v978_v63, %v970_v62 }
 0xa68   :  { %3829 = vtanh.f32 %v980_v4 }
 0xa6b   :  { %v1082_v10 = vpop.permute.xlu0 %1081 }
 0xa6c   :  { %v1084_v11 = vadd.f32 %v1082_v10, %v1074_v7 }
 0xa6e   :  { %3831 = vtanh.f32 %v1084_v11 }
 0xa72   :  { %v3830_v13 = vpop.eup %3829 }
 0xa73   :  { %983 = vrot.lane.b32.xlu1 %v3830_v13, %s3942_s25 }
 0xa78   :  { %v3832_v15 = vpop.eup %3831 }
 0xa79   :  { %1087 = vrot.lane.b32.xlu0 %v3832_v15, %s3942_s25 }
 0xae5   :  { %v984_v16 = vpop.permute.xlu1 %983 }
 0xae6   :  { %v986_v17 = vmul.f32 %v3826_v50, %v984_v16 }
 0xae8   :  { %v1611_v19 = vrot.slane %v986_v17, 6 }
 0xaea   :  { %1612 = vrot.lane.b32.xlu1 %v1611_v19, %s3943_s16 }
 0xaeb   :  { %v1088_v53 = vpop.permute.xlu0 %1087 }
 0xaec   :  { %v1090_v20 = vmul.f32 %v3828_v55, %v1088_v53 }
 0xaee   :  { %1092 = vrot.lane.b32.xlu0 %v1090_v20, %s3943_s16 }
 0xb5c   :  { %v1613_v48 = vpop.permute.xlu1 %1612 }
 0xb5d   :  { %3161 = vmatmul.mubr.msk.f32.vlgmr.msra.gmra.mrb[16].mxu1 %vm256_vm1, %v1613_v48 }
 0xb5e   :  { %3661 = vmatpush3.bf16.msra.mxu1 %v4549_v23  ;;  %3408 = vmatprep.mubr.msk.f32.mxu1 %vm3940_vm0, %v3941_v9 }
 0xb5f   :  { %3662 = vmatprep.subr.bf16.mxu1 %v3939_v8 }
 0xb60   :  { %v1093_v52 = vpop.permute.xlu0 %1092 }
 0xb61   :  { %3154 = vmatmul.mubr.msk.f32.vlgmr.msra.gmra.mrb[4].mxu0 %vm256_vm1, %v1093_v52 }
 0xb62   :  { %3600 = vmatpush1.bf16.msra.mxu0 %v4494_v31  ;;  %3664 = vmatpush3.bf16.msra.mxu1 %v4559_v29 }
 0xb63   :  { %3602 = vmatprep.subr.bf16.mxu0 %v4497_v32  ;;  %1231 = vmatprep.mubr.f32.mxu0 %v3941_v9 }
 0xb64   :  { %3671 = vmatprep.subr.bf16.mxu1 %v3939_v8 }
 0xb65   :  { %3409 = vmatmul.mubr.f32.vlgmr.msra.gmra.mrb[18].mxu1 %v3941_v9 }
 0xb66   :  { %3604 = vmatpush1.bf16.msra.mxu0 %v4507_v34  ;;  %3673 = vmatpush3.bf16.msra.mxu1 %v4549_v23 }
 0xb67   :  { %3622 = vmatprep.subr.bf16.mxu0 %v4426_v3  ;;  %3674 = vmatprep.subr.bf16.mxu1 %v3939_v8  ;;  %v101_v3 = vld [vmem:[%s5063_s7 + $0x8] sm:$0xff] }
 0xb68   :  { %3430 = vmatprep.mubr.msk.f32.mxu1 %vm3940_vm0, %v3941_v9 }
 0xb69   :  { %3155 = vmatmul.mubr.msk.f32.vlgmr.msra.gmra.mrb[4].mxu0 %vm256_vm1, %v4346_v38  ;;  %v100_v38 = vld [vmem:[%s5063_s7] sm:$0xff] }
 0xb6a   :  { %3624 = vmatpush1.bf16.msra.mxu0 %v4434_v6  ;;  %1459 = vmatprep.mubr.f32.mxu0 %v3941_v9  ;;  %v4598_v6 = vpack.c.bf16 %v101_v3, %v100_v38  ;;  %v1393_v38 = vadd.f32 %v4531_v43, %v4639_v40 }
 0xb6b   :  { %3626 = vmatprep.subr.bf16.mxu0 %v4444_v14  ;;  %3676 = vmatpush3.bf16.msra.mxu1 %v4559_v29  ;;  %v103_v14 = vld [vmem:[%s5063_s7 + $0x18] sm:$0xff] }
 0xb6c   :  { %3683 = vmatprep.subr.bf16.mxu1 %v3939_v8 }
 0xb6e   :  { %3628 = vmatpush1.bf16.msra.mxu0 %v4452_v18 }
 0xb6f   :  { %3630 = vmatprep.subr.bf16.mxu0 %v4463_v21 }
 0xb71   :  { %3158 = vmatmul.mubr.msk.f32.vlgmr.msra.gmra.mrb[6].mxu0 %vm256_vm1, %v4394_v25  ;;  %v102_v25 = vld [vmem:[%s5063_s7 + $0x10] sm:$0xff] }
 0xb72   :  { %3632 = vmatpush1.bf16.msra.mxu0 %v4494_v31  ;;  %1530 = vmatprep.mubr.f32.mxu0 %v3941_v9  ;;  %v4610_v18 = vpack.c.bf16 %v103_v14, %v102_v25  ;;  %v4630_v31 = vrot.slane %v91_v30, %v4319_v58 }
 0xb73   :  { %3634 = vmatprep.subr.bf16.mxu0 %v4497_v32 }
 0xb76   :  { %3636 = vmatpush1.bf16.msra.mxu0 %v4507_v34 }
 0xb77   :  { %3653 = vmatprep.subr.bf16.mxu0 %v3939_v8 }
 0xb79   :  { %3159 = vmatmul.mubr.msk.f32.vlgmr.msra.gmra.mrb[6].mxu0 %vm256_vm1, %v4467_v27 }
 0xb7a   :  { %3655 = vmatpush3.bf16.msra.mxu0 %v4598_v6  ;;  %3397 = vmatprep.mubr.msk.f32.mxu0 %vm3940_vm0, %v3941_v9 }
 0xb7b   :  { %3656 = vmatprep.subr.bf16.mxu0 %v3939_v8 }
 0xb7e   :  { %3658 = vmatpush3.bf16.msra.mxu0 %v4610_v18 }
 0xb7f   :  { %3665 = vmatprep.subr.bf16.mxu0 %v3939_v8 }
 0xb81   :  { %3398 = vmatmul.mubr.f32.vlgmr.msra.gmra.mrb[8].mxu0 %v3941_v9 }
 0xb82   :  { %3667 = vmatpush3.bf16.msra.mxu0 %v4598_v6  ;;  %3419 = vmatprep.mubr.msk.f32.mxu0 %vm3940_vm0, %v3941_v9 }
 0xb83   :  { %3668 = vmatprep.subr.bf16.mxu0 %v3939_v8 }
 0xb86   :  { %3670 = vmatpush3.bf16.msra.mxu0 %v4610_v18 }
 0xb87   :  { %3677 = vmatprep.subr.bf16.mxu0 %v3939_v8 }
 0xc30   :  { %v4624_v21 = vpop.f32.mrb[16].mxu1 }
 0xc31   :  { %v1684_v27 = vpop.f32.mrb[17].mxu1 }
 0xc32   :  { %v1688_v32 = vadd.f32 %v1684_v27, %v4630_v31 }
 0xc38   :  { %v1850_v2 = vpop.f32.mrb[18].mxu1 }
 0xc39   :  { %v1854_v33 = vadd.f32 %v1850_v2, %v1688_v32  ;;  %v3410_v34 = vpop.f32.mrb[19].mxu1 }
 0xc3b   :  { %3833 = vtanh.f32 %v1854_v33  ;;  %v3163_v0 = vmul.f32 -1.442695, %v1854_v33 }
 0xc3c   :  { %v1233_v24 = vpop.f32.mrb[4].mxu0 }
 0xc3d   :  { %v4633_v12 = vpop.f32.mrb[5].mxu0  ;;  %v1249_v39 = vadd.f32 %v4639_v40, %v1233_v24 }
 0xc45   :  { %v3834_v35 = vpop.eup %3833 }
 0xc46   :  { %1864 = vrot.lane.b32.xlu0 %v3834_v35, %s3942_s25 }
 0xc4c   :  { %v4636_v36 = vpop.f32.mrb[6].mxu0 }
 0xc4d   :  { %v1534_v37 = vpop.f32.mrb[7].mxu0 }
 0xc4e   :  { %v1538_v22 = vadd.f32 %v1534_v37, %v4630_v31 }
 0xc54   :  { %v1755_v41 = vpop.f32.mrb[8].mxu0 }
 0xc55   :  { %v1759_v42 = vadd.f32 %v1755_v41, %v1249_v39  ;;  %v3399_v45 = vpop.f32.mrb[9].mxu0 }
 0xc57   :  { %3835 = vtanh.f32 %v1759_v42  ;;  %v3162_v1 = vmul.f32 -1.442695, %v1759_v42 }
 0xc58   :  { %3837 = vpow2.f32 %v3163_v0 }
 0xc61   :  { %v3836_v46 = vpop.eup %3835 }
 0xc62   :  { %1769 = vrot.lane.b32.xlu1 %v3836_v46, %s3942_s25  ;;  %v3838_v47 = vpop.eup %3837 }
 0xc63   :  { %v1858_v49 = vadd.f32 1.0, %v3838_v47 }
 0xc65   :  { %3839 = vrcp.f32 %v1858_v49 }
 0xc66   :  { %3841 = vpow2.f32 %v3162_v1 }
 0xc6f   :  { %v3840_v50 = vpop.eup %3839 }
 0xc70   :  { %v3842_v55 = vpop.eup %3841  ;;  %v1862_v63 = vmul.f32 0.0, %v3840_v50 }
 0xc71   :  { %v1763_v56 = vadd.f32 1.0, %v3842_v55 }
 0xc73   :  { %3843 = vrcp.f32 %v1763_v56 }
 0xc7d   :  { %v3844_v60 = vpop.eup %3843 }
 0xc7e   :  { %v1767_v10 = vmul.f32 0.0, %v3844_v60 }
 0xcb8   :  { %v1865_v51 = vpop.permute.xlu0 %1864 }
 0xcb9   :  { %v1867_v54 = vmul.f32 %v3840_v50, %v1865_v51 }
 0xcbb   :  { %1869 = vrot.lane.b32.xlu0 %v1867_v54, %s3943_s16 }
 0xcd4   :  { %v1770_v61 = vpop.permute.xlu1 %1769 }
 0xcd5   :  { %v1772_v62 = vmul.f32 %v3844_v60, %v1770_v61 }
 0xcd7   :  { %1774 = vrot.lane.b32.xlu1 %v1772_v62, %s3943_s16 }
 0xd2d   :  { %v1870_v4 = vpop.permute.xlu0 %1869 }
 0xd2e   :  { %v1872_v5 = vadd.f32 %v1870_v4, %v1862_v63 }
 0xd30   :  { %3845 = vtanh.f32 %v1872_v5 }
 0xd3a   :  { %v3846_v7 = vpop.eup %3845 }
 0xd3b   :  { %1875 = vrot.lane.b32.xlu0 %v3846_v7, %s3942_s25 }
 0xd49   :  { %v1775_v11 = vpop.permute.xlu1 %1774 }
 0xd4a   :  { %v1777_v13 = vadd.f32 %v1775_v11, %v1767_v10 }
 0xd4c   :  { %3847 = vtanh.f32 %v1777_v13 }
 0xd56   :  { %v3848_v15 = vpop.eup %3847 }
 0xd57   :  { %1780 = vrot.lane.b32.xlu1 %v3848_v15, %s3942_s25 }
 0xdad   :  { %v1876_v16 = vpop.permute.xlu0 %1875 }
 0xdae   :  { %v4647_v17 = vmul.f32 %v3840_v50, %v1876_v16 }
 0xdb0   :  { %1980 = vrot.lane.b32.xlu0 %v4647_v17, %s3943_s16 }
 0xdc9   :  { %v1781_v19 = vpop.permute.xlu1 %1780 }
 0xdca   :  { %v4651_v53 = vmul.f32 %v3844_v60, %v1781_v19 }
 0xdcc   :  { %1880 = vrot.lane.b32.xlu1 %v4651_v53, %s3943_s16 }
 0xe22   :  { %v4655_v20 = vpop.permute.xlu0 %1980 }
 0xe23   :  { %3431 = vmatmul.mubr.msk.f32.vlgmr.msra.gmra.mrb[20].mxu1 %vm256_vm1, %v4655_v20 }
 0xe24   :  { %3685 = vmatpush3.bf16.msra.mxu1 %v4549_v23  ;;  %3452 = vmatprep.mubr.msk.f32.mxu1 %vm3940_vm0, %v3941_v9 }
 0xe25   :  { %3686 = vmatprep.subr.bf16.mxu1 %v3939_v8 }
 0xe28   :  { %3688 = vmatpush3.bf16.msra.mxu1 %v4559_v29 }
 0xe29   :  { %3695 = vmatprep.subr.bf16.mxu1 %v3939_v8 }
 0xe3e   :  { %v4665_v59 = vpop.permute.xlu1 %1880 }
 0xe3f   :  { %3420 = vmatmul.mubr.msk.f32.vlgmr.msra.gmra.mrb[10].mxu0 %vm256_vm1, %v4665_v59 }
 0xe40   :  { %3679 = vmatpush3.bf16.msra.mxu0 %v4598_v6  ;;  %3441 = vmatprep.mubr.msk.f32.mxu0 %vm3940_vm0, %v3941_v9 }
 0xe41   :  { %3680 = vmatprep.subr.bf16.mxu0 %v3939_v8 }
 0xe44   :  { %3682 = vmatpush3.bf16.msra.mxu0 %v4610_v18 }
 0xe45   :  { %3689 = vmatprep.subr.bf16.mxu0 %v3939_v8 }
 0xef6   :  { %v2050_v26 = vpop.f32.mrb[20].mxu1 }
 0xef7   :  { %v2054_v28 = vadd.f32 %v2050_v26, %v1538_v22  ;;  %v3432_v48 = vpop.f32.mrb[21].mxu1 }
 0xef9   :  { %3849 = vtanh.f32 %v2054_v28  ;;  %v3167_v30 = vmul.f32 -1.442695, %v2054_v28 }
 0xf03   :  { %v3850_v52 = vpop.eup %3849 }
 0xf04   :  { %2064 = vrot.lane.b32.xlu0 %v3850_v52, %s3942_s25 }
 0xf12   :  { %v1950_v3 = vpop.f32.mrb[10].mxu0 }
 0xf13   :  { %v1954_v25 = vadd.f32 %v1950_v3, %v1393_v38  ;;  %v3421_v14 = vpop.f32.mrb[11].mxu0 }
 0xf15   :  { %3851 = vtanh.f32 %v1954_v25  ;;  %v3165_v33 = vmul.f32 -1.442695, %v1954_v25 }
 0xf16   :  { %3853 = vpow2.f32 %v3167_v30 }
 0xf1f   :  { %v3852_v27 = vpop.eup %3851 }
 0xf20   :  { %1964 = vrot.lane.b32.xlu1 %v3852_v27, %s3942_s25  ;;  %v3854_v32 = vpop.eup %3853 }
 0xf21   :  { %v2058_v2 = vadd.f32 1.0, %v3854_v32 }
 0xf23   :  { %3855 = vrcp.f32 %v2058_v2 }
 0xf24   :  { %3857 = vpow2.f32 %v3165_v33 }
 0xf2d   :  { %v3856_v34 = vpop.eup %3855 }
 0xf2e   :  { %v3858_v43 = vpop.eup %3857  ;;  %v2062_v45 = vmul.f32 %v3856_v34, %v1872_v5 }
 0xf2f   :  { %v1958_v37 = vadd.f32 1.0, %v3858_v43 }
 0xf31   :  { %3859 = vrcp.f32 %v1958_v37 }
 0xf3b   :  { %v3860_v39 = vpop.eup %3859 }
 0xf3c   :  { %v1962_v49 = vmul.f32 %v3860_v39, %v1777_v13 }
 0xf76   :  { %v2065_v24 = vpop.permute.xlu0 %2064 }
 0xf77   :  { %v2067_v35 = vmul.f32 %v3856_v34, %v2065_v24 }
 0xf79   :  { %2069 = vrot.lane.b32.xlu0 %v2067_v35, %s3943_s16 }
 0xf92   :  { %v1965_v41 = vpop.permute.xlu1 %1964 }
 0xf93   :  { %v1967_v42 = vmul.f32 %v3860_v39, %v1965_v41 }
 0xf95   :  { %1969 = vrot.lane.b32.xlu1 %v1967_v42, %s3943_s16 }
 0xfeb   :  { %v2070_v46 = vpop.permute.xlu0 %2069 }
 0xfec   :  { %v2072_v0 = vadd.f32 %v2070_v46, %v2062_v45 }
 0xfee   :  { %3861 = vtanh.f32 %v2072_v0 }
 0xff8   :  { %v3862_v47 = vpop.eup %3861 }
 0xff9   :  { %2075 = vrot.lane.b32.xlu0 %v3862_v47, %s3942_s25 }
0x1007   :  { %v1970_v1 = vpop.permute.xlu1 %1969 }
0x1008   :  { %v1972_v50 = vadd.f32 %v1970_v1, %v1962_v49 }
0x100a   :  { %3863 = vtanh.f32 %v1972_v50 }
0x1014   :  { %v3864_v51 = vpop.eup %3863 }
0x1015   :  { %1975 = vrot.lane.b32.xlu1 %v3864_v51, %s3942_s25 }
0x106b   :  { %v2076_v54 = vpop.permute.xlu0 %2075 }
0x106c   :  { %v4684_v55 = vmul.f32 %v3856_v34, %v2076_v54 }
0x106e   :  { %2180 = vrot.lane.b32.xlu0 %v4684_v55, %s3943_s16 }
0x1087   :  { %v1976_v56 = vpop.permute.xlu1 %1975 }
0x1088   :  { %v4688_v60 = vmul.f32 %v3860_v39, %v1976_v56  ;;  %v1250_v39 = vadd.f32 %v4630_v31, %v4633_v12 }
0x108a   :  { %2080 = vrot.lane.b32.xlu1 %v4688_v60, %s3943_s16 }
0x10e0   :  { %v4692_v61 = vpop.permute.xlu0 %2180 }
0x10e1   :  { %3453 = vmatmul.mubr.msk.f32.vlgmr.msra.gmra.mrb[22].mxu1 %vm256_vm1, %v4692_v61 }
0x10e2   :  { %3697 = vmatpush3.bf16.msra.mxu1 %v4549_v23  ;;  %3474 = vmatprep.mubr.msk.f32.mxu1 %vm3940_vm0, %v3941_v9  ;;  %v1394_v23 = vadd.f32 %v4533_v44, %v4630_v31 }
0x10e3   :  { %3698 = vmatprep.subr.bf16.mxu1 %v3939_v8 }
0x10e6   :  { %3700 = vmatpush3.bf16.msra.mxu1 %v4559_v29 }
0x10fc   :  { %v4701_v62 = vpop.permute.xlu1 %2080 }
0x10fd   :  { %3442 = vmatmul.mubr.msk.f32.vlgmr.msra.gmra.mrb[12].mxu0 %vm256_vm1, %v4701_v62 }
0x10fe   :  { %3691 = vmatpush3.bf16.msra.mxu0 %v4598_v6  ;;  %3463 = vmatprep.mubr.msk.f32.mxu0 %vm3940_vm0, %v3941_v9  ;;  %v1537_v6 = vadd.f32 %v4636_v36, %v4639_v40 }
0x10ff   :  { %3692 = vmatprep.subr.bf16.mxu0 %v3939_v8 }
0x1102   :  { %3694 = vmatpush3.bf16.msra.mxu0 %v4610_v18 }
0x11b4   :  { %v2250_v63 = vpop.f32.mrb[22].mxu1 }
0x11b5   :  { %v2254_v4 = vadd.f32 %v2250_v63, %v1394_v23  ;;  %v3454_v29 = vpop.f32.mrb[23].mxu1 }
0x11b7   :  { %3865 = vtanh.f32 %v2254_v4  ;;  %v3171_v18 = vmul.f32 -1.442695, %v2254_v4 }
0x11c1   :  { %v3866_v5 = vpop.eup %3865 }
0x11c2   :  { %2264 = vrot.lane.b32.xlu0 %v3866_v5, %s3942_s25 }
0x11d0   :  { %v2150_v7 = vpop.f32.mrb[12].mxu0 }
0x11d1   :  { %v2154_v10 = vadd.f32 %v2150_v7, %v1537_v6  ;;  %v3443_v11 = vpop.f32.mrb[13].mxu0 }
0x11d3   :  { %3867 = vtanh.f32 %v2154_v10  ;;  %v3169_v15 = vmul.f32 -1.442695, %v2154_v10 }
0x11d4   :  { %3869 = vpow2.f32 %v3171_v18 }
0x11dd   :  { %v3868_v8 = vpop.eup %3867 }
0x11de   :  { %2164 = vrot.lane.b32.xlu1 %v3868_v8, %s3942_s25  ;;  %v3870_v44 = vpop.eup %3869 }
0x11df   :  { %v2258_v13 = vadd.f32 1.0, %v3870_v44 }
0x11e1   :  { %3871 = vrcp.f32 %v2258_v13 }
0x11e2   :  { %3873 = vpow2.f32 %v3169_v15 }
0x11eb   :  { %v3872_v16 = vpop.eup %3871 }
0x11ec   :  { %v3874_v36 = vpop.eup %3873  ;;  %v2262_v38 = vmul.f32 %v3872_v16, %v2072_v0  ;;  %v1687_v0 = vadd.f32 %v4624_v21, %v4639_v40 }
0x11ed   :  { %v2158_v26 = vadd.f32 1.0, %v3874_v36  ;;  %v2488_v36 = vsel %vm2487_vm2, %v4665_v59, 0.0 }
0x11ef   :  { %3875 = vrcp.f32 %v2158_v26  ;;  %v2601_v26 = vsel %vm2487_vm2, %v4701_v62, 0.0 }
0x11f9   :  { %v3876_v28 = vpop.eup %3875 }
0x11fa   :  { %v2162_v27 = vmul.f32 %v3876_v28, %v1972_v50 }
0x1234   :  { %v2265_v19 = vpop.permute.xlu0 %2264 }
0x1235   :  { %v2267_v22 = vmul.f32 %v3872_v16, %v2265_v19 }
0x1237   :  { %2269 = vrot.lane.b32.xlu0 %v2267_v22, %s3943_s16 }
0x1250   :  { %v2165_v48 = vpop.permute.xlu1 %2164 }
0x1251   :  { %v2167_v52 = vmul.f32 %v3876_v28, %v2165_v48  ;;  %v2661_v48 = vsel %vm2487_vm2, %v4692_v61, 0.0 }
0x1253   :  { %2169 = vrot.lane.b32.xlu1 %v2167_v52, %s3943_s16  ;;  %v2720_v52 = vsel %vm2487_vm2, %v4655_v20, 0.0 }
0x12a9   :  { %v2270_v3 = vpop.permute.xlu0 %2269 }
0x12aa   :  { %v2272_v25 = vadd.f32 %v2270_v3, %v2262_v38 }
0x12ac   :  { %3877 = vtanh.f32 %v2272_v25 }
0x12b6   :  { %v3878_v14 = vpop.eup %3877 }
0x12b7   :  { %2275 = vrot.lane.b32.xlu0 %v3878_v14, %s3942_s25 }
0x12c5   :  { %v2170_v30 = vpop.permute.xlu1 %2169 }
0x12c6   :  { %v2172_v32 = vadd.f32 %v2170_v30, %v2162_v27 }
0x12c8   :  { %3879 = vtanh.f32 %v2172_v32 }
0x12d2   :  { %v3880_v2 = vpop.eup %3879 }
0x12d3   :  { %2175 = vrot.lane.b32.xlu1 %v3880_v2, %s3942_s25 }
0x1329   :  { %v2276_v33 = vpop.permute.xlu0 %2275 }
0x132a   :  { %v4720_v34 = vmul.f32 %v3872_v16, %v2276_v33 }
0x132c   :  { %2380 = vrot.lane.b32.xlu0 %v4720_v34, %s3943_s16 }
0x1345   :  { %v2176_v24 = vpop.permute.xlu1 %2175 }
0x1346   :  { %v4724_v35 = vmul.f32 %v3876_v28, %v2176_v24 }
0x1348   :  { %2280 = vrot.lane.b32.xlu1 %v4724_v35, %s3943_s16 }
0x139e   :  { %v2381_v43 = vpop.permute.xlu0 %2380 }
0x139f   :  { %3475 = vmatmul.mubr.msk.f32.vlgmr.msra.gmra.mrb[24].mxu1 %vm256_vm1, %v2381_v43  ;;  %v2605_v28 = vsel %vm2487_vm2, %v2381_v43, 0.0 }
0x13ba   :  { %v4729_v37 = vpop.permute.xlu1 %2280 }
0x13bb   :  { %3464 = vmatmul.mubr.msk.f32.vlgmr.msra.gmra.mrb[14].mxu0 %vm256_vm1, %v4729_v37  ;;  %v2657_v38 = vsel %vm2487_vm2, %v4729_v37, 0.0 }
0x13bc   :  { %2916 = vmatprep.mubr.f32.mxu0 %v3941_v9 }
0x1472   :  { %v2450_v41 = vpop.f32.mrb[24].mxu1 }
0x1473   :  { %v2454_v42 = vadd.f32 %v2450_v41, %v1250_v39  ;;  %v3476_v45 = vpop.f32.mrb[25].mxu1 }
0x1475   :  { %3881 = vtanh.f32 %v2454_v42  ;;  %v3175_v51 = vmul.f32 -1.442695, %v2454_v42 }
0x147f   :  { %v3882_v46 = vpop.eup %3881 }
0x1480   :  { %2464 = vrot.lane.b32.xlu0 %v3882_v46, %s3942_s25 }
0x148e   :  { %v2350_v47 = vpop.f32.mrb[14].mxu0 }
0x148f   :  { %v2354_v49 = vadd.f32 %v2350_v47, %v1687_v0  ;;  %v3465_v1 = vpop.f32.mrb[15].mxu0 }
0x1491   :  { %3883 = vtanh.f32 %v2354_v49  ;;  %v3173_v54 = vmul.f32 -1.442695, %v2354_v49 }
0x1492   :  { %3885 = vpow2.f32 %v3175_v51 }
0x149b   :  { %v3884_v50 = vpop.eup %3883 }
0x149c   :  { %2364 = vrot.lane.b32.xlu1 %v3884_v50, %s3942_s25  ;;  %v3886_v31 = vpop.eup %3885 }
0x149d   :  { %v2458_v12 = vadd.f32 1.0, %v3886_v31 }
0x149f   :  { %3887 = vrcp.f32 %v2458_v12 }
0x14a0   :  { %3889 = vpow2.f32 %v3173_v54 }
0x14a9   :  { %v3888_v56 = vpop.eup %3887 }
0x14aa   :  { %v3890_v21 = vpop.eup %3889  ;;  %v2462_v6 = vmul.f32 %v3888_v56, %v2272_v25 }
0x14ab   :  { %v2358_v40 = vadd.f32 1.0, %v3890_v21 }
0x14ad   :  { %3891 = vrcp.f32 %v2358_v40 }
0x14b7   :  { %v3892_v4 = vpop.eup %3891 }
0x14b8   :  { %v2362_v8 = vmul.f32 %v3892_v4, %v2172_v32 }
0x14f2   :  { %v2465_v23 = vpop.permute.xlu0 %2464 }
0x14f3   :  { %v2467_v63 = vmul.f32 %v3888_v56, %v2465_v23 }
0x14f5   :  { %2469 = vrot.lane.b32.xlu0 %v2467_v63, %s3943_s16 }
0x150e   :  { %v2365_v29 = vpop.permute.xlu1 %2364 }
0x150f   :  { %v2367_v5 = vmul.f32 %v3892_v4, %v2365_v29 }
0x1511   :  { %2369 = vrot.lane.b32.xlu1 %v2367_v5, %s3943_s16 }
0x1567   :  { %v2470_v7 = vpop.permute.xlu0 %2469 }
0x1568   :  { %v2472_v10 = vadd.f32 %v2470_v7, %v2462_v6  ;;  %v3176_v7 = vld [vmem:[%s5066_s10] ss:$0 sm:$0xff] }
0x156a   :  { %3893 = vtanh.f32 %v2472_v10 }
0x1574   :  { %v3894_v11 = vpop.eup %3893 }
0x1575   :  { %2475 = vrot.lane.b32.xlu0 %v3894_v11, %s3942_s25 }
0x1583   :  { %v2370_v18 = vpop.permute.xlu1 %2369 }
0x1584   :  { %v2372_v44 = vadd.f32 %v2370_v18, %v2362_v8 }
0x1586   :  { %3895 = vtanh.f32 %v2372_v44 }
0x1590   :  { %v3896_v13 = vpop.eup %3895 }
0x1591   :  { %2375 = vrot.lane.b32.xlu1 %v3896_v13, %s3942_s25 }
0x15e7   :  { %v2476_v15 = vpop.permute.xlu0 %2475 }
0x15e8   :  { %v2478_v16 = vmul.f32 %v3888_v56, %v2476_v15 }
0x15ea   :  { %2492 = vrot.lane.b32.xlu0 %v2478_v16, %s3943_s16 }
0x1603   :  { %v2376_v19 = vpop.permute.xlu1 %2375 }
0x1604   :  { %v2378_v22 = vmul.f32 %v3892_v4, %v2376_v19  ;;  %v3177_v19 = vld [vmem:[%s5068_s12] ss:$0 sm:$0xff] }
0x1606   :  { %2713 = vrot.lane.b32.xlu1 %v2378_v22, %s3943_s16 }
0x1609   :  { %2489 = vadd.xlane.f32.xlu0 %v2488_v36  ;;  %v3178_v36 = vld [vmem:[%s5067_s11] ss:$0 sm:$0xff] }
0x160d   :  { %2602 = vadd.xlane.f32.xlu0 %v2601_v26  ;;  %v3181_v26 = vld [vmem:[%s5071_s15] ss:$0 sm:$0xff] }
0x1611   :  { %2606 = vadd.xlane.f32.xlu0 %v2605_v28  ;;  %v3180_v28 = vld [vmem:[%s5070_s14] ss:$0 sm:$0xff] }
0x1615   :  { %2662 = vadd.xlane.f32.xlu0 %v2661_v48 }
0x1619   :  { %2721 = vadd.xlane.f32.xlu0 %v2720_v52 }
0x162a   :  { %2658 = vadd.xlane.f32.xlu1 %v2657_v38 }
0x165c   :  { %v2493_v59 = vpop.permute.xlu0 %2492 }
0x165d   :  { %v2495_v3 = vsel %vm2487_vm2, %v2493_v59, 0.0 }
0x165e   :  { %2496 = vadd.xlane.f32.xlu1 %v2495_v3 }
0x1678   :  { %v2714_v62 = vpop.permute.xlu1 %2713 }
0x1679   :  { %v2716_v25 = vsel %vm2487_vm2, %v2714_v62, 0.0 }
0x167a   :  { %2717 = vadd.xlane.f32.xlu1 %v2716_v25 }
0x1696   :  { %v2490_v14 = vpop.xlane.xlu0 %2489 }
0x169a   :  { %v2603_v27 = vpop.xlane.xlu0 %2602 }
0x169e   :  { %v2607_v61 = vpop.xlane.xlu0 %2606 }
0x169f   :  { %v2608_v30 = vadd.f32 %v2607_v61, %v2603_v27 }
0x16a1   :  { %v2609_v32 = vmul.f32 0.015625, %v2608_v30 }
0x16a2   :  { %v2663_v43 = vpop.xlane.xlu0 %2662 }
0x16a3   :  { %v4760_v20 = vsub.f32 %v4688_v60, %v2609_v32  ;;  %v4763_v2 = vsub.f32 %v4720_v34, %v2609_v32 }
0x16a5   :  { %v2612_v33 = vmul.f32 %v4760_v20, %v4760_v20  ;;  %v2620_v24 = vmul.f32 %v4763_v2, %v4763_v2 }
0x16a6   :  { %v2722_v50 = vpop.xlane.xlu0 %2721 }
0x16a7   :  { %2614 = vrot.lane.b32.xlu1 %v2612_v33, %s3943_s16 }
0x16ab   :  { %2622 = vrot.lane.b32.xlu1 %v2620_v24, %s3943_s16 }
0x16b7   :  { %v2659_v37 = vpop.xlane.xlu1 %2658 }
0x16b8   :  { %v2664_v39 = vadd.f32 %v2663_v43, %v2659_v37 }
0x16ba   :  { %v2665_v41 = vmul.f32 0.015625, %v2664_v39 }
0x16bc   :  { %v4772_v60 = vsub.f32 %v4724_v35, %v2665_v41  ;;  %v4775_v34 = vsub.f32 %v4684_v55, %v2665_v41 }
0x16be   :  { %v2676_v42 = vmul.f32 %v4775_v34, %v4775_v34  ;;  %v2668_v45 = vmul.f32 %v4772_v60, %v4772_v60 }
0x16c0   :  { %2678 = vrot.lane.b32.xlu1 %v2676_v42, %s3943_s16  ;;  %2670 = vrot.lane.b32.xlu0 %v2668_v45, %s3943_s16 }
0x16eb   :  { %v2497_v46 = vpop.xlane.xlu1 %2496 }
0x16ec   :  { %v2498_v0 = vadd.f32 %v2497_v46, %v2490_v14 }
0x16ee   :  { %v2499_v47 = vmul.f32 0.015625, %v2498_v0 }
0x16f0   :  { %v4784_v49 = vsub.f32 %v4651_v53, %v2499_v47  ;;  %v4786_v35 = vsub.f32 %v2478_v16, %v2499_v47 }
0x16f2   :  { %v2502_v55 = vmul.f32 %v4784_v49, %v4784_v49  ;;  %v2510_v1 = vmul.f32 %v4786_v35, %v4786_v35 }
0x16f4   :  { %2504 = vrot.lane.b32.xlu1 %v2502_v55, %s3943_s16  ;;  %2512 = vrot.lane.b32.xlu0 %v2510_v1, %s3943_s16 }
0x1707   :  { %v2718_v51 = vpop.xlane.xlu1 %2717 }
0x1708   :  { %v2723_v31 = vadd.f32 %v2722_v50, %v2718_v51 }
0x170a   :  { %v2724_v12 = vmul.f32 0.015625, %v2723_v31 }
0x170c   :  { %v4794_v54 = vsub.f32 %v2378_v22, %v2724_v12  ;;  %v4797_v53 = vsub.f32 %v4647_v17, %v2724_v12  ;;  %v3179_v22 = vld [vmem:[%s5069_s13] ss:$0 sm:$0xff] }
0x170e   :  { %v2735_v56 = vmul.f32 %v4797_v53, %v4797_v53  ;;  %v2727_v23 = vmul.f32 %v4794_v54, %v4794_v54 }
0x1710   :  { %2737 = vrot.lane.b32.xlu1 %v2735_v56, %s3943_s16  ;;  %2729 = vrot.lane.b32.xlu0 %v2727_v23, %s3943_s16 }
0x1719   :  { %v2615_v63 = vpop.permute.xlu1 %2614 }
0x171a   :  { %v2617_v21 = vsel %vm2487_vm2, %v2615_v63, 0.0 }
0x171d   :  { %v2623_v40 = vpop.permute.xlu1 %2622 }
0x171e   :  { %v2625_v29 = vsel %vm2487_vm2, %v2623_v40, 0.0 }
0x172f   :  { %2618 = vadd.xlane.f32.xlu0 %v2617_v21 }
0x1732   :  { %v2671_v4 = vpop.permute.xlu0 %2670  ;;  %v2679_v17 = vpop.permute.xlu1 %2678 }
0x1733   :  { %2626 = vadd.xlane.f32.xlu0 %v2625_v29  ;;  %v2673_v5 = vsel %vm2487_vm2, %v2671_v4, 0.0  ;;  %v2681_v6 = vsel %vm2487_vm2, %v2679_v17, 0.0 }
0x1734   :  { %2674 = vadd.xlane.f32.xlu1 %v2673_v5 }
0x1737   :  { %2682 = vadd.xlane.f32.xlu0 %v2681_v6 }
0x1745   :  { %2528 = vrot.lane.b32.xlu1 %v3176_v7, %s3944_s28 }
0x1766   :  { %v2505_v10 = vpop.permute.xlu1 %2504  ;;  %v2513_v11 = vpop.permute.xlu0 %2512 }
0x1767   :  { %v2507_v8 = vsel %vm2487_vm2, %v2505_v10, 0.0  ;;  %v2515_v18 = vsel %vm2487_vm2, %v2513_v11, 0.0 }
0x1768   :  { %2508 = vadd.xlane.f32.xlu0 %v2507_v8 }
0x1769   :  { %2516 = vadd.xlane.f32.xlu1 %v2515_v18 }
0x1782   :  { %v2738_v44 = vpop.permute.xlu1 %2737  ;;  %v2730_v13 = vpop.permute.xlu0 %2729 }
0x1783   :  { %v2740_v15 = vsel %vm2487_vm2, %v2738_v44, 0.0  ;;  %v2732_v16 = vsel %vm2487_vm2, %v2730_v13, 0.0 }
0x1784   :  { %2741 = vadd.xlane.f32.xlu0 %v2740_v15  ;;  %2733 = vadd.xlane.f32.xlu1 %v2732_v16 }
0x1795   :  { %2537 = vrot.lane.b32.xlu1 %v3177_v19, %s3944_s28 }
0x1799   :  { %2556 = vrot.lane.b32.xlu1 %v3179_v22, %s3944_s28 }
0x179a   :  { %2547 = vrot.lane.b32.xlu0 %v3178_v36, %s3944_s28 }
0x179d   :  { %2581 = vrot.lane.b32.xlu1 %v3181_v26, %s3944_s28 }
0x179e   :  { %2565 = vrot.lane.b32.xlu0 %v3180_v28, %s3944_s28 }
0x17bc   :  { %v2619_v48 = vpop.xlane.xlu0 %2618 }
0x17c0   :  { %v2627_v52 = vpop.xlane.xlu0 %2626 }
0x17c1   :  { %v2675_v38 = vpop.xlane.xlu1 %2674  ;;  %v2628_v59 = vadd.f32 %v2627_v52, %v2619_v48 }
0x17c3   :  { %v2629_v25 = vmul.f32 0.015625, %v2628_v59 }
0x17c4   :  { %v2683_v3 = vpop.xlane.xlu0 %2682 }
0x17c5   :  { %v2529_v62 = vpop.permute.xlu1 %2528  ;;  %v2684_v14 = vadd.f32 %v2683_v3, %v2675_v38  ;;  %v2630_v30 = vadd.f32 1e-05, %v2629_v25 }
0x17c7   :  { %v2685_v32 = vmul.f32 0.015625, %v2684_v14  ;;  %3897 = vrsqrt.f32 %v2630_v30 }
0x17c9   :  { %v2686_v24 = vadd.f32 1e-05, %v2685_v32 }
0x17cb   :  { %3899 = vrsqrt.f32 %v2686_v24 }
0x17d1   :  { %v3898_v39 = vpop.eup %3897 }
0x17d2   :  { %v2632_v46 = vmul.f32 %v3898_v39, %v4760_v20  ;;  %v2635_v56 = vmul.f32 %v3898_v39, %v4763_v2 }
0x17d4   :  { %v2633_v51 = vmul.f32 %v2632_v46, %v2529_v62 }
0x17d5   :  { %v3900_v0 = vpop.eup %3899 }
0x17d6   :  { %v2688_v31 = vmul.f32 %v3900_v0, %v4772_v60  ;;  %v2691_v17 = vmul.f32 %v3900_v0, %v4775_v34 }
0x17d8   :  { %v2689_v4 = vmul.f32 %v2688_v31, %v2529_v62 }
0x17f5   :  { %v2509_v61 = vpop.xlane.xlu0 %2508 }
0x17f6   :  { %v2517_v27 = vpop.xlane.xlu1 %2516 }
0x17f7   :  { %v2518_v33 = vadd.f32 %v2517_v27, %v2509_v61 }
0x17f9   :  { %v2519_v43 = vmul.f32 0.015625, %v2518_v33 }
0x17fb   :  { %v2520_v37 = vadd.f32 1e-05, %v2519_v43 }
0x17fd   :  { %3901 = vrsqrt.f32 %v2520_v37 }
0x1807   :  { %v3902_v12 = vpop.eup %3901 }
0x1808   :  { %v2522_v20 = vmul.f32 %v3902_v12, %v4784_v49  ;;  %v2541_v8 = vmul.f32 %v3902_v12, %v4786_v35 }
0x180a   :  { %v2531_v10 = vmul.f32 %v2529_v62, %v2522_v20 }
0x1811   :  { %v2734_v41 = vpop.xlane.xlu1 %2733  ;;  %v2742_v42 = vpop.xlane.xlu0 %2741 }
0x1812   :  { %v2743_v45 = vadd.f32 %v2742_v42, %v2734_v41  ;;  %v3945_v41 = vmov 0  }
0x1813   :  { %3768 = vset.pattern.permute.xlu0 %v3945_v41  ;;  %3767 = vset.pattern.permute.xlu1 %v3945_v41  ;;  %v2834_v41 = vld [vmem:[%s5073_s17 + $0x18] sm:$0xff] }
0x1814   :  { %v2744_v47 = vmul.f32 0.015625, %v2743_v45 }
0x1815   :  { %v2538_v55 = vpop.permute.xlu1 %2537  ;;  %v2548_v1 = vpop.permute.xlu0 %2547 }
0x1816   :  { %v2745_v50 = vadd.f32 1e-05, %v2744_v47  ;;  %v4834_v23 = vadd.f32 %v2633_v51, %v2538_v55  ;;  %v2636_v40 = vmul.f32 %v2635_v56, %v2548_v1  ;;  %v4841_v6 = vadd.f32 %v2689_v4, %v2538_v55 }
0x1817   :  { %v2692_v2 = vmul.f32 %v2691_v17, %v2548_v1  ;;  %v4850_v34 = vadd.f32 %v2538_v55, %v2531_v10  ;;  %v2550_v44 = vmul.f32 %v2548_v1, %v2541_v8 }
0x1818   :  { %3903 = vrsqrt.f32 %v2745_v50 }
0x1819   :  { %v2557_v63 = vpop.permute.xlu1 %2556  ;;  %v2566_v21 = vpop.permute.xlu0 %2565 }
0x181a   :  { %v2638_v29 = vmul.f32 %v4834_v23, %v2566_v21  ;;  %v4839_v5 = vadd.f32 %v2636_v40, %v2557_v63  ;;  %v2694_v11 = vmul.f32 %v4841_v6, %v2566_v21  ;;  %v4847_v49 = vadd.f32 %v2692_v2, %v2557_v63 }
0x181b   :  { %v2568_v19 = vmul.f32 %v2566_v21, %v4850_v34  ;;  %v4857_v22 = vadd.f32 %v2557_v63, %v2550_v44 }
0x181c   :  { %2640 = vrot.lane.b32.xlu0 %v2638_v29, %s3943_s16 }
0x181d   :  { %v2582_v60 = vpop.permute.xlu1 %2581 }
0x181e   :  { %v2646_v7 = vmul.f32 %v4839_v5, %v2582_v60  ;;  %v2702_v13 = vmul.f32 %v4847_v49, %v2582_v60  ;;  %v2584_v26 = vmul.f32 %v2582_v60, %v4857_v22 }
0x1820   :  { %2648 = vrot.lane.b32.xlu1 %v2646_v7, %s3943_s16  ;;  %2696 = vrot.lane.b32.xlu0 %v2694_v11, %s3943_s16 }
0x1822   :  { %v3904_v18 = vpop.eup %3903 }
0x1823   :  { %v2747_v15 = vmul.f32 %v3904_v18, %v4794_v54  ;;  %v2750_v16 = vmul.f32 %v3904_v18, %v4797_v53 }
0x1824   :  { %2704 = vrot.lane.b32.xlu1 %v2702_v13, %s3943_s16  ;;  %2570 = vrot.lane.b32.xlu0 %v2568_v19, %s3943_s16 }
0x1825   :  { %v2748_v35 = vmul.f32 %v2747_v15, %v2529_v62  ;;  %v2751_v36 = vmul.f32 %v2750_v16, %v2548_v1  ;;  %v3182_v1 = vld [vmem:[#allocation2] ss:$0 sm:$0xff] }
0x1827   :  { %v4862_v28 = vadd.f32 %v2748_v35, %v2538_v55  ;;  %v4864_v48 = vadd.f32 %v2751_v36, %v2557_v63 }
0x1828   :  { %2586 = vrot.lane.b32.xlu1 %v2584_v26, %s3943_s16 }
0x1829   :  { %v2753_v54 = vmul.f32 %v4862_v28, %v2566_v21  ;;  %v2761_v53 = vmul.f32 %v4864_v48, %v2582_v60 }
0x182b   :  { %2755 = vrot.lane.b32.xlu0 %v2753_v54, %s3943_s16 }
0x182c   :  { %2763 = vrot.lane.b32.xlu1 %v2761_v53, %s3943_s16 }
0x188e   :  { %v2641_v52 = vpop.permute.xlu0 %2640 }
0x188f   :  { %v2643_v38 = vsel %vm2487_vm2, %v2641_v52, 0.0 }
0x1890   :  { %2644 = vadd.xlane.f32.xlu0 %v2643_v38 }
0x1892   :  { %v2649_v59 = vpop.permute.xlu1 %2648  ;;  %v2697_v62 = vpop.permute.xlu0 %2696 }
0x1893   :  { %v2651_v3 = vsel %vm2487_vm2, %v2649_v59, 0.0  ;;  %v2699_v25 = vsel %vm2487_vm2, %v2697_v62, 0.0  ;;  %v2840_v62 = vld [vmem:[%s5074_s18 + $0x8] sm:$0xff] }
0x1894   :  { %2652 = vadd.xlane.f32.xlu0 %v2651_v3  ;;  %2700 = vadd.xlane.f32.xlu1 %v2699_v25  ;;  %v2842_v25 = vld [vmem:[%s5074_s18 + $0x18] sm:$0xff] }
0x1896   :  { %v2705_v14 = vpop.permute.xlu1 %2704  ;;  %v2571_v61 = vpop.permute.xlu0 %2570 }
0x1897   :  { %v2707_v27 = vsel %vm2487_vm2, %v2705_v14, 0.0  ;;  %v2573_v33 = vsel %vm2487_vm2, %v2571_v61, 0.0  ;;  %v2839_v14 = vld [vmem:[%s5074_s18] sm:$0xff]  ;;  %v2841_v61 = vld [vmem:[%s5074_s18 + $0x10] sm:$0xff] }
0x1898   :  { %2708 = vadd.xlane.f32.xlu0 %v2707_v27  ;;  %v3701_v27 = vpack.c.bf16 %v2842_v25, %v2840_v62  ;;  %v3024_v62 = vld [vmem:[%s5076_s20 + $0x48] sm:$0xff]  ;;  %v3041_v25 = vld [vmem:[%s5076_s20 + $0xd0] sm:$0xff] }
0x189a   :  { %v2587_v30 = vpop.permute.xlu1 %2586  ;;  %3702 = vmatprep.subr.bf16.mxu0 %v3701_v27 }
0x189b   :  { %v2589_v32 = vsel %vm2487_vm2, %v2587_v30, 0.0  ;;  %v2844_v30 = vld [vmem:[%s5074_s18 + $0x28] sm:$0xff] }
0x189c   :  { %2590 = vadd.xlane.f32.xlu1 %v2589_v32  ;;  %2574 = vadd.xlane.f32.xlu0 %v2573_v33  ;;  %v2846_v32 = vld [vmem:[%s5074_s18 + $0x38] sm:$0xff]  ;;  %v3703_v33 = vpack.c.bf16 %v2841_v61, %v2839_v14 }
0x189d   :  { %v2756_v24 = vpop.permute.xlu0 %2755  ;;  %v3042_v14 = vld [vmem:[%s5076_s20 + $0xd8] sm:$0xff] }
0x189e   :  { %v2758_v43 = vsel %vm2487_vm2, %v2756_v24, 0.0  ;;  %v2764_v37 = vpop.permute.xlu1 %2763  ;;  %v3705_v24 = vpack.c.bf16 %v2846_v32, %v2844_v30  ;;  %3704 = vmatpush1.bf16.msra.mxu0 %v3703_v33  ;;  %v3737_v61 = vpack.c.bf16 %v3042_v14, %v3041_v25  ;;  %v3025_v30 = vld [vmem:[%s5076_s20 + $0x50] sm:$0xff]  ;;  %v3026_v32 = vld [vmem:[%s5076_s20 + $0x58] sm:$0xff]  ;;  %v3043_v33 = vld [vmem:[%s5076_s20 + $0xe0] sm:$0xff] }
0x189f   :  { %v2766_v39 = vsel %vm2487_vm2, %v2764_v37, 0.0  ;;  %v2845_v37 = vld [vmem:[%s5074_s18 + $0x30] sm:$0xff] }
0x18a0   :  { %2759 = vadd.xlane.f32.xlu1 %v2758_v43  ;;  %2767 = vadd.xlane.f32.xlu0 %v2766_v39  ;;  %v2843_v43 = vld [vmem:[%s5074_s18 + $0x20] sm:$0xff]  ;;  %v2832_v39 = vld [vmem:[%s5073_s17 + $0x8] sm:$0xff] }
0x18a1   :  { %3706 = vmatprep.subr.bf16.mxu0 %v3705_v24  ;;  %v3044_v24 = vld [vmem:[%s5076_s20 + $0xe8] sm:$0xff] }
0x191d   :  { %v2645_v42 = vpop.xlane.xlu0 %2644 }
0x1921   :  { %v2653_v45 = vpop.xlane.xlu0 %2652  ;;  %v2701_v46 = vpop.xlane.xlu1 %2700 }
0x1922   :  { %v2654_v47 = vadd.f32 %v2653_v45, %v2645_v42  ;;  %v3707_v42 = vpack.c.bf16 %v2845_v37, %v2843_v43  ;;  %v3709_v45 = vpack.c.bf16 %v2834_v41, %v2832_v39  ;;  %v3739_v43 = vpack.c.bf16 %v3026_v32, %v3025_v30  ;;  %v2831_v39 = vld [vmem:[%s5073_s17] sm:$0xff]  ;;  %v2833_v41 = vld [vmem:[%s5073_s17 + $0x10] sm:$0xff] }
0x1923   :  { %v3741_v37 = vpack.c.bf16 %v3044_v24, %v3043_v33 }
0x1924   :  { %v2655_v12 = vadd.f32 %v3182_v1, %v2654_v47  ;;  %3708 = vmatpush1.bf16.msra.mxu0 %v3707_v42  ;;  %v2836_v42 = vld [vmem:[%s5073_s17 + $0x28] sm:$0xff] }
0x1925   :  { %v2709_v0 = vpop.xlane.xlu0 %2708  ;;  %3710 = vmatprep.subr.bf16.mxu0 %v3709_v45  ;;  %v2838_v45 = vld [vmem:[%s5073_s17 + $0x38] sm:$0xff] }
0x1926   :  { %v2710_v51 = vadd.f32 %v2709_v0, %v2701_v46 }
0x1928   :  { %v2711_v40 = vadd.f32 %v3182_v1, %v2710_v51 }
0x1929   :  { %v2591_v55 = vpop.xlane.xlu1 %2590  ;;  %v2575_v50 = vpop.xlane.xlu0 %2574 }
0x192a   :  { %v2592_v31 = vadd.f32 %v2591_v55, %v2575_v50 }
0x192c   :  { %v2599_v56 = vadd.f32 %v3182_v1, %v2592_v31 }
0x192d   :  { %v2760_v63 = vpop.xlane.xlu1 %2759  ;;  %v2768_v21 = vpop.xlane.xlu0 %2767 }
0x192e   :  { %v2771_v4 = vmax.f32 %v2599_v56, %v2655_v12  ;;  %v2769_v20 = vadd.f32 %v2768_v21, %v2760_v63  ;;  %v3031_v63 = vld [vmem:[%s5076_s20 + $0x80] sm:$0xff]  ;;  %v3032_v21 = vld [vmem:[%s5076_s20 + $0x88] sm:$0xff] }
0x1930   :  { %v2772_v29 = vmax.f32 %v2771_v4, %v2711_v40  ;;  %v2770_v17 = vadd.f32 %v3182_v1, %v2769_v20  ;;  %v3033_v4 = vld [vmem:[%s5076_s20 + $0x90] sm:$0xff]  ;;  %v3034_v20 = vld [vmem:[%s5076_s20 + $0x98] sm:$0xff] }
0x1932   :  { %v2773_v60 = vmax.f32 %v2772_v29, %v2770_v17 }
0x1934   :  { %v2774_v2 = vsub.f32 %v2599_v56, %v2773_v60  ;;  %v2777_v7 = vsub.f32 %v2655_v12, %v2773_v60  ;;  %v2780_v10 = vsub.f32 %v2711_v40, %v2773_v60  ;;  %v2783_v11 = vsub.f32 %v2770_v17, %v2773_v60  ;;  %v3016_v40 = vld [vmem:[%s5076_s20 + $0x8] sm:$0xff]  ;;  %v3035_v60 = vld [vmem:[%s5076_s20 + $0xa0] sm:$0xff] }
0x1935   :  { %v3721_v17 = vpack.c.bf16 %v3034_v20, %v3033_v4 }
0x1936   :  { %v2775_v8 = vmul.f32 1.442695, %v2774_v2  ;;  %v2778_v18 = vmul.f32 1.442695, %v2777_v7  ;;  %v2781_v44 = vmul.f32 1.442695, %v2780_v10 }
0x1937   :  { %v2784_v13 = vmul.f32 1.442695, %v2783_v11  ;;  %v3036_v11 = vld [vmem:[%s5076_s20 + $0xa8] sm:$0xff] }
0x1938   :  { %3905 = vpow2.f32 %v2775_v8 }
0x1939   :  { %3907 = vpow2.f32 %v2778_v18 }
0x193a   :  { %3909 = vpow2.f32 %v2781_v44  ;;  %v3725_v44 = vpack.c.bf16 %v3036_v11, %v3035_v60 }
0x193b   :  { %3911 = vpow2.f32 %v2784_v13  ;;  %v3019_v13 = vld [vmem:[%s5076_s20 + $0x20] sm:$0xff] }
0x1942   :  { %v3906_v15 = vpop.eup %3905 }
0x1943   :  { %v3908_v16 = vpop.eup %3907 }
0x1944   :  { %v2786_v19 = vadd.f32 %v3908_v16, %v3906_v15  ;;  %v3910_v35 = vpop.eup %3909 }
0x1945   :  { %v3912_v26 = vpop.eup %3911 }
0x1946   :  { %v2787_v36 = vadd.f32 %v3910_v35, %v2786_v19 }
0x1948   :  { %v2788_v54 = vadd.f32 %v3912_v26, %v2787_v36 }
0x194a   :  { %3913 = vrcp.f32 %v2788_v54  ;;  %v3022_v54 = vld [vmem:[%s5076_s20 + $0x38] sm:$0xff] }
0x1954   :  { %v3914_v53 = vpop.eup %3913 }
0x1955   :  { %v2801_v52 = vmul.f32 %v3914_v53, %v3908_v16  ;;  %v2791_v38 = vmul.f32 %v3914_v53, %v3906_v15  ;;  %v2811_v59 = vmul.f32 %v3914_v53, %v3910_v35  ;;  %v2821_v3 = vmul.f32 %v3914_v53, %v3912_v26  ;;  %v3037_v15 = vld [vmem:[%s5076_s20 + $0xb0] sm:$0xff]  ;;  %v3038_v16 = vld [vmem:[%s5076_s20 + $0xb8] sm:$0xff]  ;;  %v3039_v53 = vld [vmem:[%s5076_s20 + $0xc0] sm:$0xff] }
0x1956   :  { %v3729_v36 = vpack.c.bf16 %v3038_v16, %v3037_v15  ;;  %v3021_v26 = vld [vmem:[%s5076_s20 + $0x30] sm:$0xff] }
0x1957   :  { %2804 = vperm.xlu0 %3768, %v2801_v52   ;;  %2794 = vperm.xlu1 %3767, %v2791_v38   ;;  %v3040_v52 = vld [vmem:[%s5076_s20 + $0xc8] sm:$0xff]  ;;  %v3731_v38 = vpack.c.bf16 %v3022_v54, %v3021_v26 }
0x195b   :  { %2814 = vperm.xlu1 %3767, %v2811_v59   ;;  %v3733_v59 = vpack.c.bf16 %v3040_v52, %v3039_v53 }
0x195f   :  { %2824 = vperm.xlu1 %3767, %v2821_v3   ;;  %v3023_v3 = vld [vmem:[%s5076_s20 + $0x40] sm:$0xff] }
0x1960   :  { %v3735_v27 = vpack.c.bf16 %v3024_v62, %v3023_v3 }
0x19d6   :  { %v2805_v46 = vpop.permute.xlu0 %2804  ;;  %v2795_v0 = vpop.permute.xlu1 %2794 }
0x19d7   :  { %v2809_v47 = vmul.f32 %v2805_v46, %v4839_v5  ;;  %v2799_v55 = vmul.f32 %v2795_v0, %v4857_v22  ;;  %v2807_v51 = vmul.f32 %v2805_v46, %v4834_v23  ;;  %v2797_v31 = vmul.f32 %v2795_v0, %v4850_v34  ;;  %v3015_v5 = vld [vmem:[%s5076_s20] sm:$0xff] }
0x19d8   :  { %v3717_v34 = vpack.c.bf16 %v3032_v21, %v3031_v63  ;;  %v3719_v29 = vpack.c.bf16 %v3016_v40, %v3015_v5  ;;  %v3711_v46 = vpack.c.bf16 %v2833_v41, %v2831_v39  ;;  %v3713_v0 = vpack.c.bf16 %v2838_v45, %v2836_v42  ;;  %v3045_v63 = vld [vmem:[%s5076_s20 + $0xf0] sm:$0xff] }
0x19d9   :  { %v2810_v12 = vadd.f32 %v2809_v47, %v2799_v55  ;;  %v2808_v2 = vadd.f32 %v2807_v51, %v2797_v31  ;;  %v2835_v47 = vld [vmem:[%s5073_s17 + $0x20] sm:$0xff]  ;;  %v2837_v55 = vld [vmem:[%s5073_s17 + $0x30] sm:$0xff] }
0x19da   :  { %v2815_v1 = vpop.permute.xlu1 %2814  ;;  %3718 = vmatprep.subr.bf16.mxu1 %v3717_v34  ;;  %v3027_v31 = vld [vmem:[%s5076_s20 + $0x60] sm:$0xff]  ;;  %v3029_v5 = vld [vmem:[%s5076_s20 + $0x70] sm:$0xff] }
0x19db   :  { %v2819_v50 = vmul.f32 %v2815_v1, %v4847_v49  ;;  %v2817_v49 = vmul.f32 %v2815_v1, %v4841_v6  ;;  %v3017_v6 = vld [vmem:[%s5076_s20 + $0x10] sm:$0xff]  ;;  %3720 = vmatpush3.bf16.msra.mxu1 %v3719_v29 }
0x19dc   :  { %3722 = vmatprep.subr.bf16.mxu1 %v3721_v17 }
0x19dd   :  { %v2820_v22 = vadd.f32 %v2819_v50, %v2810_v12  ;;  %v2818_v18 = vadd.f32 %v2817_v49, %v2808_v2  ;;  %v3715_v50 = vpack.c.bf16 %v2837_v55, %v2835_v47  ;;  %v3028_v12 = vld [vmem:[%s5076_s20 + $0x68] sm:$0xff]  ;;  %v3030_v49 = vld [vmem:[%s5076_s20 + $0x78] sm:$0xff]  ;;  %v3185_v2 = vld [vmem:[%s5077_s21] ss:$0 sm:$0xff] }
0x19de   :  { %v2825_v56 = vpop.permute.xlu1 %2824 }
0x19df   :  { %v2829_v23 = vmul.f32 %v2825_v56, %v4864_v48  ;;  %v3018_v48 = vld [vmem:[%s5076_s20 + $0x18] sm:$0xff]  ;;  %v2827_v7 = vmul.f32 %v2825_v56, %v4862_v28  ;;  %v3020_v28 = vld [vmem:[%s5076_s20 + $0x28] sm:$0xff]  ;;  %v3743_v56 = vpack.c.bf16 %v3028_v12, %v3027_v31 }
0x19e0   :  { %v3723_v8 = vpack.c.bf16 %v3018_v48, %v3017_v6  ;;  %v3727_v35 = vpack.c.bf16 %v3020_v28, %v3019_v13 }
0x19e1   :  { %v2830_v10 = vadd.f32 %v2829_v23, %v2820_v22  ;;  %v2828_v19 = vadd.f32 %v2827_v7, %v2818_v18  ;;  %v3747_v22 = vpack.c.bf16 %v3030_v49, %v3029_v5  ;;  %v2999_v23 = vld [vmem:[%s5075_s19] sm:$0x3]  ;;  %s3132_s19 = sshll.u32 %s3946_s8, 4  ;;  %s3133_s19 = int_to_ptr.vmem [resolvable:$true] %s3132_s19 }
0x19e2   :  { %3724 = vmatpush3.bf16.msra.mxu1 %v3723_v8  ;;  %v3004_v34 = vrot.slane %v2999_v23, %v4317_v57  ;;  %v3008_v40 = vrot.slane %v2999_v23, %v4319_v58  ;;  %s3915_s26 = scalar_lea.vmem %s3133_s19, 32  ;;  %p3920_p1 = scmp.lt.s32.totalorder %s3133_s19, %s3133_s19 }
0x19e3   :  { %2848 = vrot.lane.b32.xlu1 %v2830_v10, %s3943_s16  ;;  %3726 = vmatprep.subr.bf16.mxu1 %v3725_v44  ;;  %p3916_p0 = scmp.ne.s32.totalorder %s3133_s19, %s3915_s26  ;;  %p3921_p2 = scmp.lt.s32.totalorder %s3915_s26, %s3915_s26 }
0x19e5   :  { %p3922_p3 = por %p3921_p2, %p3920_p1 }
0x19e6   :  { %3728 = vmatpush3.bf16.msra.mxu1 %v3727_v35 }
0x19e7   :  { %2924 = vrot.lane.b32.xlu1 %v2828_v19, %s3943_s16  ;;  %3730 = vmatprep.subr.bf16.mxu1 %v3729_v36  ;;  %p3923_p4 = pnand %p3922_p3, %p3916_p0 }
0x19ea   :  { %3732 = vmatpush3.bf16.msra.mxu1 %v3731_v38 }
0x19eb   :  { %3734 = vmatprep.subr.bf16.mxu1 %v3733_v59 }
0x19ee   :  { %3736 = vmatpush3.bf16.msra.mxu1 %v3735_v27 }
0x19ef   :  { %3738 = vmatprep.subr.bf16.mxu1 %v3737_v61 }
0x19f2   :  { %3740 = vmatpush3.bf16.msra.mxu1 %v3739_v43 }
0x19f3   :  { %3742 = vmatprep.subr.bf16.mxu1 %v3741_v37 }
0x19f6   :  { %3744 = vmatpush3.bf16.msra.mxu1 %v3743_v56 }
0x1a55   :  { %v2849_v1 = vpop.permute.xlu1 %2848 }
0x1a56   :  { %3183 = vmatmul.mubr.msk.f32.vlgmr.msra.gmra.mrb[16].mxu0 %vm256_vm1, %v2849_v1 }
0x1a57   :  { %3712 = vmatpush1.bf16.msra.mxu0 %v3711_v46  ;;  %2992 = vmatprep.mubr.f32.mxu0 %v3941_v9  ;;  %v3046_v9 = vld [vmem:[%s5076_s20 + $0xf8] sm:$0xff] }
0x1a58   :  { %3714 = vmatprep.subr.bf16.mxu0 %v3713_v0  ;;  %v3745_v21 = vpack.c.bf16 %v3046_v9, %v3045_v63 }
0x1a59   :  { %v2925_v51 = vpop.permute.xlu1 %2924 }
0x1a5a   :  { %3746 = vmatprep.subr.bf16.mxu1 %v3745_v21 }
0x1a5b   :  { %3716 = vmatpush1.bf16.msra.mxu0 %v3715_v50  ;;  %3748 = vmatpush3.bf16.msra.mxu1 %v3747_v22 }
0x1a5e   :  { %3184 = vmatmul.mubr.msk.f32.vlgmr.msra.gmra.mrb[16].mxu0 %vm256_vm1, %v2925_v51 }
0x1b31   :  { %v2994_v4 = vpop.f32.mrb[16].mxu0 }
0x1b32   :  { %v3011_v20 = vadd.f32 %v3004_v34, %v2994_v4  ;;  %v2996_v29 = vpop.f32.mrb[17].mxu0 }
0x1b33   :  { %v3012_v17 = vadd.f32 %v3008_v40, %v2996_v29 }
0x1b34   :  { %v3013_v48 = vmax.f32 %v3011_v20, 0.0 }
0x1b35   :  { %v3014_v6 = vmax.f32 %v3012_v17, 0.0 }
0x1b37   :  { %3118 = vmatprep.mubr.f32.mxu1 %v3014_v6 }
0x1b38   :  { %3119 = vmatmul.mubr.f32.vlgmr.msra.gmra.mrb[26].mxu1 %v3013_v48 }
0x1c0b   :  { %v3298_v60 = vpop.f32.mrb[26].mxu1 }
0x1c0c   :  { %v3299_v7 = vpop.f32.mrb[27].mxu1 }
0x1c0d   :  { %v3300_v10 = vadd.f32 %v3299_v7, %v3298_v60 }
0x1c0f   :  { %v3121_v57 = vadd.f32 %v3300_v10, %v3185_v2 }
0x1c11   :  { %3125 = vst.msk [vmem:[#allocation3] sm:$0x3] %vm3124_vm3, %v3121_v57 }
0x1c12   :  { %3926 = shalt.err (!%p3923_p4)
}
0x1c13   :  { %s3927_s11 = scalar_lea.hbm %s5078_s22, 32 }
0x1c14   :  { %p3928_p5 = scmp.ne.s32.totalorder %s5078_s22, %s3927_s11  ;;  %p3931_p6 = scmp.lt.u32.totalorder %s3927_s11, %s5078_s22 }
0x1c16   :  { %p3933_p7 = pnand %p3931_p6, %p3928_p5 }
0x1c18   :  { %3936 = shalt.err (!%p3933_p7)
}
0x1c19   :  { %3135 = dma.vmem_to_hbm [thread:$0]  %s3133_s19, 32, %s5078_s22, [#allocation4]  }
0x1c1a   :  { %3937 = dma.done.wait [#allocation4], 32  }
0x1c1b   :  { %3938 = vsyncadd [#allocation4], 4294967264 }
0x1c1c   :  { %3139 = vsyncpa [#allocation4], 1 }

</bundles_post_ra>
